<compile_context>
chip_gen: v6e
topology: v6e:2x2x1
jax: 0.10.0
libtpu: 0.0.40
codegen_flags: <defaults>
</compile_context>

<pallas_src>
import functools
import math

import jax
import jax.numpy as jnp
from jax import lax
from jax.experimental import pallas as pl
from jax.experimental.pallas import tpu as pltpu


# slots per layer: w_in, b_in, w_out, b_out, w1, b1, w2T, b2, ln1_w, ln1_b, ln2_w, ln2_b
_PER_LAYER = 12
_W1_IDX, _W2T_IDX = 4, 6  # the two big FFN weights (prefetched for layers >= 1)


def _layernorm(y, g, b):
    # PyTorch LayerNorm: biased variance, eps=1e-5, f32 math
    mean = jnp.mean(y, axis=-1, keepdims=True)
    yc = y - mean
    var = jnp.mean(yc * yc, axis=-1, keepdims=True)
    return yc * lax.rsqrt(var + 1e-5) * g + b


def _ffn(x, w1_ref, b1_ref, w2t_ref, b2, *, ff, ff_chunk):
    """ReLU FFN with the hidden dim split into ff_chunk-wide pieces.

    w1_ref:  (D, FF)  bf16   (x @ w1_chunk)
    w2t_ref: (D, FF)  bf16   lane-dense; used via NT dot_general (h @ w2_chunk^T)
    b1_ref:  (1, FF)  f32
    b2:      (1, D)   f32
    """
    x_bf = x.astype(jnp.bfloat16)
    n_chunks = ff // ff_chunk

    def body(c, acc):
        c0 = pl.multiple_of(c * ff_chunk, ff_chunk)
        w1_c = w1_ref[:, pl.ds(c0, ff_chunk)]                      # (D, chunk) bf16
        b1_c = b1_ref[:, pl.ds(c0, ff_chunk)]                      # (1, chunk) f32
        h = jnp.dot(x_bf, w1_c, preferred_element_type=jnp.float32) + b1_c
        h = jnp.maximum(h, 0.0).astype(jnp.bfloat16)               # (BT, chunk)
        w2t_c = w2t_ref[:, pl.ds(c0, ff_chunk)]                    # (D, chunk) bf16
        # h @ w2t_c.T -> (BT, D); NT matmul keeps w2 lane-dense in HBM/VMEM
        return acc + lax.dot_general(
            h, w2t_c, (((1,), (1,)), ((), ())),
            preferred_element_type=jnp.float32)

    acc0 = jnp.zeros((x.shape[0], x.shape[1]), jnp.float32)
    acc = lax.fori_loop(0, n_chunks, body, acc0, unroll=True)
    return acc + b2


def _fused_gpt_kernel(*refs, num_layers, nhead, T, B, D, ff, ff_chunk):
    """refs = (x, pe, <12 weight refs per layer>..., out, <prefetch scratch>)."""
    n_w = _PER_LAYER * num_layers
    x_ref, pe_ref = refs[0], refs[1]
    w_refs = refs[2:2 + n_w]
    o_ref = refs[2 + n_w]
    scratch = refs[3 + n_w:]

    n_pf = num_layers - 1  # layers whose FFN weights are manually prefetched
    if n_pf > 0:
        w1_bufs = scratch[0:n_pf]
        w2_bufs = scratch[n_pf:2 * n_pf]
        sem = scratch[2 * n_pf]

    hd = D // nhead

    def layer_refs(l):
        return w_refs[_PER_LAYER * l:_PER_LAYER * (l + 1)]

    # ---- kick off layer>=1 FFN-weight DMAs so they overlap layer-0 compute ----
    for l in range(1, num_layers):
        lw = layer_refs(l)
        i = l - 1
        pltpu.make_async_copy(lw[_W1_IDX], w1_bufs[i], sem.at[i, 0]).start()
        pltpu.make_async_copy(lw[_W2T_IDX], w2_bufs[i], sem.at[i, 1]).start()

    # fused positional-encoding add (dropout is identity in eval mode)
    x = x_ref[...] + pe_ref[...]                                   # (B*T, D) f32

    for l in range(num_layers):
        (w_in_r, b_in_r, w_out_r, b_out_r, w1_r, b1_r, w2t_r, b2_r,
         g1_r, be1_r, g2_r, be2_r) = layer_refs(l)

        # ---------------- self-attention ---------------- #
        # NOTE: 1/sqrt(hd) is already folded into the Q columns of w_in/b_in.
        qkv = (jnp.dot(x.astype(jnp.bfloat16), w_in_r[...],
                       preferred_element_type=jnp.float32)
               + b_in_r[...])                                      # (B*T, 3D) f32

        batch_out = []
        for b in range(B):
            rows = slice(b * T, (b + 1) * T)
            q_blk = qkv[rows, 0:D]                                 # lane-aligned
            k_blk = qkv[rows, D:2 * D]
            v_blk = qkv[rows, 2 * D:3 * D]
            head_out = []
            for h in range(nhead):
                cols = slice(h * hd, (h + 1) * hd)
                q = q_blk[:, cols]                                 # (T, hd)
                k = k_blk[:, cols]
                v = v_blk[:, cols]
                s = lax.dot_general(q, k, (((1,), (1,)), ((), ())),
                                    preferred_element_type=jnp.float32)  # (T, T)
                s = s - jnp.max(s, axis=-1, keepdims=True)
                p = jnp.exp(s)
                p = p * pl.reciprocal(jnp.sum(p, axis=-1, keepdims=True),
                                      approx=True)
                head_out.append(jnp.dot(p, v,
                                        preferred_element_type=jnp.float32))
            batch_out.append(jnp.concatenate(head_out, axis=-1))   # (T, D)
        attn = jnp.concatenate(batch_out, axis=0)                  # (B*T, D)

        # out_proj + residual + LayerNorm1 (post-norm)
        y = (jnp.dot(attn.astype(jnp.bfloat16), w_out_r[...],
                     preferred_element_type=jnp.float32)
             + b_out_r[...] + x)
        x = _layernorm(y, g1_r[...], be1_r[...])

        # ---------------- FFN (ReLU) + residual + LayerNorm2 ---------------- #
        if l == 0:
            w1_src, w2t_src = w1_r, w2t_r
        else:
            i = l - 1
            pltpu.make_async_copy(w1_r, w1_bufs[i], sem.at[i, 0]).wait()
            pltpu.make_async_copy(w2t_r, w2_bufs[i], sem.at[i, 1]).wait()
            w1_src, w2t_src = w1_bufs[i], w2_bufs[i]

        y = _ffn(x, w1_src, b1_r, w2t_src, b2_r[...],
                 ff=ff, ff_chunk=ff_chunk) + x
        x = _layernorm(y, g2_r[...], be2_r[...])

    o_ref[...] = x


def _full_spec(shape):
    n = len(shape)
    return pl.BlockSpec(shape, lambda i, _n=n: (0,) * _n)


# ----------------------------- params / glue -------------------------------- #

def make_positional_encoding(max_len, d_model):
    position = jnp.arange(max_len, dtype=jnp.float32)[:, None]
    div_term = jnp.exp(
        jnp.arange(0, d_model, 2, dtype=jnp.float32)
        * (-math.log(10000.0) / d_model))
    pe = jnp.zeros((max_len, d_model), jnp.float32)
    pe = pe.at[:, 0::2].set(jnp.sin(position * div_term))
    pe = pe.at[:, 1::2].set(jnp.cos(position * div_term))
    return pe[:, None, :]  # (max_len, 1, d_model)


def init_params(key, d_model, nhead, num_layers, dim_ff, max_len):
    """f32 master params, PyTorch-equivalent layout (stored transposed for x@W)."""
    pe = make_positional_encoding(max_len + 1, d_model)
    layers = []
    for l in range(num_layers):
        k = jax.random.fold_in(key, l)
        k1, k2, k3, k4 = jax.random.split(k, 4)
        w_in = 0.02 * jax.random.normal(k1, (3 * d_model, d_model), jnp.float32)
        w_out = 0.02 * jax.random.normal(k2, (d_model, d_model), jnp.float32)
        w1 = 0.02 * jax.random.normal(k3, (dim_ff, d_model), jnp.float32)
        w2 = 0.02 * jax.random.normal(k4, (d_model, dim_ff), jnp.float32)
        layers.append(dict(
            w_in=w_in.T, b_in=jnp.zeros((1, 3 * d_model), jnp.float32),
            w_out=w_out.T, b_out=jnp.zeros((1, d_model), jnp.float32),
            w1=w1.T, b1=jnp.zeros((1, dim_ff), jnp.float32),
            w2=w2.T, b2=jnp.zeros((1, d_model), jnp.float32),
            ln1_w=jnp.ones((1, d_model), jnp.float32),
            ln1_b=jnp.zeros((1, d_model), jnp.float32),
            ln2_w=jnp.ones((1, d_model), jnp.float32),
            ln2_b=jnp.zeros((1, d_model), jnp.float32),
        ))
    return dict(pe=pe, layers=layers)


def prepare_inference_params(params, *, nhead, T, B, max_len, special_pe=False):
    """Host-side, ONCE per (T, B, special_pe):
       - prebuild the (B*T, D) positional-encoding slab (incl. special_pe),
       - fold 1/sqrt(head_dim) into the Q columns of w_in / b_in,
       - cast matmul weights to bf16; keep w2 transposed as lane-dense (D, FF)."""
    pe = params["pe"]                                   # (max_len+1, 1, D)
    D = pe.shape[-1]
    hd = D // nhead
    scale = 1.0 / math.sqrt(hd)

    if special_pe:
        # X[:-1] += pe[:T-1]; X[-1] += pe[max_len-1]
        pe_slab = jnp.concatenate([pe[:T - 1], pe[max_len - 1:max_len]], axis=0)
    else:
        pe_slab = pe[:T]
    pe_bt = jnp.broadcast_to(pe_slab.transpose(1, 0, 2),
                             (B, T, D)).reshape(B * T, D).astype(jnp.float32)

    flat_w = []
    for lp in params["layers"]:
        w_in = lp["w_in"].at[:, :D].multiply(scale)     # fold softmax scale (Q cols)
        b_in = lp["b_in"].at[:, :D].multiply(scale)
        flat_w += [
            w_in.astype(jnp.bfloat16), b_in,
            lp["w_out"].astype(jnp.bfloat16), lp["b_out"],
            lp["w1"].astype(jnp.bfloat16), lp["b1"],            # (D, FF) bf16
            lp["w2"].T.astype(jnp.bfloat16), lp["b2"],          # (D, FF) bf16 (lane-dense)
            lp["ln1_w"], lp["ln1_b"], lp["ln2_w"], lp["ln2_b"],
        ]
    return dict(pe_bt=pe_bt, flat_w=tuple(flat_w))


@functools.partial(jax.jit, static_argnames=("nhead", "dim_ff", "ff_chunk"))
def gpt_idm_forward(X, pe_bt, flat_w, *, nhead, dim_ff, ff_chunk=512):
    """Forward of GPT_IDM in eval mode (all dropouts identity). X: (T, B, D)."""
    # TODO(synk): attn_mask / key_padding_mask path of nn.TransformerEncoder is
    # not implemented (mask is always None here).
    T, B, D = X.shape
    num_layers = len(flat_w) // _PER_LAYER
    ff_chunk = min(ff_chunk, dim_ff)
    assert dim_ff % ff_chunk == 0

    # Batch-major (B*T, D) token layout: every per-(batch, head) attention tile
    # is a contiguous static slice inside the kernel.
    x_bt = X.astype(jnp.float32).transpose(1, 0, 2).reshape(B * T, D)

    kern = functools.partial(
        _fused_gpt_kernel, num_layers=num_layers, nhead=nhead,
        T=T, B=B, D=D, ff=dim_ff, ff_chunk=ff_chunk)

    inputs = (x_bt, pe_bt, *flat_w)
    in_specs = [_full_spec(x_bt.shape), _full_spec(pe_bt.shape)]
    for l in range(num_layers):
        lw = flat_w[_PER_LAYER * l:_PER_LAYER * (l + 1)]
        for j, a in enumerate(lw):
            if l >= 1 and j in (_W1_IDX, _W2T_IDX):
                # later layers' big FFN weights: raw HBM ref, manually prefetched
                in_specs.append(pl.BlockSpec(memory_space=pl.ANY))
            else:
                in_specs.append(_full_spec(a.shape))

    n_pf = num_layers - 1
    scratch_shapes = []
    if n_pf > 0:
        scratch_shapes += [pltpu.VMEM((D, dim_ff), jnp.bfloat16)
                           for _ in range(2 * n_pf)]
        scratch_shapes.append(pltpu.SemaphoreType.DMA((n_pf, 2)))

    out = pl.pallas_call(
        kern,
        out_shape=jax.ShapeDtypeStruct((B * T, D), jnp.float32),
        grid=(1,),
        in_specs=in_specs,
        out_specs=_full_spec((B * T, D)),
        scratch_shapes=scratch_shapes,
    )(*inputs)

    return out.reshape(B, T, D).transpose(1, 0, 2)


# ---------------------------------- main ------------------------------------ #

if __name__ == "__main__":
    # args: d_model=32, nhead=4, layers=2, dropout=0.1, max_len=16
    T, B = 8, 2
    d_model, nhead, num_layers, max_len = 32, 4, 2, 16
    dim_ff = 2048  # nn.TransformerEncoderLayer default dim_feedforward

    pkey, xkey = jax.random.split(jax.random.PRNGKey(0))
    params = init_params(pkey, d_model, nhead, num_layers, dim_ff, max_len)
    prepared = prepare_inference_params(params, nhead=nhead, T=T, B=B,
                                        max_len=max_len, special_pe=False)
    X = jax.random.normal(xkey, (T, B, d_model), jnp.float32)

    out = gpt_idm_forward(X, prepared["pe_bt"], prepared["flat_w"],
                          nhead=nhead, dim_ff=dim_ff, ff_chunk=512)
    jax.block_until_ready(out)
    assert out.shape == (T, B, d_model)
    assert bool(jnp.all(jnp.isfinite(out)))
    print("KERNEL_OK")
</pallas_src>

<mosaic_0001>
module attributes {stable_mosaic.version = 11 : i64} {
  func.func @_fused_gpt_kernel(%arg0: i32, %arg1: memref<16x32xf32, #tpu.memory_space<vmem>>, %arg2: memref<16x32xf32, #tpu.memory_space<vmem>>, %arg3: memref<32x96xbf16, #tpu.memory_space<vmem>>, %arg4: memref<1x96xf32, #tpu.memory_space<vmem>>, %arg5: memref<32x32xbf16, #tpu.memory_space<vmem>>, %arg6: memref<1x32xf32, #tpu.memory_space<vmem>>, %arg7: memref<32x2048xbf16, #tpu.memory_space<vmem>>, %arg8: memref<1x2048xf32, #tpu.memory_space<vmem>>, %arg9: memref<32x2048xbf16, #tpu.memory_space<vmem>>, %arg10: memref<1x32xf32, #tpu.memory_space<vmem>>, %arg11: memref<1x32xf32, #tpu.memory_space<vmem>>, %arg12: memref<1x32xf32, #tpu.memory_space<vmem>>, %arg13: memref<1x32xf32, #tpu.memory_space<vmem>>, %arg14: memref<1x32xf32, #tpu.memory_space<vmem>>, %arg15: memref<32x96xbf16, #tpu.memory_space<vmem>>, %arg16: memref<1x96xf32, #tpu.memory_space<vmem>>, %arg17: memref<32x32xbf16, #tpu.memory_space<vmem>>, %arg18: memref<1x32xf32, #tpu.memory_space<vmem>>, %arg19: memref<32x2048xbf16, #tpu.memory_space<any>>, %arg20: memref<1x2048xf32, #tpu.memory_space<vmem>>, %arg21: memref<32x2048xbf16, #tpu.memory_space<any>>, %arg22: memref<1x32xf32, #tpu.memory_space<vmem>>, %arg23: memref<1x32xf32, #tpu.memory_space<vmem>>, %arg24: memref<1x32xf32, #tpu.memory_space<vmem>>, %arg25: memref<1x32xf32, #tpu.memory_space<vmem>>, %arg26: memref<1x32xf32, #tpu.memory_space<vmem>>, %arg27: memref<16x32xf32, #tpu.memory_space<vmem>>, %arg28: memref<32x2048xbf16, #tpu.memory_space<vmem>>, %arg29: memref<32x2048xbf16, #tpu.memory_space<vmem>>, %arg30: memref<1x2x!tpu.dma_semaphore, #tpu.memory_space<semaphore_mem>>) attributes {dimension_semantics = [#tpu.dimension_semantics<arbitrary>], iteration_bounds = array<i64: 1>, scalar_prefetch = 0 : i64, scratch_operands = 3 : i64, tpu.core_type = #tpu.core_type<tc>, window_params = [{pipeline_mode = #tpu.pipeline_mode<synchronous>, transform_indices = @transform_0, window_bounds = array<i64: 16, 32>}, {pipeline_mode = #tpu.pipeline_mode<synchronous>, transform_indices = @transform_1, window_bounds = array<i64: 16, 32>}, {pipeline_mode = #tpu.pipeline_mode<synchronous>, transform_indices = @transform_2, window_bounds = array<i64: 32, 96>}, {pipeline_mode = #tpu.pipeline_mode<synchronous>, transform_indices = @transform_3, window_bounds = array<i64: 1, 96>}, {pipeline_mode = #tpu.pipeline_mode<synchronous>, transform_indices = @transform_4, window_bounds = array<i64: 32, 32>}, {pipeline_mode = #tpu.pipeline_mode<synchronous>, transform_indices = @transform_5, window_bounds = array<i64: 1, 32>}, {pipeline_mode = #tpu.pipeline_mode<synchronous>, transform_indices = @transform_6, window_bounds = array<i64: 32, 2048>}, {pipeline_mode = #tpu.pipeline_mode<synchronous>, transform_indices = @transform_7, window_bounds = array<i64: 1, 2048>}, {pipeline_mode = #tpu.pipeline_mode<synchronous>, transform_indices = @transform_8, window_bounds = array<i64: 32, 2048>}, {pipeline_mode = #tpu.pipeline_mode<synchronous>, transform_indices = @transform_9, window_bounds = array<i64: 1, 32>}, {pipeline_mode = #tpu.pipeline_mode<synchronous>, transform_indices = @transform_10, window_bounds = array<i64: 1, 32>}, {pipeline_mode = #tpu.pipeline_mode<synchronous>, transform_indices = @transform_11, window_bounds = array<i64: 1, 32>}, {pipeline_mode = #tpu.pipeline_mode<synchronous>, transform_indices = @transform_12, window_bounds = array<i64: 1, 32>}, {pipeline_mode = #tpu.pipeline_mode<synchronous>, transform_indices = @transform_13, window_bounds = array<i64: 1, 32>}, {pipeline_mode = #tpu.pipeline_mode<synchronous>, transform_indices = @transform_14, window_bounds = array<i64: 32, 96>}, {pipeline_mode = #tpu.pipeline_mode<synchronous>, transform_indices = @transform_15, window_bounds = array<i64: 1, 96>}, {pipeline_mode = #tpu.pipeline_mode<synchronous>, transform_indices = @transform_16, window_bounds = array<i64: 32, 32>}, {pipeline_mode = #tpu.pipeline_mode<synchronous>, transform_indices = @transform_17, window_bounds = array<i64: 1, 32>}, {}, {pipeline_mode = #tpu.pipeline_mode<synchronous>, transform_indices = @transform_19, window_bounds = array<i64: 1, 2048>}, {}, {pipeline_mode = #tpu.pipeline_mode<synchronous>, transform_indices = @transform_21, window_bounds = array<i64: 1, 32>}, {pipeline_mode = #tpu.pipeline_mode<synchronous>, transform_indices = @transform_22, window_bounds = array<i64: 1, 32>}, {pipeline_mode = #tpu.pipeline_mode<synchronous>, transform_indices = @transform_23, window_bounds = array<i64: 1, 32>}, {pipeline_mode = #tpu.pipeline_mode<synchronous>, transform_indices = @transform_24, window_bounds = array<i64: 1, 32>}, {pipeline_mode = #tpu.pipeline_mode<synchronous>, transform_indices = @transform_25, window_bounds = array<i64: 1, 32>}, {pipeline_mode = #tpu.pipeline_mode<synchronous>, transform_indices = @transform_26, window_bounds = array<i64: 16, 32>}]} {
    %c0_i32 = arith.constant 0 : i32
    %c0_i32_0 = arith.constant 0 : i32
    %0 = tpu.memref_slice %arg30[%c0_i32, %c0_i32_0] : memref<1x2x!tpu.dma_semaphore, #tpu.memory_space<semaphore_mem>> -> memref<1x1x!tpu.dma_semaphore, #tpu.memory_space<semaphore_mem>>
    %1 = tpu.memref_squeeze %0 : memref<1x1x!tpu.dma_semaphore, #tpu.memory_space<semaphore_mem>> -> memref<!tpu.dma_semaphore, #tpu.memory_space<semaphore_mem>>
    tpu.enqueue_dma source(%arg19 : memref<32x2048xbf16, #tpu.memory_space<any>>) target(%arg28 : memref<32x2048xbf16, #tpu.memory_space<vmem>>) target_semaphore(%1 : memref<!tpu.dma_semaphore, #tpu.memory_space<semaphore_mem>>)
    %c0_i32_1 = arith.constant 0 : i32
    %c1_i32 = arith.constant 1 : i32
    %2 = tpu.memref_slice %arg30[%c0_i32_1, %c1_i32] : memref<1x2x!tpu.dma_semaphore, #tpu.memory_space<semaphore_mem>> -> memref<1x1x!tpu.dma_semaphore, #tpu.memory_space<semaphore_mem>>
    %3 = tpu.memref_squeeze %2 : memref<1x1x!tpu.dma_semaphore, #tpu.memory_space<semaphore_mem>> -> memref<!tpu.dma_semaphore, #tpu.memory_space<semaphore_mem>>
    tpu.enqueue_dma source(%arg21 : memref<32x2048xbf16, #tpu.memory_space<any>>) target(%arg29 : memref<32x2048xbf16, #tpu.memory_space<vmem>>) target_semaphore(%3 : memref<!tpu.dma_semaphore, #tpu.memory_space<semaphore_mem>>)
    %c0 = arith.constant 0 : index
    %c0_2 = arith.constant 0 : index
    %4 = vector.load %arg1[%c0, %c0_2] : memref<16x32xf32, #tpu.memory_space<vmem>>, vector<16x32xf32>
    %c0_3 = arith.constant 0 : index
    %c0_4 = arith.constant 0 : index
    %5 = vector.load %arg2[%c0_3, %c0_4] : memref<16x32xf32, #tpu.memory_space<vmem>>, vector<16x32xf32>
    %6 = arith.addf %4, %5 : vector<16x32xf32>
    %7 = arith.truncf %6 : vector<16x32xf32> to vector<16x32xbf16>
    %c0_5 = arith.constant 0 : index
    %c0_6 = arith.constant 0 : index
    %8 = vector.load %arg3[%c0_5, %c0_6] : memref<32x96xbf16, #tpu.memory_space<vmem>>, vector<32x96xbf16>
    %cst = arith.constant dense<0.000000e+00> : vector<16x96xf32>
    %9 = tpu.matmul %7, %8, %cst {dimension_numbers = #tpu.dot_dimension_numbers<[1], [0], [0], [1], [0, 0, 1, 1], [], []>} : vector<16x32xbf16>, vector<32x96xbf16>, vector<16x96xf32> -> vector<16x96xf32>
    %c0_7 = arith.constant 0 : index
    %c0_8 = arith.constant 0 : index
    %10 = vector.load %arg4[%c0_7, %c0_8] : memref<1x96xf32, #tpu.memory_space<vmem>>, vector<1x96xf32>
    %11 = vector.broadcast %10 : vector<1x96xf32> to vector<16x96xf32>
    %12 = arith.addf %9, %11 : vector<16x96xf32>
    %13 = vector.extract_strided_slice %12 {offsets = [0, 0], sizes = [8, 32], strides = [1, 1]} : vector<16x96xf32> to vector<8x32xf32>
    %14 = vector.extract_strided_slice %12 {offsets = [0, 32], sizes = [8, 32], strides = [1, 1]} : vector<16x96xf32> to vector<8x32xf32>
    %15 = vector.extract_strided_slice %12 {offsets = [0, 64], sizes = [8, 32], strides = [1, 1]} : vector<16x96xf32> to vector<8x32xf32>
    %16 = vector.extract_strided_slice %13 {offsets = [0, 0], sizes = [8, 8], strides = [1, 1]} : vector<8x32xf32> to vector<8x8xf32>
    %17 = vector.extract_strided_slice %14 {offsets = [0, 0], sizes = [8, 8], strides = [1, 1]} : vector<8x32xf32> to vector<8x8xf32>
    %18 = vector.extract_strided_slice %15 {offsets = [0, 0], sizes = [8, 8], strides = [1, 1]} : vector<8x32xf32> to vector<8x8xf32>
    %cst_9 = arith.constant dense<0.000000e+00> : vector<8x8xf32>
    %19 = tpu.matmul %16, %17, %cst_9 {dimension_numbers = #tpu.dot_dimension_numbers<[1], [1], [0], [0], [0, 0, 1, 0], [], []>} : vector<8x8xf32>, vector<8x8xf32>, vector<8x8xf32> -> vector<8x8xf32>
    %cst_10 = arith.constant dense<0xFF800000> : vector<8xf32>
    %20 = vector.multi_reduction <maximumf>, %19, %cst_10 [1] : vector<8x8xf32> to vector<8xf32>
    %21 = vector.shape_cast %20 : vector<8xf32> to vector<8x1xf32>
    %22 = vector.broadcast %21 : vector<8x1xf32> to vector<8x8xf32>
    %23 = arith.subf %19, %22 : vector<8x8xf32>
    %24 = math.exp %23 : vector<8x8xf32>
    %cst_11 = arith.constant dense<0.000000e+00> : vector<8xf32>
    %25 = vector.multi_reduction <add>, %24, %cst_11 [1] : vector<8x8xf32> to vector<8xf32>
    %26 = vector.shape_cast %25 : vector<8xf32> to vector<8x1xf32>
    %27 = tpu.reciprocal %26 {approx = true} : vector<8x1xf32> -> vector<8x1xf32>
    %28 = vector.broadcast %27 : vector<8x1xf32> to vector<8x8xf32>
    %29 = arith.mulf %24, %28 : vector<8x8xf32>
    %cst_12 = arith.constant dense<0.000000e+00> : vector<8x8xf32>
    %30 = tpu.matmul %29, %18, %cst_12 {dimension_numbers = #tpu.dot_dimension_numbers<[1], [0], [0], [1], [0, 0, 1, 1], [], []>} : vector<8x8xf32>, vector<8x8xf32>, vector<8x8xf32> -> vector<8x8xf32>
    %31 = vector.extract_strided_slice %13 {offsets = [0, 8], sizes = [8, 8], strides = [1, 1]} : vector<8x32xf32> to vector<8x8xf32>
    %32 = vector.extract_strided_slice %14 {offsets = [0, 8], sizes = [8, 8], strides = [1, 1]} : vector<8x32xf32> to vector<8x8xf32>
    %33 = vector.extract_strided_slice %15 {offsets = [0, 8], sizes = [8, 8], strides = [1, 1]} : vector<8x32xf32> to vector<8x8xf32>
    %cst_13 = arith.constant dense<0.000000e+00> : vector<8x8xf32>
    %34 = tpu.matmul %31, %32, %cst_13 {dimension_numbers = #tpu.dot_dimension_numbers<[1], [1], [0], [0], [0, 0, 1, 0], [], []>} : vector<8x8xf32>, vector<8x8xf32>, vector<8x8xf32> -> vector<8x8xf32>
    %cst_14 = arith.constant dense<0xFF800000> : vector<8xf32>
    %35 = vector.multi_reduction <maximumf>, %34, %cst_14 [1] : vector<8x8xf32> to vector<8xf32>
    %36 = vector.shape_cast %35 : vector<8xf32> to vector<8x1xf32>
    %37 = vector.broadcast %36 : vector<8x1xf32> to vector<8x8xf32>
    %38 = arith.subf %34, %37 : vector<8x8xf32>
    %39 = math.exp %38 : vector<8x8xf32>
    %cst_15 = arith.constant dense<0.000000e+00> : vector<8xf32>
    %40 = vector.multi_reduction <add>, %39, %cst_15 [1] : vector<8x8xf32> to vector<8xf32>
    %41 = vector.shape_cast %40 : vector<8xf32> to vector<8x1xf32>
    %42 = tpu.reciprocal %41 {approx = true} : vector<8x1xf32> -> vector<8x1xf32>
    %43 = vector.broadcast %42 : vector<8x1xf32> to vector<8x8xf32>
    %44 = arith.mulf %39, %43 : vector<8x8xf32>
    %cst_16 = arith.constant dense<0.000000e+00> : vector<8x8xf32>
    %45 = tpu.matmul %44, %33, %cst_16 {dimension_numbers = #tpu.dot_dimension_numbers<[1], [0], [0], [1], [0, 0, 1, 1], [], []>} : vector<8x8xf32>, vector<8x8xf32>, vector<8x8xf32> -> vector<8x8xf32>
    %46 = vector.extract_strided_slice %13 {offsets = [0, 16], sizes = [8, 8], strides = [1, 1]} : vector<8x32xf32> to vector<8x8xf32>
    %47 = vector.extract_strided_slice %14 {offsets = [0, 16], sizes = [8, 8], strides = [1, 1]} : vector<8x32xf32> to vector<8x8xf32>
    %48 = vector.extract_strided_slice %15 {offsets = [0, 16], sizes = [8, 8], strides = [1, 1]} : vector<8x32xf32> to vector<8x8xf32>
    %cst_17 = arith.constant dense<0.000000e+00> : vector<8x8xf32>
    %49 = tpu.matmul %46, %47, %cst_17 {dimension_numbers = #tpu.dot_dimension_numbers<[1], [1], [0], [0], [0, 0, 1, 0], [], []>} : vector<8x8xf32>, vector<8x8xf32>, vector<8x8xf32> -> vector<8x8xf32>
    %cst_18 = arith.constant dense<0xFF800000> : vector<8xf32>
    %50 = vector.multi_reduction <maximumf>, %49, %cst_18 [1] : vector<8x8xf32> to vector<8xf32>
    %51 = vector.shape_cast %50 : vector<8xf32> to vector<8x1xf32>
    %52 = vector.broadcast %51 : vector<8x1xf32> to vector<8x8xf32>
    %53 = arith.subf %49, %52 : vector<8x8xf32>
    %54 = math.exp %53 : vector<8x8xf32>
    %cst_19 = arith.constant dense<0.000000e+00> : vector<8xf32>
    %55 = vector.multi_reduction <add>, %54, %cst_19 [1] : vector<8x8xf32> to vector<8xf32>
    %56 = vector.shape_cast %55 : vector<8xf32> to vector<8x1xf32>
    %57 = tpu.reciprocal %56 {approx = true} : vector<8x1xf32> -> vector<8x1xf32>
    %58 = vector.broadcast %57 : vector<8x1xf32> to vector<8x8xf32>
    %59 = arith.mulf %54, %58 : vector<8x8xf32>
    %cst_20 = arith.constant dense<0.000000e+00> : vector<8x8xf32>
    %60 = tpu.matmul %59, %48, %cst_20 {dimension_numbers = #tpu.dot_dimension_numbers<[1], [0], [0], [1], [0, 0, 1, 1], [], []>} : vector<8x8xf32>, vector<8x8xf32>, vector<8x8xf32> -> vector<8x8xf32>
    %61 = vector.extract_strided_slice %13 {offsets = [0, 24], sizes = [8, 8], strides = [1, 1]} : vector<8x32xf32> to vector<8x8xf32>
    %62 = vector.extract_strided_slice %14 {offsets = [0, 24], sizes = [8, 8], strides = [1, 1]} : vector<8x32xf32> to vector<8x8xf32>
    %63 = vector.extract_strided_slice %15 {offsets = [0, 24], sizes = [8, 8], strides = [1, 1]} : vector<8x32xf32> to vector<8x8xf32>
    %cst_21 = arith.constant dense<0.000000e+00> : vector<8x8xf32>
    %64 = tpu.matmul %61, %62, %cst_21 {dimension_numbers = #tpu.dot_dimension_numbers<[1], [1], [0], [0], [0, 0, 1, 0], [], []>} : vector<8x8xf32>, vector<8x8xf32>, vector<8x8xf32> -> vector<8x8xf32>
    %cst_22 = arith.constant dense<0xFF800000> : vector<8xf32>
    %65 = vector.multi_reduction <maximumf>, %64, %cst_22 [1] : vector<8x8xf32> to vector<8xf32>
    %66 = vector.shape_cast %65 : vector<8xf32> to vector<8x1xf32>
    %67 = vector.broadcast %66 : vector<8x1xf32> to vector<8x8xf32>
    %68 = arith.subf %64, %67 : vector<8x8xf32>
    %69 = math.exp %68 : vector<8x8xf32>
    %cst_23 = arith.constant dense<0.000000e+00> : vector<8xf32>
    %70 = vector.multi_reduction <add>, %69, %cst_23 [1] : vector<8x8xf32> to vector<8xf32>
    %71 = vector.shape_cast %70 : vector<8xf32> to vector<8x1xf32>
    %72 = tpu.reciprocal %71 {approx = true} : vector<8x1xf32> -> vector<8x1xf32>
    %73 = vector.broadcast %72 : vector<8x1xf32> to vector<8x8xf32>
    %74 = arith.mulf %69, %73 : vector<8x8xf32>
    %cst_24 = arith.constant dense<0.000000e+00> : vector<8x8xf32>
    %75 = tpu.matmul %74, %63, %cst_24 {dimension_numbers = #tpu.dot_dimension_numbers<[1], [0], [0], [1], [0, 0, 1, 1], [], []>} : vector<8x8xf32>, vector<8x8xf32>, vector<8x8xf32> -> vector<8x8xf32>
    %76 = tpu.concatenate %30, %45, %60, %75 in 1 : vector<8x8xf32>, vector<8x8xf32>, vector<8x8xf32>, vector<8x8xf32> -> vector<8x32xf32>
    %77 = vector.extract_strided_slice %12 {offsets = [8, 0], sizes = [8, 32], strides = [1, 1]} : vector<16x96xf32> to vector<8x32xf32>
    %78 = vector.extract_strided_slice %12 {offsets = [8, 32], sizes = [8, 32], strides = [1, 1]} : vector<16x96xf32> to vector<8x32xf32>
    %79 = vector.extract_strided_slice %12 {offsets = [8, 64], sizes = [8, 32], strides = [1, 1]} : vector<16x96xf32> to vector<8x32xf32>
    %80 = vector.extract_strided_slice %77 {offsets = [0, 0], sizes = [8, 8], strides = [1, 1]} : vector<8x32xf32> to vector<8x8xf32>
    %81 = vector.extract_strided_slice %78 {offsets = [0, 0], sizes = [8, 8], strides = [1, 1]} : vector<8x32xf32> to vector<8x8xf32>
    %82 = vector.extract_strided_slice %79 {offsets = [0, 0], sizes = [8, 8], strides = [1, 1]} : vector<8x32xf32> to vector<8x8xf32>
    %cst_25 = arith.constant dense<0.000000e+00> : vector<8x8xf32>
    %83 = tpu.matmul %80, %81, %cst_25 {dimension_numbers = #tpu.dot_dimension_numbers<[1], [1], [0], [0], [0, 0, 1, 0], [], []>} : vector<8x8xf32>, vector<8x8xf32>, vector<8x8xf32> -> vector<8x8xf32>
    %cst_26 = arith.constant dense<0xFF800000> : vector<8xf32>
    %84 = vector.multi_reduction <maximumf>, %83, %cst_26 [1] : vector<8x8xf32> to vector<8xf32>
    %85 = vector.shape_cast %84 : vector<8xf32> to vector<8x1xf32>
    %86 = vector.broadcast %85 : vector<8x1xf32> to vector<8x8xf32>
    %87 = arith.subf %83, %86 : vector<8x8xf32>
    %88 = math.exp %87 : vector<8x8xf32>
    %cst_27 = arith.constant dense<0.000000e+00> : vector<8xf32>
    %89 = vector.multi_reduction <add>, %88, %cst_27 [1] : vector<8x8xf32> to vector<8xf32>
    %90 = vector.shape_cast %89 : vector<8xf32> to vector<8x1xf32>
    %91 = tpu.reciprocal %90 {approx = true} : vector<8x1xf32> -> vector<8x1xf32>
    %92 = vector.broadcast %91 : vector<8x1xf32> to vector<8x8xf32>
    %93 = arith.mulf %88, %92 : vector<8x8xf32>
    %cst_28 = arith.constant dense<0.000000e+00> : vector<8x8xf32>
    %94 = tpu.matmul %93, %82, %cst_28 {dimension_numbers = #tpu.dot_dimension_numbers<[1], [0], [0], [1], [0, 0, 1, 1], [], []>} : vector<8x8xf32>, vector<8x8xf32>, vector<8x8xf32> -> vector<8x8xf32>
    %95 = vector.extract_strided_slice %77 {offsets = [0, 8], sizes = [8, 8], strides = [1, 1]} : vector<8x32xf32> to vector<8x8xf32>
    %96 = vector.extract_strided_slice %78 {offsets = [0, 8], sizes = [8, 8], strides = [1, 1]} : vector<8x32xf32> to vector<8x8xf32>
    %97 = vector.extract_strided_slice %79 {offsets = [0, 8], sizes = [8, 8], strides = [1, 1]} : vector<8x32xf32> to vector<8x8xf32>
    %cst_29 = arith.constant dense<0.000000e+00> : vector<8x8xf32>
    %98 = tpu.matmul %95, %96, %cst_29 {dimension_numbers = #tpu.dot_dimension_numbers<[1], [1], [0], [0], [0, 0, 1, 0], [], []>} : vector<8x8xf32>, vector<8x8xf32>, vector<8x8xf32> -> vector<8x8xf32>
    %cst_30 = arith.constant dense<0xFF800000> : vector<8xf32>
    %99 = vector.multi_reduction <maximumf>, %98, %cst_30 [1] : vector<8x8xf32> to vector<8xf32>
    %100 = vector.shape_cast %99 : vector<8xf32> to vector<8x1xf32>
    %101 = vector.broadcast %100 : vector<8x1xf32> to vector<8x8xf32>
    %102 = arith.subf %98, %101 : vector<8x8xf32>
    %103 = math.exp %102 : vector<8x8xf32>
    %cst_31 = arith.constant dense<0.000000e+00> : vector<8xf32>
    %104 = vector.multi_reduction <add>, %103, %cst_31 [1] : vector<8x8xf32> to vector<8xf32>
    %105 = vector.shape_cast %104 : vector<8xf32> to vector<8x1xf32>
    %106 = tpu.reciprocal %105 {approx = true} : vector<8x1xf32> -> vector<8x1xf32>
    %107 = vector.broadcast %106 : vector<8x1xf32> to vector<8x8xf32>
    %108 = arith.mulf %103, %107 : vector<8x8xf32>
    %cst_32 = arith.constant dense<0.000000e+00> : vector<8x8xf32>
    %109 = tpu.matmul %108, %97, %cst_32 {dimension_numbers = #tpu.dot_dimension_numbers<[1], [0], [0], [1], [0, 0, 1, 1], [], []>} : vector<8x8xf32>, vector<8x8xf32>, vector<8x8xf32> -> vector<8x8xf32>
    %110 = vector.extract_strided_slice %77 {offsets = [0, 16], sizes = [8, 8], strides = [1, 1]} : vector<8x32xf32> to vector<8x8xf32>
    %111 = vector.extract_strided_slice %78 {offsets = [0, 16], sizes = [8, 8], strides = [1, 1]} : vector<8x32xf32> to vector<8x8xf32>
    %112 = vector.extract_strided_slice %79 {offsets = [0, 16], sizes = [8, 8], strides = [1, 1]} : vector<8x32xf32> to vector<8x8xf32>
    %cst_33 = arith.constant dense<0.000000e+00> : vector<8x8xf32>
    %113 = tpu.matmul %110, %111, %cst_33 {dimension_numbers = #tpu.dot_dimension_numbers<[1], [1], [0], [0], [0, 0, 1, 0], [], []>} : vector<8x8xf32>, vector<8x8xf32>, vector<8x8xf32> -> vector<8x8xf32>
    %cst_34 = arith.constant dense<0xFF800000> : vector<8xf32>
    %114 = vector.multi_reduction <maximumf>, %113, %cst_34 [1] : vector<8x8xf32> to vector<8xf32>
    %115 = vector.shape_cast %114 : vector<8xf32> to vector<8x1xf32>
    %116 = vector.broadcast %115 : vector<8x1xf32> to vector<8x8xf32>
    %117 = arith.subf %113, %116 : vector<8x8xf32>
    %118 = math.exp %117 : vector<8x8xf32>
    %cst_35 = arith.constant dense<0.000000e+00> : vector<8xf32>
    %119 = vector.multi_reduction <add>, %118, %cst_35 [1] : vector<8x8xf32> to vector<8xf32>
    %120 = vector.shape_cast %119 : vector<8xf32> to vector<8x1xf32>
    %121 = tpu.reciprocal %120 {approx = true} : vector<8x1xf32> -> vector<8x1xf32>
    %122 = vector.broadcast %121 : vector<8x1xf32> to vector<8x8xf32>
    %123 = arith.mulf %118, %122 : vector<8x8xf32>
    %cst_36 = arith.constant dense<0.000000e+00> : vector<8x8xf32>
    %124 = tpu.matmul %123, %112, %cst_36 {dimension_numbers = #tpu.dot_dimension_numbers<[1], [0], [0], [1], [0, 0, 1, 1], [], []>} : vector<8x8xf32>, vector<8x8xf32>, vector<8x8xf32> -> vector<8x8xf32>
    %125 = vector.extract_strided_slice %77 {offsets = [0, 24], sizes = [8, 8], strides = [1, 1]} : vector<8x32xf32> to vector<8x8xf32>
    %126 = vector.extract_strided_slice %78 {offsets = [0, 24], sizes = [8, 8], strides = [1, 1]} : vector<8x32xf32> to vector<8x8xf32>
    %127 = vector.extract_strided_slice %79 {offsets = [0, 24], sizes = [8, 8], strides = [1, 1]} : vector<8x32xf32> to vector<8x8xf32>
    %cst_37 = arith.constant dense<0.000000e+00> : vector<8x8xf32>
    %128 = tpu.matmul %125, %126, %cst_37 {dimension_numbers = #tpu.dot_dimension_numbers<[1], [1], [0], [0], [0, 0, 1, 0], [], []>} : vector<8x8xf32>, vector<8x8xf32>, vector<8x8xf32> -> vector<8x8xf32>
    %cst_38 = arith.constant dense<0xFF800000> : vector<8xf32>
    %129 = vector.multi_reduction <maximumf>, %128, %cst_38 [1] : vector<8x8xf32> to vector<8xf32>
    %130 = vector.shape_cast %129 : vector<8xf32> to vector<8x1xf32>
    %131 = vector.broadcast %130 : vector<8x1xf32> to vector<8x8xf32>
    %132 = arith.subf %128, %131 : vector<8x8xf32>
    %133 = math.exp %132 : vector<8x8xf32>
    %cst_39 = arith.constant dense<0.000000e+00> : vector<8xf32>
    %134 = vector.multi_reduction <add>, %133, %cst_39 [1] : vector<8x8xf32> to vector<8xf32>
    %135 = vector.shape_cast %134 : vector<8xf32> to vector<8x1xf32>
    %136 = tpu.reciprocal %135 {approx = true} : vector<8x1xf32> -> vector<8x1xf32>
    %137 = vector.broadcast %136 : vector<8x1xf32> to vector<8x8xf32>
    %138 = arith.mulf %133, %137 : vector<8x8xf32>
    %cst_40 = arith.constant dense<0.000000e+00> : vector<8x8xf32>
    %139 = tpu.matmul %138, %127, %cst_40 {dimension_numbers = #tpu.dot_dimension_numbers<[1], [0], [0], [1], [0, 0, 1, 1], [], []>} : vector<8x8xf32>, vector<8x8xf32>, vector<8x8xf32> -> vector<8x8xf32>
    %140 = tpu.concatenate %94, %109, %124, %139 in 1 : vector<8x8xf32>, vector<8x8xf32>, vector<8x8xf32>, vector<8x8xf32> -> vector<8x32xf32>
    %141 = tpu.concatenate %76, %140 in 0 : vector<8x32xf32>, vector<8x32xf32> -> vector<16x32xf32>
    %142 = arith.truncf %141 : vector<16x32xf32> to vector<16x32xbf16>
    %c0_41 = arith.constant 0 : index
    %c0_42 = arith.constant 0 : index
    %143 = vector.load %arg5[%c0_41, %c0_42] : memref<32x32xbf16, #tpu.memory_space<vmem>>, vector<32x32xbf16>
    %cst_43 = arith.constant dense<0.000000e+00> : vector<16x32xf32>
    %144 = tpu.matmul %142, %143, %cst_43 {dimension_numbers = #tpu.dot_dimension_numbers<[1], [0], [0], [1], [0, 0, 1, 1], [], []>} : vector<16x32xbf16>, vector<32x32xbf16>, vector<16x32xf32> -> vector<16x32xf32>
    %c0_44 = arith.constant 0 : index
    %c0_45 = arith.constant 0 : index
    %145 = vector.load %arg6[%c0_44, %c0_45] : memref<1x32xf32, #tpu.memory_space<vmem>>, vector<1x32xf32>
    %146 = vector.broadcast %145 : vector<1x32xf32> to vector<16x32xf32>
    %147 = arith.addf %144, %146 : vector<16x32xf32>
    %148 = arith.addf %147, %6 : vector<16x32xf32>
    %c0_46 = arith.constant 0 : index
    %c0_47 = arith.constant 0 : index
    %149 = vector.load %arg11[%c0_46, %c0_47] : memref<1x32xf32, #tpu.memory_space<vmem>>, vector<1x32xf32>
    %c0_48 = arith.constant 0 : index
    %c0_49 = arith.constant 0 : index
    %150 = vector.load %arg12[%c0_48, %c0_49] : memref<1x32xf32, #tpu.memory_space<vmem>>, vector<1x32xf32>
    %cst_50 = arith.constant dense<0.000000e+00> : vector<16xf32>
    %151 = vector.multi_reduction <add>, %148, %cst_50 [1] : vector<16x32xf32> to vector<16xf32>
    %152 = vector.shape_cast %151 : vector<16xf32> to vector<16x1xf32>
    %cst_51 = arith.constant 3.200000e+01 : f32
    %153 = vector.broadcast %cst_51 : f32 to vector<16x1xf32>
    %154 = arith.divf %152, %153 : vector<16x1xf32>
    %155 = vector.broadcast %154 : vector<16x1xf32> to vector<16x32xf32>
    %156 = arith.subf %148, %155 : vector<16x32xf32>
    %157 = arith.mulf %156, %156 : vector<16x32xf32>
    %cst_52 = arith.constant dense<0.000000e+00> : vector<16xf32>
    %158 = vector.multi_reduction <add>, %157, %cst_52 [1] : vector<16x32xf32> to vector<16xf32>
    %159 = vector.shape_cast %158 : vector<16xf32> to vector<16x1xf32>
    %cst_53 = arith.constant 3.200000e+01 : f32
    %160 = vector.broadcast %cst_53 : f32 to vector<16x1xf32>
    %161 = arith.divf %159, %160 : vector<16x1xf32>
    %cst_54 = arith.constant 9.99999974E-6 : f32
    %162 = vector.broadcast %cst_54 : f32 to vector<16x1xf32>
    %163 = arith.addf %161, %162 : vector<16x1xf32>
    %164 = math.rsqrt %163 : vector<16x1xf32>
    %165 = vector.broadcast %164 : vector<16x1xf32> to vector<16x32xf32>
    %166 = arith.mulf %156, %165 : vector<16x32xf32>
    %167 = vector.broadcast %149 : vector<1x32xf32> to vector<16x32xf32>
    %168 = arith.mulf %166, %167 : vector<16x32xf32>
    %169 = vector.broadcast %150 : vector<1x32xf32> to vector<16x32xf32>
    %170 = arith.addf %168, %169 : vector<16x32xf32>
    %c0_55 = arith.constant 0 : index
    %c0_56 = arith.constant 0 : index
    %171 = vector.load %arg10[%c0_55, %c0_56] : memref<1x32xf32, #tpu.memory_space<vmem>>, vector<1x32xf32>
    %172 = arith.truncf %170 : vector<16x32xf32> to vector<16x32xbf16>
    %cst_57 = arith.constant 0.000000e+00 : f32
    %173 = vector.broadcast %cst_57 : f32 to vector<16x32xf32>
    %c0_i32_58 = arith.constant 0 : i32
    %c512_i32 = arith.constant 512 : i32
    %174 = arith.muli %c0_i32_58, %c512_i32 : i32
    %175 = tpu.assume_multiple %174, 512 : i32
    %c0_59 = arith.constant 0 : index
    %176 = arith.index_cast %175 : i32 to index
    %177 = vector.load %arg7[%c0_59, %176] : memref<32x2048xbf16, #tpu.memory_space<vmem>>, vector<32x512xbf16>
    %c0_60 = arith.constant 0 : index
    %178 = arith.index_cast %175 : i32 to index
    %179 = vector.load %arg8[%c0_60, %178] : memref<1x2048xf32, #tpu.memory_space<vmem>>, vector<1x512xf32>
    %cst_61 = arith.constant dense<0.000000e+00> : vector<16x512xf32>
    %180 = tpu.matmul %172, %177, %cst_61 {dimension_numbers = #tpu.dot_dimension_numbers<[1], [0], [0], [1], [0, 0, 1, 1], [], []>} : vector<16x32xbf16>, vector<32x512xbf16>, vector<16x512xf32> -> vector<16x512xf32>
    %181 = vector.broadcast %179 : vector<1x512xf32> to vector<16x512xf32>
    %182 = arith.addf %180, %181 : vector<16x512xf32>
    %cst_62 = arith.constant 0.000000e+00 : f32
    %183 = vector.broadcast %cst_62 : f32 to vector<16x512xf32>
    %184 = arith.maximumf %182, %183 : vector<16x512xf32>
    %185 = arith.truncf %184 : vector<16x512xf32> to vector<16x512xbf16>
    %c0_63 = arith.constant 0 : index
    %186 = arith.index_cast %175 : i32 to index
    %187 = vector.load %arg9[%c0_63, %186] : memref<32x2048xbf16, #tpu.memory_space<vmem>>, vector<32x512xbf16>
    %cst_64 = arith.constant dense<0.000000e+00> : vector<16x32xf32>
    %188 = tpu.matmul %185, %187, %cst_64 {dimension_numbers = #tpu.dot_dimension_numbers<[1], [1], [0], [0], [0, 0, 1, 0], [], []>} : vector<16x512xbf16>, vector<32x512xbf16>, vector<16x32xf32> -> vector<16x32xf32>
    %189 = arith.addf %173, %188 : vector<16x32xf32>
    %c1_i32_65 = arith.constant 1 : i32
    %c512_i32_66 = arith.constant 512 : i32
    %190 = arith.muli %c1_i32_65, %c512_i32_66 : i32
    %191 = tpu.assume_multiple %190, 512 : i32
    %c0_67 = arith.constant 0 : index
    %192 = arith.index_cast %191 : i32 to index
    %193 = vector.load %arg7[%c0_67, %192] : memref<32x2048xbf16, #tpu.memory_space<vmem>>, vector<32x512xbf16>
    %c0_68 = arith.constant 0 : index
    %194 = arith.index_cast %191 : i32 to index
    %195 = vector.load %arg8[%c0_68, %194] : memref<1x2048xf32, #tpu.memory_space<vmem>>, vector<1x512xf32>
    %cst_69 = arith.constant dense<0.000000e+00> : vector<16x512xf32>
    %196 = tpu.matmul %172, %193, %cst_69 {dimension_numbers = #tpu.dot_dimension_numbers<[1], [0], [0], [1], [0, 0, 1, 1], [], []>} : vector<16x32xbf16>, vector<32x512xbf16>, vector<16x512xf32> -> vector<16x512xf32>
    %197 = vector.broadcast %195 : vector<1x512xf32> to vector<16x512xf32>
    %198 = arith.addf %196, %197 : vector<16x512xf32>
    %cst_70 = arith.constant 0.000000e+00 : f32
    %199 = vector.broadcast %cst_70 : f32 to vector<16x512xf32>
    %200 = arith.maximumf %198, %199 : vector<16x512xf32>
    %201 = arith.truncf %200 : vector<16x512xf32> to vector<16x512xbf16>
    %c0_71 = arith.constant 0 : index
    %202 = arith.index_cast %191 : i32 to index
    %203 = vector.load %arg9[%c0_71, %202] : memref<32x2048xbf16, #tpu.memory_space<vmem>>, vector<32x512xbf16>
    %cst_72 = arith.constant dense<0.000000e+00> : vector<16x32xf32>
    %204 = tpu.matmul %201, %203, %cst_72 {dimension_numbers = #tpu.dot_dimension_numbers<[1], [1], [0], [0], [0, 0, 1, 0], [], []>} : vector<16x512xbf16>, vector<32x512xbf16>, vector<16x32xf32> -> vector<16x32xf32>
    %205 = arith.addf %189, %204 : vector<16x32xf32>
    %c2_i32 = arith.constant 2 : i32
    %c512_i32_73 = arith.constant 512 : i32
    %206 = arith.muli %c2_i32, %c512_i32_73 : i32
    %207 = tpu.assume_multiple %206, 512 : i32
    %c0_74 = arith.constant 0 : index
    %208 = arith.index_cast %207 : i32 to index
    %209 = vector.load %arg7[%c0_74, %208] : memref<32x2048xbf16, #tpu.memory_space<vmem>>, vector<32x512xbf16>
    %c0_75 = arith.constant 0 : index
    %210 = arith.index_cast %207 : i32 to index
    %211 = vector.load %arg8[%c0_75, %210] : memref<1x2048xf32, #tpu.memory_space<vmem>>, vector<1x512xf32>
    %cst_76 = arith.constant dense<0.000000e+00> : vector<16x512xf32>
    %212 = tpu.matmul %172, %209, %cst_76 {dimension_numbers = #tpu.dot_dimension_numbers<[1], [0], [0], [1], [0, 0, 1, 1], [], []>} : vector<16x32xbf16>, vector<32x512xbf16>, vector<16x512xf32> -> vector<16x512xf32>
    %213 = vector.broadcast %211 : vector<1x512xf32> to vector<16x512xf32>
    %214 = arith.addf %212, %213 : vector<16x512xf32>
    %cst_77 = arith.constant 0.000000e+00 : f32
    %215 = vector.broadcast %cst_77 : f32 to vector<16x512xf32>
    %216 = arith.maximumf %214, %215 : vector<16x512xf32>
    %217 = arith.truncf %216 : vector<16x512xf32> to vector<16x512xbf16>
    %c0_78 = arith.constant 0 : index
    %218 = arith.index_cast %207 : i32 to index
    %219 = vector.load %arg9[%c0_78, %218] : memref<32x2048xbf16, #tpu.memory_space<vmem>>, vector<32x512xbf16>
    %cst_79 = arith.constant dense<0.000000e+00> : vector<16x32xf32>
    %220 = tpu.matmul %217, %219, %cst_79 {dimension_numbers = #tpu.dot_dimension_numbers<[1], [1], [0], [0], [0, 0, 1, 0], [], []>} : vector<16x512xbf16>, vector<32x512xbf16>, vector<16x32xf32> -> vector<16x32xf32>
    %221 = arith.addf %205, %220 : vector<16x32xf32>
    %c3_i32 = arith.constant 3 : i32
    %c512_i32_80 = arith.constant 512 : i32
    %222 = arith.muli %c3_i32, %c512_i32_80 : i32
    %223 = tpu.assume_multiple %222, 512 : i32
    %c0_81 = arith.constant 0 : index
    %224 = arith.index_cast %223 : i32 to index
    %225 = vector.load %arg7[%c0_81, %224] : memref<32x2048xbf16, #tpu.memory_space<vmem>>, vector<32x512xbf16>
    %c0_82 = arith.constant 0 : index
    %226 = arith.index_cast %223 : i32 to index
    %227 = vector.load %arg8[%c0_82, %226] : memref<1x2048xf32, #tpu.memory_space<vmem>>, vector<1x512xf32>
    %cst_83 = arith.constant dense<0.000000e+00> : vector<16x512xf32>
    %228 = tpu.matmul %172, %225, %cst_83 {dimension_numbers = #tpu.dot_dimension_numbers<[1], [0], [0], [1], [0, 0, 1, 1], [], []>} : vector<16x32xbf16>, vector<32x512xbf16>, vector<16x512xf32> -> vector<16x512xf32>
    %229 = vector.broadcast %227 : vector<1x512xf32> to vector<16x512xf32>
    %230 = arith.addf %228, %229 : vector<16x512xf32>
    %cst_84 = arith.constant 0.000000e+00 : f32
    %231 = vector.broadcast %cst_84 : f32 to vector<16x512xf32>
    %232 = arith.maximumf %230, %231 : vector<16x512xf32>
    %233 = arith.truncf %232 : vector<16x512xf32> to vector<16x512xbf16>
    %c0_85 = arith.constant 0 : index
    %234 = arith.index_cast %223 : i32 to index
    %235 = vector.load %arg9[%c0_85, %234] : memref<32x2048xbf16, #tpu.memory_space<vmem>>, vector<32x512xbf16>
    %cst_86 = arith.constant dense<0.000000e+00> : vector<16x32xf32>
    %236 = tpu.matmul %233, %235, %cst_86 {dimension_numbers = #tpu.dot_dimension_numbers<[1], [1], [0], [0], [0, 0, 1, 0], [], []>} : vector<16x512xbf16>, vector<32x512xbf16>, vector<16x32xf32> -> vector<16x32xf32>
    %237 = arith.addf %221, %236 : vector<16x32xf32>
    %c4_i32 = arith.constant 4 : i32
    %238 = vector.broadcast %171 : vector<1x32xf32> to vector<16x32xf32>
    %239 = arith.addf %237, %238 : vector<16x32xf32>
    %240 = arith.addf %239, %170 : vector<16x32xf32>
    %c0_87 = arith.constant 0 : index
    %c0_88 = arith.constant 0 : index
    %241 = vector.load %arg13[%c0_87, %c0_88] : memref<1x32xf32, #tpu.memory_space<vmem>>, vector<1x32xf32>
    %c0_89 = arith.constant 0 : index
    %c0_90 = arith.constant 0 : index
    %242 = vector.load %arg14[%c0_89, %c0_90] : memref<1x32xf32, #tpu.memory_space<vmem>>, vector<1x32xf32>
    %cst_91 = arith.constant dense<0.000000e+00> : vector<16xf32>
    %243 = vector.multi_reduction <add>, %240, %cst_91 [1] : vector<16x32xf32> to vector<16xf32>
    %244 = vector.shape_cast %243 : vector<16xf32> to vector<16x1xf32>
    %cst_92 = arith.constant 3.200000e+01 : f32
    %245 = vector.broadcast %cst_92 : f32 to vector<16x1xf32>
    %246 = arith.divf %244, %245 : vector<16x1xf32>
    %247 = vector.broadcast %246 : vector<16x1xf32> to vector<16x32xf32>
    %248 = arith.subf %240, %247 : vector<16x32xf32>
    %249 = arith.mulf %248, %248 : vector<16x32xf32>
    %cst_93 = arith.constant dense<0.000000e+00> : vector<16xf32>
    %250 = vector.multi_reduction <add>, %249, %cst_93 [1] : vector<16x32xf32> to vector<16xf32>
    %251 = vector.shape_cast %250 : vector<16xf32> to vector<16x1xf32>
    %cst_94 = arith.constant 3.200000e+01 : f32
    %252 = vector.broadcast %cst_94 : f32 to vector<16x1xf32>
    %253 = arith.divf %251, %252 : vector<16x1xf32>
    %cst_95 = arith.constant 9.99999974E-6 : f32
    %254 = vector.broadcast %cst_95 : f32 to vector<16x1xf32>
    %255 = arith.addf %253, %254 : vector<16x1xf32>
    %256 = math.rsqrt %255 : vector<16x1xf32>
    %257 = vector.broadcast %256 : vector<16x1xf32> to vector<16x32xf32>
    %258 = arith.mulf %248, %257 : vector<16x32xf32>
    %259 = vector.broadcast %241 : vector<1x32xf32> to vector<16x32xf32>
    %260 = arith.mulf %258, %259 : vector<16x32xf32>
    %261 = vector.broadcast %242 : vector<1x32xf32> to vector<16x32xf32>
    %262 = arith.addf %260, %261 : vector<16x32xf32>
    %263 = arith.truncf %262 : vector<16x32xf32> to vector<16x32xbf16>
    %c0_96 = arith.constant 0 : index
    %c0_97 = arith.constant 0 : index
    %264 = vector.load %arg15[%c0_96, %c0_97] : memref<32x96xbf16, #tpu.memory_space<vmem>>, vector<32x96xbf16>
    %cst_98 = arith.constant dense<0.000000e+00> : vector<16x96xf32>
    %265 = tpu.matmul %263, %264, %cst_98 {dimension_numbers = #tpu.dot_dimension_numbers<[1], [0], [0], [1], [0, 0, 1, 1], [], []>} : vector<16x32xbf16>, vector<32x96xbf16>, vector<16x96xf32> -> vector<16x96xf32>
    %c0_99 = arith.constant 0 : index
    %c0_100 = arith.constant 0 : index
    %266 = vector.load %arg16[%c0_99, %c0_100] : memref<1x96xf32, #tpu.memory_space<vmem>>, vector<1x96xf32>
    %267 = vector.broadcast %266 : vector<1x96xf32> to vector<16x96xf32>
    %268 = arith.addf %265, %267 : vector<16x96xf32>
    %269 = vector.extract_strided_slice %268 {offsets = [0, 0], sizes = [8, 32], strides = [1, 1]} : vector<16x96xf32> to vector<8x32xf32>
    %270 = vector.extract_strided_slice %268 {offsets = [0, 32], sizes = [8, 32], strides = [1, 1]} : vector<16x96xf32> to vector<8x32xf32>
    %271 = vector.extract_strided_slice %268 {offsets = [0, 64], sizes = [8, 32], strides = [1, 1]} : vector<16x96xf32> to vector<8x32xf32>
    %272 = vector.extract_strided_slice %269 {offsets = [0, 0], sizes = [8, 8], strides = [1, 1]} : vector<8x32xf32> to vector<8x8xf32>
    %273 = vector.extract_strided_slice %270 {offsets = [0, 0], sizes = [8, 8], strides = [1, 1]} : vector<8x32xf32> to vector<8x8xf32>
    %274 = vector.extract_strided_slice %271 {offsets = [0, 0], sizes = [8, 8], strides = [1, 1]} : vector<8x32xf32> to vector<8x8xf32>
    %cst_101 = arith.constant dense<0.000000e+00> : vector<8x8xf32>
    %275 = tpu.matmul %272, %273, %cst_101 {dimension_numbers = #tpu.dot_dimension_numbers<[1], [1], [0], [0], [0, 0, 1, 0], [], []>} : vector<8x8xf32>, vector<8x8xf32>, vector<8x8xf32> -> vector<8x8xf32>
    %cst_102 = arith.constant dense<0xFF800000> : vector<8xf32>
    %276 = vector.multi_reduction <maximumf>, %275, %cst_102 [1] : vector<8x8xf32> to vector<8xf32>
    %277 = vector.shape_cast %276 : vector<8xf32> to vector<8x1xf32>
    %278 = vector.broadcast %277 : vector<8x1xf32> to vector<8x8xf32>
    %279 = arith.subf %275, %278 : vector<8x8xf32>
    %280 = math.exp %279 : vector<8x8xf32>
    %cst_103 = arith.constant dense<0.000000e+00> : vector<8xf32>
    %281 = vector.multi_reduction <add>, %280, %cst_103 [1] : vector<8x8xf32> to vector<8xf32>
    %282 = vector.shape_cast %281 : vector<8xf32> to vector<8x1xf32>
    %283 = tpu.reciprocal %282 {approx = true} : vector<8x1xf32> -> vector<8x1xf32>
    %284 = vector.broadcast %283 : vector<8x1xf32> to vector<8x8xf32>
    %285 = arith.mulf %280, %284 : vector<8x8xf32>
    %cst_104 = arith.constant dense<0.000000e+00> : vector<8x8xf32>
    %286 = tpu.matmul %285, %274, %cst_104 {dimension_numbers = #tpu.dot_dimension_numbers<[1], [0], [0], [1], [0, 0, 1, 1], [], []>} : vector<8x8xf32>, vector<8x8xf32>, vector<8x8xf32> -> vector<8x8xf32>
    %287 = vector.extract_strided_slice %269 {offsets = [0, 8], sizes = [8, 8], strides = [1, 1]} : vector<8x32xf32> to vector<8x8xf32>
    %288 = vector.extract_strided_slice %270 {offsets = [0, 8], sizes = [8, 8], strides = [1, 1]} : vector<8x32xf32> to vector<8x8xf32>
    %289 = vector.extract_strided_slice %271 {offsets = [0, 8], sizes = [8, 8], strides = [1, 1]} : vector<8x32xf32> to vector<8x8xf32>
    %cst_105 = arith.constant dense<0.000000e+00> : vector<8x8xf32>
    %290 = tpu.matmul %287, %288, %cst_105 {dimension_numbers = #tpu.dot_dimension_numbers<[1], [1], [0], [0], [0, 0, 1, 0], [], []>} : vector<8x8xf32>, vector<8x8xf32>, vector<8x8xf32> -> vector<8x8xf32>
    %cst_106 = arith.constant dense<0xFF800000> : vector<8xf32>
    %291 = vector.multi_reduction <maximumf>, %290, %cst_106 [1] : vector<8x8xf32> to vector<8xf32>
    %292 = vector.shape_cast %291 : vector<8xf32> to vector<8x1xf32>
    %293 = vector.broadcast %292 : vector<8x1xf32> to vector<8x8xf32>
    %294 = arith.subf %290, %293 : vector<8x8xf32>
    %295 = math.exp %294 : vector<8x8xf32>
    %cst_107 = arith.constant dense<0.000000e+00> : vector<8xf32>
    %296 = vector.multi_reduction <add>, %295, %cst_107 [1] : vector<8x8xf32> to vector<8xf32>
    %297 = vector.shape_cast %296 : vector<8xf32> to vector<8x1xf32>
    %298 = tpu.reciprocal %297 {approx = true} : vector<8x1xf32> -> vector<8x1xf32>
    %299 = vector.broadcast %298 : vector<8x1xf32> to vector<8x8xf32>
    %300 = arith.mulf %295, %299 : vector<8x8xf32>
    %cst_108 = arith.constant dense<0.000000e+00> : vector<8x8xf32>
    %301 = tpu.matmul %300, %289, %cst_108 {dimension_numbers = #tpu.dot_dimension_numbers<[1], [0], [0], [1], [0, 0, 1, 1], [], []>} : vector<8x8xf32>, vector<8x8xf32>, vector<8x8xf32> -> vector<8x8xf32>
    %302 = vector.extract_strided_slice %269 {offsets = [0, 16], sizes = [8, 8], strides = [1, 1]} : vector<8x32xf32> to vector<8x8xf32>
    %303 = vector.extract_strided_slice %270 {offsets = [0, 16], sizes = [8, 8], strides = [1, 1]} : vector<8x32xf32> to vector<8x8xf32>
    %304 = vector.extract_strided_slice %271 {offsets = [0, 16], sizes = [8, 8], strides = [1, 1]} : vector<8x32xf32> to vector<8x8xf32>
    %cst_109 = arith.constant dense<0.000000e+00> : vector<8x8xf32>
    %305 = tpu.matmul %302, %303, %cst_109 {dimension_numbers = #tpu.dot_dimension_numbers<[1], [1], [0], [0], [0, 0, 1, 0], [], []>} : vector<8x8xf32>, vector<8x8xf32>, vector<8x8xf32> -> vector<8x8xf32>
    %cst_110 = arith.constant dense<0xFF800000> : vector<8xf32>
    %306 = vector.multi_reduction <maximumf>, %305, %cst_110 [1] : vector<8x8xf32> to vector<8xf32>
    %307 = vector.shape_cast %306 : vector<8xf32> to vector<8x1xf32>
    %308 = vector.broadcast %307 : vector<8x1xf32> to vector<8x8xf32>
    %309 = arith.subf %305, %308 : vector<8x8xf32>
    %310 = math.exp %309 : vector<8x8xf32>
    %cst_111 = arith.constant dense<0.000000e+00> : vector<8xf32>
    %311 = vector.multi_reduction <add>, %310, %cst_111 [1] : vector<8x8xf32> to vector<8xf32>
    %312 = vector.shape_cast %311 : vector<8xf32> to vector<8x1xf32>
    %313 = tpu.reciprocal %312 {approx = true} : vector<8x1xf32> -> vector<8x1xf32>
    %314 = vector.broadcast %313 : vector<8x1xf32> to vector<8x8xf32>
    %315 = arith.mulf %310, %314 : vector<8x8xf32>
    %cst_112 = arith.constant dense<0.000000e+00> : vector<8x8xf32>
    %316 = tpu.matmul %315, %304, %cst_112 {dimension_numbers = #tpu.dot_dimension_numbers<[1], [0], [0], [1], [0, 0, 1, 1], [], []>} : vector<8x8xf32>, vector<8x8xf32>, vector<8x8xf32> -> vector<8x8xf32>
    %317 = vector.extract_strided_slice %269 {offsets = [0, 24], sizes = [8, 8], strides = [1, 1]} : vector<8x32xf32> to vector<8x8xf32>
    %318 = vector.extract_strided_slice %270 {offsets = [0, 24], sizes = [8, 8], strides = [1, 1]} : vector<8x32xf32> to vector<8x8xf32>
    %319 = vector.extract_strided_slice %271 {offsets = [0, 24], sizes = [8, 8], strides = [1, 1]} : vector<8x32xf32> to vector<8x8xf32>
    %cst_113 = arith.constant dense<0.000000e+00> : vector<8x8xf32>
    %320 = tpu.matmul %317, %318, %cst_113 {dimension_numbers = #tpu.dot_dimension_numbers<[1], [1], [0], [0], [0, 0, 1, 0], [], []>} : vector<8x8xf32>, vector<8x8xf32>, vector<8x8xf32> -> vector<8x8xf32>
    %cst_114 = arith.constant dense<0xFF800000> : vector<8xf32>
    %321 = vector.multi_reduction <maximumf>, %320, %cst_114 [1] : vector<8x8xf32> to vector<8xf32>
    %322 = vector.shape_cast %321 : vector<8xf32> to vector<8x1xf32>
    %323 = vector.broadcast %322 : vector<8x1xf32> to vector<8x8xf32>
    %324 = arith.subf %320, %323 : vector<8x8xf32>
    %325 = math.exp %324 : vector<8x8xf32>
    %cst_115 = arith.constant dense<0.000000e+00> : vector<8xf32>
    %326 = vector.multi_reduction <add>, %325, %cst_115 [1] : vector<8x8xf32> to vector<8xf32>
    %327 = vector.shape_cast %326 : vector<8xf32> to vector<8x1xf32>
    %328 = tpu.reciprocal %327 {approx = true} : vector<8x1xf32> -> vector<8x1xf32>
    %329 = vector.broadcast %328 : vector<8x1xf32> to vector<8x8xf32>
    %330 = arith.mulf %325, %329 : vector<8x8xf32>
    %cst_116 = arith.constant dense<0.000000e+00> : vector<8x8xf32>
    %331 = tpu.matmul %330, %319, %cst_116 {dimension_numbers = #tpu.dot_dimension_numbers<[1], [0], [0], [1], [0, 0, 1, 1], [], []>} : vector<8x8xf32>, vector<8x8xf32>, vector<8x8xf32> -> vector<8x8xf32>
    %332 = tpu.concatenate %286, %301, %316, %331 in 1 : vector<8x8xf32>, vector<8x8xf32>, vector<8x8xf32>, vector<8x8xf32> -> vector<8x32xf32>
    %333 = vector.extract_strided_slice %268 {offsets = [8, 0], sizes = [8, 32], strides = [1, 1]} : vector<16x96xf32> to vector<8x32xf32>
    %334 = vector.extract_strided_slice %268 {offsets = [8, 32], sizes = [8, 32], strides = [1, 1]} : vector<16x96xf32> to vector<8x32xf32>
    %335 = vector.extract_strided_slice %268 {offsets = [8, 64], sizes = [8, 32], strides = [1, 1]} : vector<16x96xf32> to vector<8x32xf32>
    %336 = vector.extract_strided_slice %333 {offsets = [0, 0], sizes = [8, 8], strides = [1, 1]} : vector<8x32xf32> to vector<8x8xf32>
    %337 = vector.extract_strided_slice %334 {offsets = [0, 0], sizes = [8, 8], strides = [1, 1]} : vector<8x32xf32> to vector<8x8xf32>
    %338 = vector.extract_strided_slice %335 {offsets = [0, 0], sizes = [8, 8], strides = [1, 1]} : vector<8x32xf32> to vector<8x8xf32>
    %cst_117 = arith.constant dense<0.000000e+00> : vector<8x8xf32>
    %339 = tpu.matmul %336, %337, %cst_117 {dimension_numbers = #tpu.dot_dimension_numbers<[1], [1], [0], [0], [0, 0, 1, 0], [], []>} : vector<8x8xf32>, vector<8x8xf32>, vector<8x8xf32> -> vector<8x8xf32>
    %cst_118 = arith.constant dense<0xFF800000> : vector<8xf32>
    %340 = vector.multi_reduction <maximumf>, %339, %cst_118 [1] : vector<8x8xf32> to vector<8xf32>
    %341 = vector.shape_cast %340 : vector<8xf32> to vector<8x1xf32>
    %342 = vector.broadcast %341 : vector<8x1xf32> to vector<8x8xf32>
    %343 = arith.subf %339, %342 : vector<8x8xf32>
    %344 = math.exp %343 : vector<8x8xf32>
    %cst_119 = arith.constant dense<0.000000e+00> : vector<8xf32>
    %345 = vector.multi_reduction <add>, %344, %cst_119 [1] : vector<8x8xf32> to vector<8xf32>
    %346 = vector.shape_cast %345 : vector<8xf32> to vector<8x1xf32>
    %347 = tpu.reciprocal %346 {approx = true} : vector<8x1xf32> -> vector<8x1xf32>
    %348 = vector.broadcast %347 : vector<8x1xf32> to vector<8x8xf32>
    %349 = arith.mulf %344, %348 : vector<8x8xf32>
    %cst_120 = arith.constant dense<0.000000e+00> : vector<8x8xf32>
    %350 = tpu.matmul %349, %338, %cst_120 {dimension_numbers = #tpu.dot_dimension_numbers<[1], [0], [0], [1], [0, 0, 1, 1], [], []>} : vector<8x8xf32>, vector<8x8xf32>, vector<8x8xf32> -> vector<8x8xf32>
    %351 = vector.extract_strided_slice %333 {offsets = [0, 8], sizes = [8, 8], strides = [1, 1]} : vector<8x32xf32> to vector<8x8xf32>
    %352 = vector.extract_strided_slice %334 {offsets = [0, 8], sizes = [8, 8], strides = [1, 1]} : vector<8x32xf32> to vector<8x8xf32>
    %353 = vector.extract_strided_slice %335 {offsets = [0, 8], sizes = [8, 8], strides = [1, 1]} : vector<8x32xf32> to vector<8x8xf32>
    %cst_121 = arith.constant dense<0.000000e+00> : vector<8x8xf32>
    %354 = tpu.matmul %351, %352, %cst_121 {dimension_numbers = #tpu.dot_dimension_numbers<[1], [1], [0], [0], [0, 0, 1, 0], [], []>} : vector<8x8xf32>, vector<8x8xf32>, vector<8x8xf32> -> vector<8x8xf32>
    %cst_122 = arith.constant dense<0xFF800000> : vector<8xf32>
    %355 = vector.multi_reduction <maximumf>, %354, %cst_122 [1] : vector<8x8xf32> to vector<8xf32>
    %356 = vector.shape_cast %355 : vector<8xf32> to vector<8x1xf32>
    %357 = vector.broadcast %356 : vector<8x1xf32> to vector<8x8xf32>
    %358 = arith.subf %354, %357 : vector<8x8xf32>
    %359 = math.exp %358 : vector<8x8xf32>
    %cst_123 = arith.constant dense<0.000000e+00> : vector<8xf32>
    %360 = vector.multi_reduction <add>, %359, %cst_123 [1] : vector<8x8xf32> to vector<8xf32>
    %361 = vector.shape_cast %360 : vector<8xf32> to vector<8x1xf32>
    %362 = tpu.reciprocal %361 {approx = true} : vector<8x1xf32> -> vector<8x1xf32>
    %363 = vector.broadcast %362 : vector<8x1xf32> to vector<8x8xf32>
    %364 = arith.mulf %359, %363 : vector<8x8xf32>
    %cst_124 = arith.constant dense<0.000000e+00> : vector<8x8xf32>
    %365 = tpu.matmul %364, %353, %cst_124 {dimension_numbers = #tpu.dot_dimension_numbers<[1], [0], [0], [1], [0, 0, 1, 1], [], []>} : vector<8x8xf32>, vector<8x8xf32>, vector<8x8xf32> -> vector<8x8xf32>
    %366 = vector.extract_strided_slice %333 {offsets = [0, 16], sizes = [8, 8], strides = [1, 1]} : vector<8x32xf32> to vector<8x8xf32>
    %367 = vector.extract_strided_slice %334 {offsets = [0, 16], sizes = [8, 8], strides = [1, 1]} : vector<8x32xf32> to vector<8x8xf32>
    %368 = vector.extract_strided_slice %335 {offsets = [0, 16], sizes = [8, 8], strides = [1, 1]} : vector<8x32xf32> to vector<8x8xf32>
    %cst_125 = arith.constant dense<0.000000e+00> : vector<8x8xf32>
    %369 = tpu.matmul %366, %367, %cst_125 {dimension_numbers = #tpu.dot_dimension_numbers<[1], [1], [0], [0], [0, 0, 1, 0], [], []>} : vector<8x8xf32>, vector<8x8xf32>, vector<8x8xf32> -> vector<8x8xf32>
    %cst_126 = arith.constant dense<0xFF800000> : vector<8xf32>
    %370 = vector.multi_reduction <maximumf>, %369, %cst_126 [1] : vector<8x8xf32> to vector<8xf32>
    %371 = vector.shape_cast %370 : vector<8xf32> to vector<8x1xf32>
    %372 = vector.broadcast %371 : vector<8x1xf32> to vector<8x8xf32>
    %373 = arith.subf %369, %372 : vector<8x8xf32>
    %374 = math.exp %373 : vector<8x8xf32>
    %cst_127 = arith.constant dense<0.000000e+00> : vector<8xf32>
    %375 = vector.multi_reduction <add>, %374, %cst_127 [1] : vector<8x8xf32> to vector<8xf32>
    %376 = vector.shape_cast %375 : vector<8xf32> to vector<8x1xf32>
    %377 = tpu.reciprocal %376 {approx = true} : vector<8x1xf32> -> vector<8x1xf32>
    %378 = vector.broadcast %377 : vector<8x1xf32> to vector<8x8xf32>
    %379 = arith.mulf %374, %378 : vector<8x8xf32>
    %cst_128 = arith.constant dense<0.000000e+00> : vector<8x8xf32>
    %380 = tpu.matmul %379, %368, %cst_128 {dimension_numbers = #tpu.dot_dimension_numbers<[1], [0], [0], [1], [0, 0, 1, 1], [], []>} : vector<8x8xf32>, vector<8x8xf32>, vector<8x8xf32> -> vector<8x8xf32>
    %381 = vector.extract_strided_slice %333 {offsets = [0, 24], sizes = [8, 8], strides = [1, 1]} : vector<8x32xf32> to vector<8x8xf32>
    %382 = vector.extract_strided_slice %334 {offsets = [0, 24], sizes = [8, 8], strides = [1, 1]} : vector<8x32xf32> to vector<8x8xf32>
    %383 = vector.extract_strided_slice %335 {offsets = [0, 24], sizes = [8, 8], strides = [1, 1]} : vector<8x32xf32> to vector<8x8xf32>
    %cst_129 = arith.constant dense<0.000000e+00> : vector<8x8xf32>
    %384 = tpu.matmul %381, %382, %cst_129 {dimension_numbers = #tpu.dot_dimension_numbers<[1], [1], [0], [0], [0, 0, 1, 0], [], []>} : vector<8x8xf32>, vector<8x8xf32>, vector<8x8xf32> -> vector<8x8xf32>
    %cst_130 = arith.constant dense<0xFF800000> : vector<8xf32>
    %385 = vector.multi_reduction <maximumf>, %384, %cst_130 [1] : vector<8x8xf32> to vector<8xf32>
    %386 = vector.shape_cast %385 : vector<8xf32> to vector<8x1xf32>
    %387 = vector.broadcast %386 : vector<8x1xf32> to vector<8x8xf32>
    %388 = arith.subf %384, %387 : vector<8x8xf32>
    %389 = math.exp %388 : vector<8x8xf32>
    %cst_131 = arith.constant dense<0.000000e+00> : vector<8xf32>
    %390 = vector.multi_reduction <add>, %389, %cst_131 [1] : vector<8x8xf32> to vector<8xf32>
    %391 = vector.shape_cast %390 : vector<8xf32> to vector<8x1xf32>
    %392 = tpu.reciprocal %391 {approx = true} : vector<8x1xf32> -> vector<8x1xf32>
    %393 = vector.broadcast %392 : vector<8x1xf32> to vector<8x8xf32>
    %394 = arith.mulf %389, %393 : vector<8x8xf32>
    %cst_132 = arith.constant dense<0.000000e+00> : vector<8x8xf32>
    %395 = tpu.matmul %394, %383, %cst_132 {dimension_numbers = #tpu.dot_dimension_numbers<[1], [0], [0], [1], [0, 0, 1, 1], [], []>} : vector<8x8xf32>, vector<8x8xf32>, vector<8x8xf32> -> vector<8x8xf32>
    %396 = tpu.concatenate %350, %365, %380, %395 in 1 : vector<8x8xf32>, vector<8x8xf32>, vector<8x8xf32>, vector<8x8xf32> -> vector<8x32xf32>
    %397 = tpu.concatenate %332, %396 in 0 : vector<8x32xf32>, vector<8x32xf32> -> vector<16x32xf32>
    %398 = arith.truncf %397 : vector<16x32xf32> to vector<16x32xbf16>
    %c0_133 = arith.constant 0 : index
    %c0_134 = arith.constant 0 : index
    %399 = vector.load %arg17[%c0_133, %c0_134] : memref<32x32xbf16, #tpu.memory_space<vmem>>, vector<32x32xbf16>
    %cst_135 = arith.constant dense<0.000000e+00> : vector<16x32xf32>
    %400 = tpu.matmul %398, %399, %cst_135 {dimension_numbers = #tpu.dot_dimension_numbers<[1], [0], [0], [1], [0, 0, 1, 1], [], []>} : vector<16x32xbf16>, vector<32x32xbf16>, vector<16x32xf32> -> vector<16x32xf32>
    %c0_136 = arith.constant 0 : index
    %c0_137 = arith.constant 0 : index
    %401 = vector.load %arg18[%c0_136, %c0_137] : memref<1x32xf32, #tpu.memory_space<vmem>>, vector<1x32xf32>
    %402 = vector.broadcast %401 : vector<1x32xf32> to vector<16x32xf32>
    %403 = arith.addf %400, %402 : vector<16x32xf32>
    %404 = arith.addf %403, %262 : vector<16x32xf32>
    %c0_138 = arith.constant 0 : index
    %c0_139 = arith.constant 0 : index
    %405 = vector.load %arg23[%c0_138, %c0_139] : memref<1x32xf32, #tpu.memory_space<vmem>>, vector<1x32xf32>
    %c0_140 = arith.constant 0 : index
    %c0_141 = arith.constant 0 : index
    %406 = vector.load %arg24[%c0_140, %c0_141] : memref<1x32xf32, #tpu.memory_space<vmem>>, vector<1x32xf32>
    %cst_142 = arith.constant dense<0.000000e+00> : vector<16xf32>
    %407 = vector.multi_reduction <add>, %404, %cst_142 [1] : vector<16x32xf32> to vector<16xf32>
    %408 = vector.shape_cast %407 : vector<16xf32> to vector<16x1xf32>
    %cst_143 = arith.constant 3.200000e+01 : f32
    %409 = vector.broadcast %cst_143 : f32 to vector<16x1xf32>
    %410 = arith.divf %408, %409 : vector<16x1xf32>
    %411 = vector.broadcast %410 : vector<16x1xf32> to vector<16x32xf32>
    %412 = arith.subf %404, %411 : vector<16x32xf32>
    %413 = arith.mulf %412, %412 : vector<16x32xf32>
    %cst_144 = arith.constant dense<0.000000e+00> : vector<16xf32>
    %414 = vector.multi_reduction <add>, %413, %cst_144 [1] : vector<16x32xf32> to vector<16xf32>
    %415 = vector.shape_cast %414 : vector<16xf32> to vector<16x1xf32>
    %cst_145 = arith.constant 3.200000e+01 : f32
    %416 = vector.broadcast %cst_145 : f32 to vector<16x1xf32>
    %417 = arith.divf %415, %416 : vector<16x1xf32>
    %cst_146 = arith.constant 9.99999974E-6 : f32
    %418 = vector.broadcast %cst_146 : f32 to vector<16x1xf32>
    %419 = arith.addf %417, %418 : vector<16x1xf32>
    %420 = math.rsqrt %419 : vector<16x1xf32>
    %421 = vector.broadcast %420 : vector<16x1xf32> to vector<16x32xf32>
    %422 = arith.mulf %412, %421 : vector<16x32xf32>
    %423 = vector.broadcast %405 : vector<1x32xf32> to vector<16x32xf32>
    %424 = arith.mulf %422, %423 : vector<16x32xf32>
    %425 = vector.broadcast %406 : vector<1x32xf32> to vector<16x32xf32>
    %426 = arith.addf %424, %425 : vector<16x32xf32>
    %c0_i32_147 = arith.constant 0 : i32
    %c0_i32_148 = arith.constant 0 : i32
    %427 = tpu.memref_slice %arg30[%c0_i32_147, %c0_i32_148] : memref<1x2x!tpu.dma_semaphore, #tpu.memory_space<semaphore_mem>> -> memref<1x1x!tpu.dma_semaphore, #tpu.memory_space<semaphore_mem>>
    %428 = tpu.memref_squeeze %427 : memref<1x1x!tpu.dma_semaphore, #tpu.memory_space<semaphore_mem>> -> memref<!tpu.dma_semaphore, #tpu.memory_space<semaphore_mem>>
    tpu.wait_dma2 semaphore(%428 : memref<!tpu.dma_semaphore, #tpu.memory_space<semaphore_mem>>) src(%arg19 : memref<32x2048xbf16, #tpu.memory_space<any>>) dst(%arg28 : memref<32x2048xbf16, #tpu.memory_space<vmem>>)
    %c0_i32_149 = arith.constant 0 : i32
    %c1_i32_150 = arith.constant 1 : i32
    %429 = tpu.memref_slice %arg30[%c0_i32_149, %c1_i32_150] : memref<1x2x!tpu.dma_semaphore, #tpu.memory_space<semaphore_mem>> -> memref<1x1x!tpu.dma_semaphore, #tpu.memory_space<semaphore_mem>>
    %430 = tpu.memref_squeeze %429 : memref<1x1x!tpu.dma_semaphore, #tpu.memory_space<semaphore_mem>> -> memref<!tpu.dma_semaphore, #tpu.memory_space<semaphore_mem>>
    tpu.wait_dma2 semaphore(%430 : memref<!tpu.dma_semaphore, #tpu.memory_space<semaphore_mem>>) src(%arg21 : memref<32x2048xbf16, #tpu.memory_space<any>>) dst(%arg29 : memref<32x2048xbf16, #tpu.memory_space<vmem>>)
    %c0_151 = arith.constant 0 : index
    %c0_152 = arith.constant 0 : index
    %431 = vector.load %arg22[%c0_151, %c0_152] : memref<1x32xf32, #tpu.memory_space<vmem>>, vector<1x32xf32>
    %432 = arith.truncf %426 : vector<16x32xf32> to vector<16x32xbf16>
    %cst_153 = arith.constant 0.000000e+00 : f32
    %433 = vector.broadcast %cst_153 : f32 to vector<16x32xf32>
    %c0_i32_154 = arith.constant 0 : i32
    %c512_i32_155 = arith.constant 512 : i32
    %434 = arith.muli %c0_i32_154, %c512_i32_155 : i32
    %435 = tpu.assume_multiple %434, 512 : i32
    %c0_156 = arith.constant 0 : index
    %436 = arith.index_cast %435 : i32 to index
    %437 = vector.load %arg28[%c0_156, %436] : memref<32x2048xbf16, #tpu.memory_space<vmem>>, vector<32x512xbf16>
    %c0_157 = arith.constant 0 : index
    %438 = arith.index_cast %435 : i32 to index
    %439 = vector.load %arg20[%c0_157, %438] : memref<1x2048xf32, #tpu.memory_space<vmem>>, vector<1x512xf32>
    %cst_158 = arith.constant dense<0.000000e+00> : vector<16x512xf32>
    %440 = tpu.matmul %432, %437, %cst_158 {dimension_numbers = #tpu.dot_dimension_numbers<[1], [0], [0], [1], [0, 0, 1, 1], [], []>} : vector<16x32xbf16>, vector<32x512xbf16>, vector<16x512xf32> -> vector<16x512xf32>
    %441 = vector.broadcast %439 : vector<1x512xf32> to vector<16x512xf32>
    %442 = arith.addf %440, %441 : vector<16x512xf32>
    %cst_159 = arith.constant 0.000000e+00 : f32
    %443 = vector.broadcast %cst_159 : f32 to vector<16x512xf32>
    %444 = arith.maximumf %442, %443 : vector<16x512xf32>
    %445 = arith.truncf %444 : vector<16x512xf32> to vector<16x512xbf16>
    %c0_160 = arith.constant 0 : index
    %446 = arith.index_cast %435 : i32 to index
    %447 = vector.load %arg29[%c0_160, %446] : memref<32x2048xbf16, #tpu.memory_space<vmem>>, vector<32x512xbf16>
    %cst_161 = arith.constant dense<0.000000e+00> : vector<16x32xf32>
    %448 = tpu.matmul %445, %447, %cst_161 {dimension_numbers = #tpu.dot_dimension_numbers<[1], [1], [0], [0], [0, 0, 1, 0], [], []>} : vector<16x512xbf16>, vector<32x512xbf16>, vector<16x32xf32> -> vector<16x32xf32>
    %449 = arith.addf %433, %448 : vector<16x32xf32>
    %c1_i32_162 = arith.constant 1 : i32
    %c512_i32_163 = arith.constant 512 : i32
    %450 = arith.muli %c1_i32_162, %c512_i32_163 : i32
    %451 = tpu.assume_multiple %450, 512 : i32
    %c0_164 = arith.constant 0 : index
    %452 = arith.index_cast %451 : i32 to index
    %453 = vector.load %arg28[%c0_164, %452] : memref<32x2048xbf16, #tpu.memory_space<vmem>>, vector<32x512xbf16>
    %c0_165 = arith.constant 0 : index
    %454 = arith.index_cast %451 : i32 to index
    %455 = vector.load %arg20[%c0_165, %454] : memref<1x2048xf32, #tpu.memory_space<vmem>>, vector<1x512xf32>
    %cst_166 = arith.constant dense<0.000000e+00> : vector<16x512xf32>
    %456 = tpu.matmul %432, %453, %cst_166 {dimension_numbers = #tpu.dot_dimension_numbers<[1], [0], [0], [1], [0, 0, 1, 1], [], []>} : vector<16x32xbf16>, vector<32x512xbf16>, vector<16x512xf32> -> vector<16x512xf32>
    %457 = vector.broadcast %455 : vector<1x512xf32> to vector<16x512xf32>
    %458 = arith.addf %456, %457 : vector<16x512xf32>
    %cst_167 = arith.constant 0.000000e+00 : f32
    %459 = vector.broadcast %cst_167 : f32 to vector<16x512xf32>
    %460 = arith.maximumf %458, %459 : vector<16x512xf32>
    %461 = arith.truncf %460 : vector<16x512xf32> to vector<16x512xbf16>
    %c0_168 = arith.constant 0 : index
    %462 = arith.index_cast %451 : i32 to index
    %463 = vector.load %arg29[%c0_168, %462] : memref<32x2048xbf16, #tpu.memory_space<vmem>>, vector<32x512xbf16>
    %cst_169 = arith.constant dense<0.000000e+00> : vector<16x32xf32>
    %464 = tpu.matmul %461, %463, %cst_169 {dimension_numbers = #tpu.dot_dimension_numbers<[1], [1], [0], [0], [0, 0, 1, 0], [], []>} : vector<16x512xbf16>, vector<32x512xbf16>, vector<16x32xf32> -> vector<16x32xf32>
    %465 = arith.addf %449, %464 : vector<16x32xf32>
    %c2_i32_170 = arith.constant 2 : i32
    %c512_i32_171 = arith.constant 512 : i32
    %466 = arith.muli %c2_i32_170, %c512_i32_171 : i32
    %467 = tpu.assume_multiple %466, 512 : i32
    %c0_172 = arith.constant 0 : index
    %468 = arith.index_cast %467 : i32 to index
    %469 = vector.load %arg28[%c0_172, %468] : memref<32x2048xbf16, #tpu.memory_space<vmem>>, vector<32x512xbf16>
    %c0_173 = arith.constant 0 : index
    %470 = arith.index_cast %467 : i32 to index
    %471 = vector.load %arg20[%c0_173, %470] : memref<1x2048xf32, #tpu.memory_space<vmem>>, vector<1x512xf32>
    %cst_174 = arith.constant dense<0.000000e+00> : vector<16x512xf32>
    %472 = tpu.matmul %432, %469, %cst_174 {dimension_numbers = #tpu.dot_dimension_numbers<[1], [0], [0], [1], [0, 0, 1, 1], [], []>} : vector<16x32xbf16>, vector<32x512xbf16>, vector<16x512xf32> -> vector<16x512xf32>
    %473 = vector.broadcast %471 : vector<1x512xf32> to vector<16x512xf32>
    %474 = arith.addf %472, %473 : vector<16x512xf32>
    %cst_175 = arith.constant 0.000000e+00 : f32
    %475 = vector.broadcast %cst_175 : f32 to vector<16x512xf32>
    %476 = arith.maximumf %474, %475 : vector<16x512xf32>
    %477 = arith.truncf %476 : vector<16x512xf32> to vector<16x512xbf16>
    %c0_176 = arith.constant 0 : index
    %478 = arith.index_cast %467 : i32 to index
    %479 = vector.load %arg29[%c0_176, %478] : memref<32x2048xbf16, #tpu.memory_space<vmem>>, vector<32x512xbf16>
    %cst_177 = arith.constant dense<0.000000e+00> : vector<16x32xf32>
    %480 = tpu.matmul %477, %479, %cst_177 {dimension_numbers = #tpu.dot_dimension_numbers<[1], [1], [0], [0], [0, 0, 1, 0], [], []>} : vector<16x512xbf16>, vector<32x512xbf16>, vector<16x32xf32> -> vector<16x32xf32>
    %481 = arith.addf %465, %480 : vector<16x32xf32>
    %c3_i32_178 = arith.constant 3 : i32
    %c512_i32_179 = arith.constant 512 : i32
    %482 = arith.muli %c3_i32_178, %c512_i32_179 : i32
    %483 = tpu.assume_multiple %482, 512 : i32
    %c0_180 = arith.constant 0 : index
    %484 = arith.index_cast %483 : i32 to index
    %485 = vector.load %arg28[%c0_180, %484] : memref<32x2048xbf16, #tpu.memory_space<vmem>>, vector<32x512xbf16>
    %c0_181 = arith.constant 0 : index
    %486 = arith.index_cast %483 : i32 to index
    %487 = vector.load %arg20[%c0_181, %486] : memref<1x2048xf32, #tpu.memory_space<vmem>>, vector<1x512xf32>
    %cst_182 = arith.constant dense<0.000000e+00> : vector<16x512xf32>
    %488 = tpu.matmul %432, %485, %cst_182 {dimension_numbers = #tpu.dot_dimension_numbers<[1], [0], [0], [1], [0, 0, 1, 1], [], []>} : vector<16x32xbf16>, vector<32x512xbf16>, vector<16x512xf32> -> vector<16x512xf32>
    %489 = vector.broadcast %487 : vector<1x512xf32> to vector<16x512xf32>
    %490 = arith.addf %488, %489 : vector<16x512xf32>
    %cst_183 = arith.constant 0.000000e+00 : f32
    %491 = vector.broadcast %cst_183 : f32 to vector<16x512xf32>
    %492 = arith.maximumf %490, %491 : vector<16x512xf32>
    %493 = arith.truncf %492 : vector<16x512xf32> to vector<16x512xbf16>
    %c0_184 = arith.constant 0 : index
    %494 = arith.index_cast %483 : i32 to index
    %495 = vector.load %arg29[%c0_184, %494] : memref<32x2048xbf16, #tpu.memory_space<vmem>>, vector<32x512xbf16>
    %cst_185 = arith.constant dense<0.000000e+00> : vector<16x32xf32>
    %496 = tpu.matmul %493, %495, %cst_185 {dimension_numbers = #tpu.dot_dimension_numbers<[1], [1], [0], [0], [0, 0, 1, 0], [], []>} : vector<16x512xbf16>, vector<32x512xbf16>, vector<16x32xf32> -> vector<16x32xf32>
    %497 = arith.addf %481, %496 : vector<16x32xf32>
    %c4_i32_186 = arith.constant 4 : i32
    %498 = vector.broadcast %431 : vector<1x32xf32> to vector<16x32xf32>
    %499 = arith.addf %497, %498 : vector<16x32xf32>
    %500 = arith.addf %499, %426 : vector<16x32xf32>
    %c0_187 = arith.constant 0 : index
    %c0_188 = arith.constant 0 : index
    %501 = vector.load %arg25[%c0_187, %c0_188] : memref<1x32xf32, #tpu.memory_space<vmem>>, vector<1x32xf32>
    %c0_189 = arith.constant 0 : index
    %c0_190 = arith.constant 0 : index
    %502 = vector.load %arg26[%c0_189, %c0_190] : memref<1x32xf32, #tpu.memory_space<vmem>>, vector<1x32xf32>
    %cst_191 = arith.constant dense<0.000000e+00> : vector<16xf32>
    %503 = vector.multi_reduction <add>, %500, %cst_191 [1] : vector<16x32xf32> to vector<16xf32>
    %504 = vector.shape_cast %503 : vector<16xf32> to vector<16x1xf32>
    %cst_192 = arith.constant 3.200000e+01 : f32
    %505 = vector.broadcast %cst_192 : f32 to vector<16x1xf32>
    %506 = arith.divf %504, %505 : vector<16x1xf32>
    %507 = vector.broadcast %506 : vector<16x1xf32> to vector<16x32xf32>
    %508 = arith.subf %500, %507 : vector<16x32xf32>
    %509 = arith.mulf %508, %508 : vector<16x32xf32>
    %cst_193 = arith.constant dense<0.000000e+00> : vector<16xf32>
    %510 = vector.multi_reduction <add>, %509, %cst_193 [1] : vector<16x32xf32> to vector<16xf32>
    %511 = vector.shape_cast %510 : vector<16xf32> to vector<16x1xf32>
    %cst_194 = arith.constant 3.200000e+01 : f32
    %512 = vector.broadcast %cst_194 : f32 to vector<16x1xf32>
    %513 = arith.divf %511, %512 : vector<16x1xf32>
    %cst_195 = arith.constant 9.99999974E-6 : f32
    %514 = vector.broadcast %cst_195 : f32 to vector<16x1xf32>
    %515 = arith.addf %513, %514 : vector<16x1xf32>
    %516 = math.rsqrt %515 : vector<16x1xf32>
    %517 = vector.broadcast %516 : vector<16x1xf32> to vector<16x32xf32>
    %518 = arith.mulf %508, %517 : vector<16x32xf32>
    %519 = vector.broadcast %501 : vector<1x32xf32> to vector<16x32xf32>
    %520 = arith.mulf %518, %519 : vector<16x32xf32>
    %521 = vector.broadcast %502 : vector<1x32xf32> to vector<16x32xf32>
    %522 = arith.addf %520, %521 : vector<16x32xf32>
    %c0_196 = arith.constant 0 : index
    %c0_197 = arith.constant 0 : index
    %523 = vector.load %arg27[%c0_196, %c0_197] : memref<16x32xf32, #tpu.memory_space<vmem>>, vector<16x32xf32>
    tpu.vector_store %arg27[%c0_196, %c0_197], %522 {strides = array<i32>} : memref<16x32xf32, #tpu.memory_space<vmem>>, vector<16x32xf32>,
    return
  }
  func.func @transform_0(%arg0: i32) -> (i32, i32) {
    %c0_i32 = arith.constant 0 : i32
    %c0_i32_0 = arith.constant 0 : i32
    %c0_i32_1 = arith.constant 0 : i32
    return %c0_i32, %c0_i32_0 : i32, i32
  }
  func.func @transform_1(%arg0: i32) -> (i32, i32) {
    %c0_i32 = arith.constant 0 : i32
    %c0_i32_0 = arith.constant 0 : i32
    %c0_i32_1 = arith.constant 0 : i32
    return %c0_i32, %c0_i32_0 : i32, i32
  }
  func.func @transform_2(%arg0: i32) -> (i32, i32) {
    %c0_i32 = arith.constant 0 : i32
    %c0_i32_0 = arith.constant 0 : i32
    %c0_i32_1 = arith.constant 0 : i32
    return %c0_i32, %c0_i32_0 : i32, i32
  }
  func.func @transform_3(%arg0: i32) -> (i32, i32) {
    %c0_i32 = arith.constant 0 : i32
    %c0_i32_0 = arith.constant 0 : i32
    %c0_i32_1 = arith.constant 0 : i32
    return %c0_i32, %c0_i32_0 : i32, i32
  }
  func.func @transform_4(%arg0: i32) -> (i32, i32) {
    %c0_i32 = arith.constant 0 : i32
    %c0_i32_0 = arith.constant 0 : i32
    %c0_i32_1 = arith.constant 0 : i32
    return %c0_i32, %c0_i32_0 : i32, i32
  }
  func.func @transform_5(%arg0: i32) -> (i32, i32) {
    %c0_i32 = arith.constant 0 : i32
    %c0_i32_0 = arith.constant 0 : i32
    %c0_i32_1 = arith.constant 0 : i32
    return %c0_i32, %c0_i32_0 : i32, i32
  }
  func.func @transform_6(%arg0: i32) -> (i32, i32) {
    %c0_i32 = arith.constant 0 : i32
    %c0_i32_0 = arith.constant 0 : i32
    %c0_i32_1 = arith.constant 0 : i32
    return %c0_i32, %c0_i32_0 : i32, i32
  }
  func.func @transform_7(%arg0: i32) -> (i32, i32) {
    %c0_i32 = arith.constant 0 : i32
    %c0_i32_0 = arith.constant 0 : i32
    %c0_i32_1 = arith.constant 0 : i32
    return %c0_i32, %c0_i32_0 : i32, i32
  }
  func.func @transform_8(%arg0: i32) -> (i32, i32) {
    %c0_i32 = arith.constant 0 : i32
    %c0_i32_0 = arith.constant 0 : i32
    %c0_i32_1 = arith.constant 0 : i32
    return %c0_i32, %c0_i32_0 : i32, i32
  }
  func.func @transform_9(%arg0: i32) -> (i32, i32) {
    %c0_i32 = arith.constant 0 : i32
    %c0_i32_0 = arith.constant 0 : i32
    %c0_i32_1 = arith.constant 0 : i32
    return %c0_i32, %c0_i32_0 : i32, i32
  }
  func.func @transform_10(%arg0: i32) -> (i32, i32) {
    %c0_i32 = arith.constant 0 : i32
    %c0_i32_0 = arith.constant 0 : i32
    %c0_i32_1 = arith.constant 0 : i32
    return %c0_i32, %c0_i32_0 : i32, i32
  }
  func.func @transform_11(%arg0: i32) -> (i32, i32) {
    %c0_i32 = arith.constant 0 : i32
    %c0_i32_0 = arith.constant 0 : i32
    %c0_i32_1 = arith.constant 0 : i32
    return %c0_i32, %c0_i32_0 : i32, i32
  }
  func.func @transform_12(%arg0: i32) -> (i32, i32) {
    %c0_i32 = arith.constant 0 : i32
    %c0_i32_0 = arith.constant 0 : i32
    %c0_i32_1 = arith.constant 0 : i32
    return %c0_i32, %c0_i32_0 : i32, i32
  }
  func.func @transform_13(%arg0: i32) -> (i32, i32) {
    %c0_i32 = arith.constant 0 : i32
    %c0_i32_0 = arith.constant 0 : i32
    %c0_i32_1 = arith.constant 0 : i32
    return %c0_i32, %c0_i32_0 : i32, i32
  }
  func.func @transform_14(%arg0: i32) -> (i32, i32) {
    %c0_i32 = arith.constant 0 : i32
    %c0_i32_0 = arith.constant 0 : i32
    %c0_i32_1 = arith.constant 0 : i32
    return %c0_i32, %c0_i32_0 : i32, i32
  }
  func.func @transform_15(%arg0: i32) -> (i32, i32) {
    %c0_i32 = arith.constant 0 : i32
    %c0_i32_0 = arith.constant 0 : i32
    %c0_i32_1 = arith.constant 0 : i32
    return %c0_i32, %c0_i32_0 : i32, i32
  }
  func.func @transform_16(%arg0: i32) -> (i32, i32) {
    %c0_i32 = arith.constant 0 : i32
    %c0_i32_0 = arith.constant 0 : i32
    %c0_i32_1 = arith.constant 0 : i32
    return %c0_i32, %c0_i32_0 : i32, i32
  }
  func.func @transform_17(%arg0: i32) -> (i32, i32) {
    %c0_i32 = arith.constant 0 : i32
    %c0_i32_0 = arith.constant 0 : i32
    %c0_i32_1 = arith.constant 0 : i32
    return %c0_i32, %c0_i32_0 : i32, i32
  }
  func.func @transform_19(%arg0: i32) -> (i32, i32) {
    %c0_i32 = arith.constant 0 : i32
    %c0_i32_0 = arith.constant 0 : i32
    %c0_i32_1 = arith.constant 0 : i32
    return %c0_i32, %c0_i32_0 : i32, i32
  }
  func.func @transform_21(%arg0: i32) -> (i32, i32) {
    %c0_i32 = arith.constant 0 : i32
    %c0_i32_0 = arith.constant 0 : i32
    %c0_i32_1 = arith.constant 0 : i32
    return %c0_i32, %c0_i32_0 : i32, i32
  }
  func.func @transform_22(%arg0: i32) -> (i32, i32) {
    %c0_i32 = arith.constant 0 : i32
    %c0_i32_0 = arith.constant 0 : i32
    %c0_i32_1 = arith.constant 0 : i32
    return %c0_i32, %c0_i32_0 : i32, i32
  }
  func.func @transform_23(%arg0: i32) -> (i32, i32) {
    %c0_i32 = arith.constant 0 : i32
    %c0_i32_0 = arith.constant 0 : i32
    %c0_i32_1 = arith.constant 0 : i32
    return %c0_i32, %c0_i32_0 : i32, i32
  }
  func.func @transform_24(%arg0: i32) -> (i32, i32) {
    %c0_i32 = arith.constant 0 : i32
    %c0_i32_0 = arith.constant 0 : i32
    %c0_i32_1 = arith.constant 0 : i32
    return %c0_i32, %c0_i32_0 : i32, i32
  }
  func.func @transform_25(%arg0: i32) -> (i32, i32) {
    %c0_i32 = arith.constant 0 : i32
    %c0_i32_0 = arith.constant 0 : i32
    %c0_i32_1 = arith.constant 0 : i32
    return %c0_i32, %c0_i32_0 : i32, i32
  }
  func.func @transform_26(%arg0: i32) -> (i32, i32) {
    %c0_i32 = arith.constant 0 : i32
    %c0_i32_0 = arith.constant 0 : i32
    %c0_i32_1 = arith.constant 0 : i32
    return %c0_i32, %c0_i32_0 : i32, i32
  }
}

</mosaic_0001>

<bundles_post_ra>
// kernel: gpt_idm_forward.1
= control target key start
LH: loop header
LB: loop body
LE: loop exit
PB: predicated region body
PF: predicated region fallthrough
CT: control target
= control target key end

     0   :  { %s7779_s0 = inlined_call_operand.vmem [shape: f32[16,32], index: 0, kind: input, shape index: {}]   ;;  %s7780_s1 = inlined_call_operand.vmem [shape: f32[16,32], index: 1, kind: input, shape index: {}]   ;;  %s7781_s2 = inlined_call_operand.vmem [shape: bf16[32,96], index: 2, kind: input, shape index: {}]   ;;  %s7782_s3 = inlined_call_operand.hbm [shape: f32[1,96], index: 3, kind: input, shape index: {}]   ;;  %s7783_s4 = inlined_call_operand.hbm [shape: bf16[32,32], index: 4, kind: input, shape index: {}]   ;;  %s7784_s5 = inlined_call_operand.hbm [shape: f32[1,32], index: 5, kind: input, shape index: {}]   ;;  %s7785_s6 = inlined_call_operand.hbm [shape: bf16[32,2048], index: 6, kind: input, shape index: {}]   ;;  %s7786_s7 = inlined_call_operand.hbm [shape: f32[1,2048], index: 7, kind: input, shape index: {}]   ;;  %s7787_s8 = inlined_call_operand.hbm [shape: bf16[32,2048], index: 8, kind: input, shape index: {}]   ;;  %s7788_s9 = inlined_call_operand.hbm [shape: f32[1,32], index: 9, kind: input, shape index: {}]   ;;  %s7789_s10 = inlined_call_operand.hbm [shape: f32[1,32], index: 10, kind: input, shape index: {}]   ;;  %s7790_s11 = inlined_call_operand.hbm [shape: f32[1,32], index: 11, kind: input, shape index: {}]   ;;  %s7791_s12 = inlined_call_operand.hbm [shape: f32[1,32], index: 12, kind: input, shape index: {}]   ;;  %s7792_s13 = inlined_call_operand.hbm [shape: f32[1,32], index: 13, kind: input, shape index: {}]   ;;  %s7793_s14 = inlined_call_operand.vmem [shape: bf16[32,96], index: 14, kind: input, shape index: {}]   ;;  %s7794_s15 = inlined_call_operand.hbm [shape: f32[1,96], index: 15, kind: input, shape index: {}]   ;;  %s7795_s16 = inlined_call_operand.hbm [shape: bf16[32,32], index: 16, kind: input, shape index: {}]   ;;  %s7796_s17 = inlined_call_operand.hbm [shape: f32[1,32], index: 17, kind: input, shape index: {}]   ;;  %s7797_s18 = inlined_call_operand.hbm [shape: bf16[32,2048], index: 18, kind: input, shape index: {}]   ;;  %s7798_s19 = inlined_call_operand.vmem [shape: f32[1,2048], index: 19, kind: input, shape index: {}]   ;;  %s7799_s20 = inlined_call_operand.hbm [shape: bf16[32,2048], index: 20, kind: input, shape index: {}]   ;;  %s7800_s21 = inlined_call_operand.vmem [shape: f32[1,32], index: 21, kind: input, shape index: {}]   ;;  %s7801_s22 = inlined_call_operand.vmem [shape: f32[1,32], index: 22, kind: input, shape index: {}]   ;;  %s7802_s23 = inlined_call_operand.vmem [shape: f32[1,32], index: 23, kind: input, shape index: {}]   ;;  %s7803_s24 = inlined_call_operand.vmem [shape: f32[1,32], index: 24, kind: input, shape index: {}]   ;;  %s7804_s25 = inlined_call_operand.vmem [shape: f32[1,32], index: 25, kind: input, shape index: {}]   ;;  %s7805_s26 = inlined_call_operand.vmem [shape: f32[16,32], index: 26, kind: output, shape index: {}]  }
   0x1   :  { %7811 = sst [smem:[#allocation43_spill]] %s7779_s0 }
   0x2   :  { %7812 = sst [smem:[#allocation44_spill]] %s7780_s1 }
   0x3   :  { %7813 = sst [smem:[#allocation45_spill]] %s7781_s2 }
   0x4   :  { %7814 = sst [smem:[#allocation46_spill]] %s7782_s3 }
   0x5   :  { %7815 = sst [smem:[#allocation47_spill]] %s7783_s4 }
   0x6   :  { %7816 = sst [smem:[#allocation48_spill]] %s7784_s5 }
   0x7   :  { %7817 = sst [smem:[#allocation49_spill]] %s7785_s6 }
   0x8   :  { %7818 = sst [smem:[#allocation50_spill]] %s7786_s7 }
   0x9   :  { %7819 = sst [smem:[#allocation51_spill]] %s7787_s8 }
   0xa   :  { %7820 = sst [smem:[#allocation52_spill]] %s7788_s9 }
   0xb   :  { %7821 = sst [smem:[#allocation53_spill]] %s7789_s10 }
   0xc   :  { %7822 = sst [smem:[#allocation54_spill]] %s7805_s26 }
   0xd   :  { %31 = vsyncpa [#allocation6], 0 }
   0xe   :  { %32 = vsyncpa [#allocation8], 0 }
   0xf   :  { %33 = vsyncpa [#allocation11], 0 }
  0x10   :  { %34 = vsyncpa [#allocation14], 0 }
  0x11   :  { %35 = vsyncpa [#allocation17], 0 }
  0x12   :  { %36 = vsyncpa [#allocation20], 0 }
  0x13   :  { %37 = vsyncpa [#allocation23], 0 }
  0x14   :  { %38 = vsyncpa [#allocation26], 0  ;;  %s6889_s27 = smov [#allocation7]  }
  0x15   :  { %s60_s3 = sshll.u32 %s6889_s27, 4  ;;  %s61_s3 = int_to_ptr.vmem [resolvable:$true] %s60_s3 }
  0x16   :  { %s6557_s7 = scalar_lea.vmem %s61_s3, 256  ;;  %p6562_p1 = scmp.lt.s32.totalorder %s61_s3, %s61_s3 }
  0x17   :  { %p6558_p0 = scmp.ne.s32.totalorder %s61_s3, %s6557_s7  ;;  %p6563_p2 = scmp.lt.s32.totalorder %s6557_s7, %s6557_s7 }
  0x19   :  { %p6564_p3 = por %p6563_p2, %p6562_p1 }
  0x1b   :  { %p6565_p4 = pnand %p6564_p3, %p6558_p0 }
  0x1d   :  { %6568 = shalt.err (!%p6565_p4)
}
  0x1e   :  { %s6890_s28 = smov 64   ;;  %s7809_s8 = smov 4  }
  0x1f   :  { %s7823_s0 = sld [smem:[#allocation47_spill]]  ;;  %s6892_s9 = smov [#allocation10]  }
  0x20   :  { %s82_s30 = sshll.u32 %s6892_s9, 4  ;;  %s83_s30 = int_to_ptr.vmem [resolvable:$true] %s82_s30 }
  0x21   :  { %s6577_s2 = scalar_lea.vmem %s83_s30, 4096  ;;  %p6582_p6 = scmp.lt.s32.totalorder %s83_s30, %s83_s30 }
  0x22   :  { %p6578_p5 = scmp.ne.s32.totalorder %s83_s30, %s6577_s2  ;;  %p6583_p7 = scmp.lt.s32.totalorder %s6577_s2, %s6577_s2 }
  0x24   :  { %p6584_p8 = por %p6583_p7, %p6582_p6 }
  0x25   :  { %66 = dma.hbm_to_vmem [thread:$0]  %s7823_s0, 256, %s61_s3, [#allocation8], %s6890_s28, %s6890_s28, %s7809_s8  }
  0x26   :  { %p6585_p9 = pnand %p6584_p8, %p6578_p5 }
  0x28   :  { %6588 = shalt.err (!%p6585_p9)
}
  0x29   :  { %s6893_s5 = smov 1024   ;;  %s7824_s1 = sld [smem:[#allocation49_spill]] }
  0x2a   :  { %s6894_s27 = smov [#allocation13]   ;;  %s6895_s3 = smov [#allocation16]  }
  0x2b   :  { %s104_s7 = sshll.u32 %s6894_s27, 4  ;;  %s127_s4 = sshll.u32 %s6895_s3, 4  ;;  %s105_s7 = int_to_ptr.vmem [resolvable:$true] %s104_s7  ;;  %s128_s4 = int_to_ptr.vmem [resolvable:$true] %s127_s4 }
  0x2c   :  { %s6597_s29 = scalar_lea.vmem %s105_s7, 4096  ;;  %p6602_p11 = scmp.lt.s32.totalorder %s105_s7, %s105_s7 }
  0x2d   :  { %p6598_p10 = scmp.ne.s32.totalorder %s105_s7, %s6597_s29  ;;  %p6603_p12 = scmp.lt.s32.totalorder %s6597_s29, %s6597_s29 }
  0x2f   :  { %88 = dma.hbm_to_vmem [thread:$0]  %s7824_s1, 4096, %s83_s30, [#allocation11], %s6893_s5, %s6893_s5, %s6890_s28  }
  0x30   :  { %p6604_p13 = por %p6603_p12, %p6602_p11 }
  0x32   :  { %p6605_p0 = pnand %p6604_p13, %p6598_p10 }
  0x34   :  { %6608 = shalt.err (!%p6605_p0)
}
  0x35   :  { %s7825_s2 = sld [smem:[#allocation51_spill]]  ;;  %s6617_s10 = scalar_lea.vmem %s128_s4, 16 }
  0x36   :  { %p6618_p1 = scmp.ne.s32.totalorder %s128_s4, %s6617_s10  ;;  %s6621_s30 = scalar_lea.vmem %s128_s4, 32 }
  0x37   :  { %p6622_p2 = scmp.lt.s32.totalorder %s128_s4, %s128_s4  ;;  %p6623_p3 = scmp.lt.s32.totalorder %s6621_s30, %s6617_s10 }
  0x39   :  { %p6624_p4 = por %p6623_p3, %p6622_p2 }
  0x3b   :  { %110 = dma.hbm_to_vmem [thread:$0]  %s7825_s2, 4096, %s105_s7, [#allocation14], %s6893_s5, %s6893_s5, %s6890_s28  }
  0x3c   :  { %p6625_p5 = pnand %p6624_p4, %p6618_p1 }
  0x3e   :  { %6628 = shalt.err (!%p6625_p5)
}
  0x3f   :  { %s7826_s27 = sld [smem:[#allocation53_spill]]  ;;  %s6896_s3 = smov [#allocation19]  }
  0x40   :  { %s147_s29 = sshll.u32 %s6896_s3, 4  ;;  %s6897_s8 = smov [#allocation22]   ;;  %s148_s29 = int_to_ptr.vmem [resolvable:$true] %s147_s29 }
  0x41   :  { %s169_s26 = sshll.u32 %s6897_s8, 4  ;;  %s6637_s0 = scalar_lea.vmem %s148_s29, 16  ;;  %s170_s26 = int_to_ptr.vmem [resolvable:$true] %s169_s26 }
  0x42   :  { %p6638_p6 = scmp.ne.s32.totalorder %s148_s29, %s6637_s0  ;;  %s6641_s5 = scalar_lea.vmem %s148_s29, 32 }
  0x43   :  { %p6642_p7 = scmp.lt.s32.totalorder %s148_s29, %s148_s29  ;;  %p6643_p8 = scmp.lt.s32.totalorder %s6641_s5, %s6637_s0 }
  0x45   :  { %130 = dma.hbm_to_vmem [thread:$0]  %s7826_s27, 16, %s128_s4, [#allocation17]  }
  0x46   :  { %p6644_p9 = por %p6643_p8, %p6642_p7 }
  0x48   :  { %p6645_p10 = pnand %p6644_p9, %p6638_p6 }
  0x4a   :  { %6648 = shalt.err (!%p6645_p10)
}
  0x4b   :  { %150 = dma.hbm_to_vmem [thread:$0]  %s7791_s12, 16, %s148_s29, [#allocation20]  }
  0x4c   :  { %s6657_s2 = scalar_lea.vmem %s170_s26, 16  ;;  %s6661_s4 = scalar_lea.vmem %s170_s26, 32 }
  0x4d   :  { %p6658_p11 = scmp.ne.s32.totalorder %s170_s26, %s6657_s2  ;;  %p6662_p12 = scmp.lt.s32.totalorder %s170_s26, %s170_s26 }
  0x4e   :  { %p6663_p13 = scmp.lt.s32.totalorder %s6661_s4, %s6657_s2 }
  0x50   :  { %p6664_p0 = por %p6663_p13, %p6662_p12 }
  0x52   :  { %p6665_p1 = pnand %p6664_p0, %p6658_p11 }
  0x54   :  { %6668 = shalt.err (!%p6665_p1)
}
  0x55   :  { %172 = dma.hbm_to_vmem [thread:$0]  %s7794_s15, 16, %s170_s26, [#allocation23]  }
  0x56   :  { %s6898_s30 = smov [#allocation5]   ;;  %s6899_s1 = smov [#allocation9]  }
  0x57   :  { %s51_s6 = sshll.u32 %s6898_s30, 4  ;;  %s73_s27 = sshll.u32 %s6899_s1, 4  ;;  %s52_s6 = int_to_ptr.vmem [resolvable:$true] %s51_s6  ;;  %s74_s27 = int_to_ptr.vmem [resolvable:$true] %s73_s27 }
  0x58   :  { %s6677_s3 = scalar_lea.vmem %s52_s6, 16  ;;  %s6681_s12 = scalar_lea.vmem %s52_s6, 32 }
  0x59   :  { %p6678_p2 = scmp.ne.s32.totalorder %s52_s6, %s6677_s3  ;;  %p6682_p3 = scmp.lt.s32.totalorder %s52_s6, %s52_s6 }
  0x5a   :  { %p6683_p4 = scmp.lt.s32.totalorder %s6681_s12, %s6677_s3 }
  0x5c   :  { %p6684_p5 = por %p6683_p4, %p6682_p3 }
  0x5e   :  { %p6685_p6 = pnand %p6684_p5, %p6678_p2 }
  0x60   :  { %6688 = shalt.err (!%p6685_p6)
}
  0x61   :  { %s7827_s5 = sld [smem:[#allocation46_spill]]  ;;  %s6697_s7 = scalar_lea.vmem %s74_s27, 16 }
  0x62   :  { %p6698_p7 = scmp.ne.s32.totalorder %s74_s27, %s6697_s7  ;;  %s6701_s15 = scalar_lea.vmem %s74_s27, 32 }
  0x63   :  { %p6702_p8 = scmp.lt.s32.totalorder %s74_s27, %s74_s27  ;;  %p6703_p9 = scmp.lt.s32.totalorder %s6701_s15, %s6697_s7 }
  0x65   :  { %p6704_p10 = por %p6703_p9, %p6702_p8 }
  0x67   :  { %54 = dma.hbm_to_vmem [thread:$0]  %s7827_s5, 16, %s52_s6, [#allocation6]  }
  0x68   :  { %p6705_p11 = pnand %p6704_p10, %p6698_p7 }
  0x6a   :  { %6708 = shalt.err (!%p6705_p11)
}
  0x6b   :  { %s7828_s2 = sld [smem:[#allocation48_spill]]  ;;  %s6900_s4 = smov [#allocation12]  }
  0x6c   :  { %s95_s8 = sshll.u32 %s6900_s4, 4  ;;  %s6901_s10 = smov [#allocation15]   ;;  %s96_s8 = int_to_ptr.vmem [resolvable:$true] %s95_s8 }
  0x6d   :  { %s117_s30 = sshll.u32 %s6901_s10, 4  ;;  %s6717_s1 = scalar_lea.vmem %s96_s8, 256  ;;  %s118_s30 = int_to_ptr.vmem [resolvable:$true] %s117_s30 }
  0x6e   :  { %p6718_p12 = scmp.ne.s32.totalorder %s96_s8, %s6717_s1  ;;  %p6722_p13 = scmp.lt.s32.totalorder %s96_s8, %s96_s8 }
  0x6f   :  { %p6723_p0 = scmp.lt.s32.totalorder %s6717_s1, %s6717_s1 }
  0x71   :  { %76 = dma.hbm_to_vmem [thread:$0]  %s7828_s2, 16, %s74_s27, [#allocation8]  }
  0x72   :  { %p6724_p1 = por %p6723_p0, %p6722_p13 }
  0x74   :  { %p6725_p2 = pnand %p6724_p1, %p6718_p12 }
  0x76   :  { %6728 = shalt.err (!%p6725_p2)
}
  0x77   :  { %s7829_s12 = sld [smem:[#allocation50_spill]]  ;;  %s6737_s29 = scalar_lea.vmem %s118_s30, 16 }
  0x78   :  { %p6738_p3 = scmp.ne.s32.totalorder %s118_s30, %s6737_s29  ;;  %s6741_s27 = scalar_lea.vmem %s118_s30, 32 }
  0x79   :  { %p6742_p4 = scmp.lt.s32.totalorder %s118_s30, %s118_s30  ;;  %p6743_p5 = scmp.lt.s32.totalorder %s6741_s27, %s6737_s29 }
  0x7b   :  { %p6744_p6 = por %p6743_p5, %p6742_p4 }
  0x7d   :  { %98 = dma.hbm_to_vmem [thread:$0]  %s7829_s12, 256, %s96_s8, [#allocation11]  }
  0x7e   :  { %p6745_p7 = pnand %p6744_p6, %p6738_p3 }
  0x80   :  { %6748 = shalt.err (!%p6745_p7)
}
  0x81   :  { %s7830_s7 = sld [smem:[#allocation52_spill]]  ;;  %s6902_s15 = smov [#allocation18]  }
  0x82   :  { %s137_s26 = sshll.u32 %s6902_s15, 4  ;;  %s6903_s9 = smov [#allocation21]   ;;  %s138_s26 = int_to_ptr.vmem [resolvable:$true] %s137_s26 }
  0x83   :  { %s157_s2 = sshll.u32 %s6903_s9, 4  ;;  %s6757_s4 = scalar_lea.vmem %s138_s26, 16  ;;  %s158_s2 = int_to_ptr.vmem [resolvable:$true] %s157_s2 }
  0x84   :  { %p6758_p8 = scmp.ne.s32.totalorder %s138_s26, %s6757_s4  ;;  %s6761_s8 = scalar_lea.vmem %s138_s26, 32 }
  0x85   :  { %p6762_p9 = scmp.lt.s32.totalorder %s138_s26, %s138_s26  ;;  %p6763_p10 = scmp.lt.s32.totalorder %s6761_s8, %s6757_s4 }
  0x87   :  { %120 = dma.hbm_to_vmem [thread:$0]  %s7830_s7, 16, %s118_s30, [#allocation14]  }
  0x88   :  { %p6764_p11 = por %p6763_p10, %p6762_p9 }
  0x8a   :  { %p6765_p12 = pnand %p6764_p11, %p6758_p8 }
  0x8c   :  { %6768 = shalt.err (!%p6765_p12)
}
  0x8d   :  { %140 = dma.hbm_to_vmem [thread:$0]  %s7790_s11, 16, %s138_s26, [#allocation17]  }
  0x8e   :  { %s6777_s6 = scalar_lea.vmem %s158_s2, 16  ;;  %s6781_s30 = scalar_lea.vmem %s158_s2, 32 }
  0x8f   :  { %p6778_p13 = scmp.ne.s32.totalorder %s158_s2, %s6777_s6  ;;  %p6782_p0 = scmp.lt.s32.totalorder %s158_s2, %s158_s2 }
  0x90   :  { %p6783_p1 = scmp.lt.s32.totalorder %s6781_s30, %s6777_s6 }
  0x92   :  { %p6784_p2 = por %p6783_p1, %p6782_p0 }
  0x94   :  { %p6785_p3 = pnand %p6784_p2, %p6778_p13 }
  0x96   :  { %6788 = shalt.err (!%p6785_p3)
}
  0x97   :  { %160 = dma.hbm_to_vmem [thread:$0]  %s7792_s13, 16, %s158_s2, [#allocation20]  }
  0x98   :  { %s6904_s29 = smov [#allocation24]   ;;  %s6905_s0 = smov [#allocation25]  }
  0x99   :  { %s178_s27 = sshll.u32 %s6904_s29, 4  ;;  %s191_s5 = sshll.u32 %s6905_s0, 4  ;;  %s179_s27 = int_to_ptr.vmem [resolvable:$true] %s178_s27  ;;  %s192_s5 = int_to_ptr.vmem [resolvable:$true] %s191_s5 }
  0x9a   :  { %s6797_s7 = scalar_lea.vmem %s179_s27, 256  ;;  %p6802_p5 = scmp.lt.s32.totalorder %s179_s27, %s179_s27 }
  0x9b   :  { %p6798_p4 = scmp.ne.s32.totalorder %s179_s27, %s6797_s7  ;;  %p6803_p6 = scmp.lt.s32.totalorder %s6797_s7, %s6797_s7 }
  0x9d   :  { %p6804_p7 = por %p6803_p6, %p6802_p5 }
  0x9f   :  { %p6805_p8 = pnand %p6804_p7, %p6798_p4 }
  0xa1   :  { %6808 = shalt.err (!%p6805_p8)
}
  0xa2   :  { %s7831_s11 = smov 4   ;;  %s6817_s13 = scalar_lea.vmem %s192_s5, 16 }
  0xa3   :  { %184 = dma.hbm_to_vmem [thread:$0]  %s7795_s16, 256, %s179_s27, [#allocation23], %s6890_s28, %s6890_s28, %s7831_s11  }
  0xa4   :  { %p6818_p9 = scmp.ne.s32.totalorder %s192_s5, %s6817_s13  ;;  %s6821_s9 = scalar_lea.vmem %s192_s5, 32 }
  0xa5   :  { %p6822_p10 = scmp.lt.s32.totalorder %s192_s5, %s192_s5  ;;  %p6823_p11 = scmp.lt.s32.totalorder %s6821_s9, %s6817_s13 }
  0xa7   :  { %p6824_p12 = por %p6823_p11, %p6822_p10 }
  0xa9   :  { %p6825_p13 = pnand %p6824_p12, %p6818_p9 }
  0xab   :  { %6828 = shalt.err (!%p6825_p13)
}
  0xac   :  { %194 = dma.hbm_to_vmem [thread:$0]  %s7796_s17, 16, %s192_s5, [#allocation26]  }
  0xad   :  { %6869 = dma.done.wait [#allocation6], 16  }
  0xae   :  { %6870 = vsyncadd [#allocation6], 4294967280 }
  0xaf   :  { %6871 = dma.done.wait [#allocation8], 272  }
  0xb0   :  { %6872 = vsyncadd [#allocation8], 4294967024 }
  0xb1   :  { %6873 = dma.done.wait [#allocation11], 4352  }
  0xb2   :  { %6874 = vsyncadd [#allocation11], 4294962944 }
  0xb3   :  { %6875 = dma.done.wait [#allocation14], 4112  }
  0xb4   :  { %6876 = vsyncadd [#allocation14], 4294963184 }
  0xb5   :  { %6877 = dma.done.wait [#allocation17], 32  }
  0xb6   :  { %6878 = vsyncadd [#allocation17], 4294967264 }
  0xb7   :  { %6879 = dma.done.wait [#allocation20], 32  }
  0xb8   :  { %6880 = vsyncadd [#allocation20], 4294967264 }
  0xb9   :  { %6881 = dma.done.wait [#allocation23], 272  }
  0xba   :  { %6882 = vsyncadd [#allocation23], 4294967024 }
  0xbb   :  { %6883 = dma.done.wait [#allocation26], 16  }
  0xbc   :  { %6884 = vsyncadd [#allocation26], 4294967280  ;;  %v6906_v0 = vmov 0.0   ;;  %vm6907_vm0 = vmmov 0   ;;  %s7832_s8 = sld [smem:[#allocation45_spill]]  ;;  %vm303_vm1 = vcmask 261120  }
  0xbd   :  { %6204 = vmatprep.subr.bf16.mxu0 %v6906_v0  ;;  %6208 = vmatprep.mubr.msk.bf16.mxu0 %vm6907_vm0, %v6906_v0  ;;  %s7833_s3 = sld [smem:[#allocation43_spill]]  ;;  %v5905_v10 = vld [vmem:[#allocation5] ss:$0 sm:$0xff]  ;;  %s6908_s15 = smov 96   ;;  %vm351_vm2 = vcmask 64512   ;;  %vm1021_vm3 = vcmask 130048  }
  0xbe   :  { %6212 = vmatprep.subr.mxu1 %v6906_v0  ;;  %6214 = vmatprep.mubr.msk.f32.mxu1 %vm6907_vm0, %v6906_v0  ;;  %s7834_s5 = sld [smem:[#allocation44_spill]]  ;;  %s6909_s26 = smov 88   ;;  %vm1023_vm4 = vcmask 195584  }
  0xbf   :  { %s6910_s13 = smov 120   ;;  %s6911_s9 = smov 80  }
  0xc0   :  { %s6912_s2 = smov 112   ;;  %s6913_s4 = smov 72  }
  0xc1   :  { %s6914_s16 = smov 104   ;;  %s6915_s17 = smov 48  }
  0xc2   :  { %v6461_v1 = vld [vmem:[%s7832_s8 + $0x8] sm:$0xff]   ;;  %v6462_v2 = vld [vmem:[%s7832_s8] sm:$0xff]   ;;  %s6916_s8 = smov 40   ;;  %s6917_s10 = smov 56  }
  0xc3   :  { %6205 = vmatpush3.bf16.msra.mxu0 %v6461_v1  ;;  %v273_v3 = vld [vmem:[%s7833_s3] sm:$0xff]  ;;  %v274_v4 = vld [vmem:[%s7833_s3 + $0x8] sm:$0xff]  ;;  %s6918_s1 = smov 8   ;;  %s6919_s6 = smov 16  }
  0xc4   :  { %v275_v5 = vld [vmem:[%s7834_s5] sm:$0xff]  ;;  %6206 = vmatprep.subr.bf16.mxu0 %v6906_v0  ;;  %v276_v6 = vld [vmem:[%s7834_s5 + $0x8] sm:$0xff]  ;;  %s6920_s30 = smov 24   ;;  %s6923_s0 = smov [#allocation3]  }
  0xc5   :  { %v7134_v7 = vadd.f32 %v275_v5, %v273_v3  ;;  %v7136_v8 = vadd.f32 %v276_v6, %v274_v4  ;;  %s269_s5 = sshll.u32 %s6923_s0, 4  ;;  %s270_s5 = int_to_ptr.vmem [resolvable:$true] %s269_s5 }
  0xc7   :  { %6207 = vmatpush3.bf16.msra.mxu0 %v6462_v2  ;;  %v279_v9 = vpack.c.bf16 %v7136_v8, %v7134_v7 }
  0xc8   :  { %6227 = vmatprep.subr.mxu0 %v6906_v0 }
  0xca   :  { %6209 = vmatmul.mubr.msk.bf16.vlgmr.msra.gmra.mxu0 %vm303_vm1, %v279_v9 }
  0xcb   :  { %6229 = vmatprep.mubr.msk.f32.mxu0 %vm6907_vm0, %v6906_v0 }
 0x18a   :  { %v341_v11 = vpop.f32.mrf.mxu0 }
 0x18b   :  { %v7144_v12 = vadd.f32 %v5905_v10, %v341_v11 }
 0x18c   :  { %v6210_v13 = vpop.f32.mrf.mxu0 }
 0x18d   :  { %437 = vrot.lane.b32.xlu1 %v7144_v12, %s6890_s28  ;;  %349 = vrot.lane.b32.xlu0 %v7144_v12, %s6908_s15 }
 0x18e   :  { %v344_v14 = vpop.f32.mrf.mxu0 }
 0x18f   :  { %v7150_v15 = vadd.f32 %v5905_v10, %v344_v14 }
 0x190   :  { %v6211_v16 = vpop.f32.mrf.mxu0 }
 0x191   :  { %515 = vrot.lane.b32.xlu1 %v7144_v12, %s6909_s26 }
 0x195   :  { %513 = vrot.lane.b32.xlu1 %v7144_v12, %s6910_s13 }
 0x199   :  { %680 = vrot.lane.b32.xlu1 %v7144_v12, %s6911_s9 }
 0x19d   :  { %678 = vrot.lane.b32.xlu1 %v7144_v12, %s6912_s2 }
 0x1ff   :  { %v350_v17 = vpop.permute.xlu0 %349  ;;  %v438_v18 = vpop.permute.xlu1 %437 }
 0x200   :  { %6213 = vmatpush3.xpose.msk.msra.mxu1 %vm351_vm2, %v350_v17 }
 0x201   :  { %6217 = vmatprep.subr.mxu1 %v6906_v0 }
 0x203   :  { %6215 = vmatmul.mubr.msk.f32.vlgmr.msra.gmra.mxu1 %vm351_vm2, %v7144_v12  ;;  %v516_v27 = vpop.permute.xlu1 %515 }
 0x204   :  { %6218 = vmatpush3.msra.mxu1 %v438_v18  ;;  %6219 = vmatprep.mubr.msk.f32.mxu1 %vm6907_vm0, %v6906_v0 }
 0x205   :  { %6222 = vmatprep.subr.mxu1 %v6906_v0 }
 0x207   :  { %v514_v28 = vpop.permute.xlu1 %513 }
 0x20b   :  { %v681_v29 = vpop.permute.xlu1 %680 }
 0x20f   :  { %v679_v30 = vpop.permute.xlu1 %678 }
 0x2c3   :  { %v422_v19 = vpop.f32.mrf.mxu1 }
 0x2c4   :  { %v426_v20 = vsel %vm351_vm2, %v422_v19, -inf }
 0x2c5   :  { %427 = vmax.xlane.f32.xlu0 %v426_v20  ;;  %v6216_v21 = vpop.f32.mrf.mxu1 }
 0x2db   :  { %845 = vrot.lane.b32.xlu0 %v7144_v12, %s6913_s4 }
 0x2df   :  { %1354 = vrot.lane.b32.xlu0 %v7150_v15, %s6912_s2 }
 0x2e3   :  { %1519 = vrot.lane.b32.xlu0 %v7150_v15, %s6914_s16 }
 0x34e   :  { %v428_v22 = vpop.xlane.xlu0 %427 }
 0x34f   :  { %v429_v23 = vsub.f32 %v422_v19, %v428_v22 }
 0x351   :  { %v430_v24 = vmul.f32 1.442695, %v429_v23 }
 0x352   :  { %v846_v37 = vpop.permute.xlu0 %845 }
 0x353   :  { %6469 = vpow2.f32 %v430_v24 }
 0x356   :  { %v1355_v40 = vpop.permute.xlu0 %1354 }
 0x35a   :  { %v1520_v42 = vpop.permute.xlu0 %1519 }
 0x360   :  { %v6470_v25 = vpop.eup %6469 }
 0x361   :  { %v432_v26 = vsel %vm351_vm2, %v6470_v25, 0.0 }
 0x362   :  { %433 = vadd.xlane.f32.xlu1 %v432_v26 }
 0x373   :  { %843 = vrot.lane.b32.xlu1 %v7144_v12, %s6914_s16 }
 0x377   :  { %1026 = vrot.lane.b32.xlu1 %v7150_v15, %s6908_s15 }
 0x37b   :  { %1191 = vrot.lane.b32.xlu1 %v7150_v15, %s6909_s26 }
 0x37f   :  { %1189 = vrot.lane.b32.xlu1 %v7150_v15, %s6910_s13 }
 0x383   :  { %1356 = vrot.lane.b32.xlu1 %v7150_v15, %s6911_s9 }
 0x387   :  { %1521 = vrot.lane.b32.xlu1 %v7150_v15, %s6913_s4 }
 0x3eb   :  { %v434_v31 = vpop.xlane.xlu1 %433 }
 0x3ec   :  { %6471 = vrcp.f32 %v434_v31 }
 0x3ef   :  { %v844_v32 = vpop.permute.xlu1 %843 }
 0x3f3   :  { %v1027_v35 = vpop.permute.xlu1 %1026 }
 0x3f7   :  { %v1192_v36 = vpop.permute.xlu1 %1191 }
 0x3f9   :  { %v6472_v33 = vpop.eup %6471 }
 0x3fa   :  { %v436_v34 = vmul.f32 %v6472_v33, %v6470_v25 }
 0x3fb   :  { %v1190_v38 = vpop.permute.xlu1 %1189 }
 0x3fc   :  { %6220 = vmatmul.mubr.msk.f32.vlgmr.msra.gmra.mxu1 %vm351_vm2, %v436_v34 }
 0x3fd   :  { %6223 = vmatpush3.xpose.msk.msra.mxu1 %vm351_vm2, %v516_v27  ;;  %6224 = vmatprep.mubr.msk.f32.mxu1 %vm6907_vm0, %v6906_v0 }
 0x3fe   :  { %6232 = vmatprep.subr.mxu1 %v6906_v0 }
 0x3ff   :  { %v1357_v39 = vpop.permute.xlu1 %1356 }
 0x400   :  { %6225 = vmatmul.mubr.msk.f32.vlgmr.msra.gmra.mxu1 %vm351_vm2, %v514_v28 }
 0x401   :  { %6233 = vmatpush3.xpose.msk.msra.mxu1 %vm351_vm2, %v681_v29  ;;  %6234 = vmatprep.mubr.msk.f32.mxu1 %vm6907_vm0, %v6906_v0 }
 0x402   :  { %6242 = vmatprep.subr.mxu1 %v6906_v0 }
 0x403   :  { %v1522_v41 = vpop.permute.xlu1 %1521 }
 0x404   :  { %6235 = vmatmul.mubr.msk.f32.vlgmr.msra.gmra.mxu1 %vm351_vm2, %v679_v30 }
 0x405   :  { %6243 = vmatpush3.xpose.msk.msra.mxu1 %vm351_vm2, %v846_v37  ;;  %6244 = vmatprep.mubr.msk.f32.mxu1 %vm6907_vm0, %v6906_v0 }
 0x406   :  { %6252 = vmatprep.subr.mxu1 %v6906_v0 }
 0x408   :  { %6245 = vmatmul.mubr.msk.f32.vlgmr.msra.gmra.mxu1 %vm351_vm2, %v844_v32 }
 0x409   :  { %6253 = vmatpush3.xpose.msk.msra.mxu1 %vm351_vm2, %v1027_v35  ;;  %6254 = vmatprep.mubr.msk.f32.mxu1 %vm6907_vm0, %v6906_v0 }
 0x40a   :  { %6262 = vmatprep.subr.mxu1 %v6906_v0 }
 0x40c   :  { %6255 = vmatmul.mubr.msk.f32.vlgmr.msra.gmra.mxu1 %vm351_vm2, %v7150_v15 }
 0x40d   :  { %6263 = vmatpush3.xpose.msk.msra.mxu1 %vm351_vm2, %v1192_v36  ;;  %6264 = vmatprep.mubr.msk.f32.mxu1 %vm6907_vm0, %v6906_v0 }
 0x40e   :  { %6272 = vmatprep.subr.mxu1 %v6906_v0 }
 0x410   :  { %6265 = vmatmul.mubr.msk.f32.vlgmr.msra.gmra.mxu1 %vm351_vm2, %v1190_v38 }
 0x411   :  { %6273 = vmatpush3.xpose.msk.msra.mxu1 %vm351_vm2, %v1357_v39  ;;  %6274 = vmatprep.mubr.msk.f32.mxu1 %vm6907_vm0, %v6906_v0 }
 0x412   :  { %6282 = vmatprep.subr.mxu1 %v6906_v0 }
 0x414   :  { %6275 = vmatmul.mubr.msk.f32.vlgmr.msra.gmra.mxu1 %vm351_vm2, %v1355_v40 }
 0x415   :  { %6283 = vmatpush3.xpose.msk.msra.mxu1 %vm351_vm2, %v1522_v41  ;;  %6284 = vmatprep.mubr.msk.f32.mxu1 %vm6907_vm0, %v6906_v0 }
 0x416   :  { %6292 = vmatprep.subr.bf16.mxu1 %v6906_v0 }
 0x418   :  { %6285 = vmatmul.mubr.msk.f32.vlgmr.msra.gmra.mxu1 %vm351_vm2, %v1520_v42 }
 0x419   :  { %6296 = vmatprep.mubr.msk.bf16.mxu1 %vm6907_vm0, %v6906_v0 }
 0x4bc   :  { %v7226_v43 = vpop.f32.mrf.mxu1 }
 0x4be   :  { %v6221_v44 = vpop.f32.mrf.mxu1 }
 0x4c0   :  { %v587_v45 = vpop.f32.mrf.mxu1 }
 0x4c1   :  { %v591_v46 = vsel %vm351_vm2, %v587_v45, -inf }
 0x4c2   :  { %v6226_v47 = vpop.f32.mrf.mxu1  ;;  %592 = vmax.xlane.f32.xlu1 %v591_v46 }
 0x4c4   :  { %v752_v48 = vpop.f32.mrf.mxu1 }
 0x4c5   :  { %v756_v49 = vsel %vm351_vm2, %v752_v48, -inf }
 0x4c6   :  { %v6236_v50 = vpop.f32.mrf.mxu1  ;;  %757 = vmax.xlane.f32.xlu0 %v756_v49 }
 0x4c8   :  { %v917_v51 = vpop.f32.mrf.mxu1 }
 0x4c9   :  { %v921_v52 = vsel %vm351_vm2, %v917_v51, -inf }
 0x4ca   :  { %v6246_v53 = vpop.f32.mrf.mxu1  ;;  %922 = vmax.xlane.f32.xlu0 %v921_v52 }
 0x4cc   :  { %v1098_v54 = vpop.f32.mrf.mxu1 }
 0x4cd   :  { %v1102_v55 = vsel %vm351_vm2, %v1098_v54, -inf }
 0x4ce   :  { %1103 = vmax.xlane.f32.xlu1 %v1102_v55  ;;  %v6256_v56 = vpop.f32.mrf.mxu1 }
 0x4d0   :  { %v1263_v57 = vpop.f32.mrf.mxu1 }
 0x4d1   :  { %v1267_v58 = vsel %vm351_vm2, %v1263_v57, -inf }
 0x4d2   :  { %1268 = vmax.xlane.f32.xlu0 %v1267_v58  ;;  %v6266_v59 = vpop.f32.mrf.mxu1 }
 0x4d4   :  { %v1428_v60 = vpop.f32.mrf.mxu1 }
 0x4d5   :  { %v1432_v61 = vsel %vm351_vm2, %v1428_v60, -inf }
 0x4d6   :  { %1433 = vmax.xlane.f32.xlu1 %v1432_v61  ;;  %v6276_v62 = vpop.f32.mrf.mxu1 }
 0x4d8   :  { %v1593_v63 = vpop.f32.mrf.mxu1 }
 0x4d9   :  { %v1597_v1 = vsel %vm351_vm2, %v1593_v63, -inf }
 0x4da   :  { %1598 = vmax.xlane.f32.xlu0 %v1597_v1  ;;  %v6286_v2 = vpop.f32.mrf.mxu1 }
 0x4e7   :  { %767 = vrot.lane.b32.xlu1 %v7144_v12, %s6915_s17 }
 0x4eb   :  { %932 = vrot.lane.b32.xlu1 %v7144_v12, %s6916_s8 }
 0x4f0   :  { %602 = vrot.lane.b32.xlu0 %v7144_v12, %s6917_s10 }
 0x54b   :  { %v593_v3 = vpop.xlane.xlu1 %592 }
 0x54c   :  { %v594_v4 = vsub.f32 %v587_v45, %v593_v3 }
 0x54e   :  { %v595_v5 = vmul.f32 1.442695, %v594_v4 }
 0x54f   :  { %v758_v6 = vpop.xlane.xlu0 %757 }
 0x550   :  { %6473 = vpow2.f32 %v595_v5  ;;  %v759_v9 = vsub.f32 %v752_v48, %v758_v6 }
 0x552   :  { %v760_v10 = vmul.f32 1.442695, %v759_v9 }
 0x553   :  { %v923_v11 = vpop.xlane.xlu0 %922 }
 0x554   :  { %6475 = vpow2.f32 %v760_v10  ;;  %v924_v20 = vsub.f32 %v917_v51, %v923_v11 }
 0x556   :  { %v925_v23 = vmul.f32 1.442695, %v924_v20 }
 0x557   :  { %v1104_v21 = vpop.xlane.xlu1 %1103 }
 0x558   :  { %v1105_v22 = vsub.f32 %v1098_v54, %v1104_v21  ;;  %6477 = vpow2.f32 %v925_v23 }
 0x55a   :  { %v1106_v26 = vmul.f32 1.442695, %v1105_v22 }
 0x55b   :  { %v1269_v16 = vpop.xlane.xlu0 %1268 }
 0x55c   :  { %v1270_v24 = vsub.f32 %v1263_v57, %v1269_v16  ;;  %6479 = vpow2.f32 %v1106_v26  ;;  %v6463_v16 = vld [vmem:[#allocation7 + $0x8] sm:$0xff]  }
 0x55d   :  { %v6474_v13 = vpop.eup %6473  ;;  %6293 = vmatpush3.bf16.msra.mxu1 %v6463_v16 }
 0x55e   :  { %v597_v14 = vsel %vm351_vm2, %v6474_v13, 0.0  ;;  %v1271_v28 = vmul.f32 1.442695, %v1270_v24  ;;  %6294 = vmatprep.subr.bf16.mxu1 %v6906_v0 }
 0x55f   :  { %598 = vadd.xlane.f32.xlu1 %v597_v14  ;;  %v1434_v25 = vpop.xlane.xlu1 %1433 }
 0x560   :  { %v1435_v27 = vsub.f32 %v1428_v60, %v1434_v25  ;;  %6481 = vpow2.f32 %v1271_v28 }
 0x561   :  { %v6476_v17 = vpop.eup %6475 }
 0x562   :  { %v762_v18 = vsel %vm351_vm2, %v6476_v17, 0.0  ;;  %v1436_v30 = vmul.f32 1.442695, %v1435_v27 }
 0x563   :  { %763 = vadd.xlane.f32.xlu0 %v762_v18  ;;  %v1599_v19 = vpop.xlane.xlu0 %1598  ;;  %v768_v42 = vpop.permute.xlu1 %767 }
 0x564   :  { %v1600_v29 = vsub.f32 %v1593_v63, %v1599_v19  ;;  %6483 = vpow2.f32 %v1436_v30  ;;  %v6464_v19 = vld [vmem:[#allocation7] sm:$0xff]  }
 0x565   :  { %v6478_v32 = vpop.eup %6477  ;;  %6295 = vmatpush3.bf16.msra.mxu1 %v6464_v19  ;;  %v2000_v19 = vld [vmem:[#allocation10 + $0x90] sm:$0xff] }
 0x566   :  { %v1601_v31 = vmul.f32 1.442695, %v1600_v29  ;;  %v927_v34 = vsel %vm351_vm2, %v6478_v32, 0.0 }
 0x567   :  { %v603_v12 = vpop.permute.xlu0 %602  ;;  %v933_v44 = vpop.permute.xlu1 %932 }
 0x568   :  { %6228 = vmatpush3.msra.mxu0 %v603_v12  ;;  %6485 = vpow2.f32 %v1601_v31 }
 0x569   :  { %6237 = vmatprep.subr.mxu0 %v6906_v0  ;;  %v6480_v33 = vpop.eup %6479 }
 0x56a   :  { %v1108_v38 = vsel %vm351_vm2, %v6480_v33, 0.0 }
 0x56d   :  { %v6482_v35 = vpop.eup %6481 }
 0x56e   :  { %v1273_v37 = vsel %vm351_vm2, %v6482_v35, 0.0 }
 0x570   :  { %1278 = vrot.lane.b32.xlu1 %v7150_v15, %s6917_s10 }
 0x571   :  { %v6484_v36 = vpop.eup %6483 }
 0x572   :  { %v1438_v41 = vsel %vm351_vm2, %v6484_v36, 0.0 }
 0x575   :  { %v7251_v39 = vpop.eup %6485 }
 0x576   :  { %v1603_v40 = vsel %vm351_vm2, %v7251_v39, 0.0 }
 0x579   :  { %1113 = vrot.lane.b32.xlu0 %v7150_v15, %s6890_s28 }
 0x594   :  { %928 = vadd.xlane.f32.xlu1 %v927_v34 }
 0x598   :  { %1274 = vadd.xlane.f32.xlu1 %v1273_v37  ;;  %1109 = vadd.xlane.f32.xlu0 %v1108_v38 }
 0x59c   :  { %1604 = vadd.xlane.f32.xlu1 %v1603_v40  ;;  %1439 = vadd.xlane.f32.xlu0 %v1438_v41 }
 0x5ad   :  { %1608 = vrot.lane.b32.xlu1 %v7150_v15, %s6916_s8 }
 0x5b2   :  { %1443 = vrot.lane.b32.xlu0 %v7150_v15, %s6915_s17 }
 0x5e8   :  { %v599_v45 = vpop.xlane.xlu1 %598 }
 0x5e9   :  { %6487 = vrcp.f32 %v599_v45  ;;  %v5933_v45 = vld [vmem:[#allocation9] ss:$0 sm:$0xff] }
 0x5ec   :  { %v764_v46 = vpop.xlane.xlu0 %763  ;;  %v1279_v15 = vpop.permute.xlu1 %1278 }
 0x5ed   :  { %6489 = vrcp.f32 %v764_v46 }
 0x5f0   :  { %v1114_v51 = vpop.permute.xlu0 %1113 }
 0x5f6   :  { %v6488_v47 = vpop.eup %6487 }
 0x5f7   :  { %v601_v48 = vmul.f32 %v6488_v47, %v6474_v13 }
 0x5f9   :  { %6230 = vmatmul.mubr.msk.f32.vlgmr.msra.gmra.mxu0 %vm351_vm2, %v601_v48 }
 0x5fa   :  { %v6490_v49 = vpop.eup %6489  ;;  %6238 = vmatpush3.msra.mxu0 %v768_v42  ;;  %6239 = vmatprep.mubr.msk.f32.mxu0 %vm6907_vm0, %v6906_v0 }
 0x5fb   :  { %6247 = vmatprep.subr.mxu0 %v6906_v0  ;;  %v766_v50 = vmul.f32 %v6490_v49, %v6476_v17 }
 0x5fd   :  { %6240 = vmatmul.mubr.msk.f32.vlgmr.msra.gmra.mxu0 %vm351_vm2, %v766_v50 }
 0x5fe   :  { %6248 = vmatpush3.msra.mxu0 %v933_v44  ;;  %6249 = vmatprep.mubr.msk.f32.mxu0 %vm6907_vm0, %v6906_v0 }
 0x5ff   :  { %6257 = vmatprep.subr.mxu0 %v6906_v0 }
 0x61d   :  { %v929_v52 = vpop.xlane.xlu1 %928 }
 0x61e   :  { %6491 = vrcp.f32 %v929_v52 }
 0x621   :  { %v1110_v53 = vpop.xlane.xlu0 %1109  ;;  %v1275_v54 = vpop.xlane.xlu1 %1274 }
 0x622   :  { %6493 = vrcp.f32 %v1110_v53 }
 0x623   :  { %6495 = vrcp.f32 %v1275_v54 }
 0x625   :  { %v1440_v55 = vpop.xlane.xlu0 %1439  ;;  %v1605_v56 = vpop.xlane.xlu1 %1604 }
 0x626   :  { %6497 = vrcp.f32 %v1440_v55 }
 0x627   :  { %6499 = vrcp.f32 %v1605_v56 }
 0x629   :  { %v1444_v1 = vpop.permute.xlu0 %1443  ;;  %v1609_v4 = vpop.permute.xlu1 %1608 }
 0x62b   :  { %v6492_v57 = vpop.eup %6491 }
 0x62c   :  { %v931_v58 = vmul.f32 %v6492_v57, %v6478_v32 }
 0x62e   :  { %6250 = vmatmul.mubr.msk.f32.vlgmr.msra.gmra.mxu0 %vm351_vm2, %v931_v58 }
 0x62f   :  { %v6494_v59 = vpop.eup %6493  ;;  %6258 = vmatpush3.msra.mxu0 %v1114_v51  ;;  %6259 = vmatprep.mubr.msk.f32.mxu0 %vm6907_vm0, %v6906_v0 }
 0x630   :  { %6267 = vmatprep.subr.mxu0 %v6906_v0  ;;  %v1112_v60 = vmul.f32 %v6494_v59, %v6480_v33  ;;  %v6496_v61 = vpop.eup %6495 }
 0x631   :  { %v1277_v62 = vmul.f32 %v6496_v61, %v6482_v35 }
 0x632   :  { %6260 = vmatmul.mubr.msk.f32.vlgmr.msra.gmra.mxu0 %vm351_vm2, %v1112_v60 }
 0x633   :  { %6268 = vmatpush3.msra.mxu0 %v1279_v15  ;;  %6269 = vmatprep.mubr.msk.f32.mxu0 %vm6907_vm0, %v6906_v0  ;;  %v6498_v63 = vpop.eup %6497 }
 0x634   :  { %6277 = vmatprep.subr.mxu0 %v6906_v0  ;;  %v1442_v2 = vmul.f32 %v6498_v63, %v6484_v36  ;;  %v6500_v3 = vpop.eup %6499  ;;  %v1820_v63 = vld [vmem:[#allocation10 + $0x80] sm:$0xff] }
 0x635   :  { %v1607_v5 = vmul.f32 %v6500_v3, %v7251_v39  ;;  %v1823_v3 = vld [vmem:[#allocation10 + $0xc8] sm:$0xff] }
 0x636   :  { %6270 = vmatmul.mubr.msk.f32.vlgmr.msra.gmra.mxu0 %vm351_vm2, %v1277_v62 }
 0x637   :  { %6278 = vmatpush3.msra.mxu0 %v1444_v1  ;;  %6279 = vmatprep.mubr.msk.f32.mxu0 %vm6907_vm0, %v6906_v0  ;;  %v1822_v1 = vld [vmem:[#allocation10 + $0xc0] sm:$0xff] }
 0x638   :  { %6287 = vmatprep.subr.mxu0 %v6906_v0 }
 0x63a   :  { %6280 = vmatmul.mubr.msk.f32.vlgmr.msra.gmra.mxu0 %vm351_vm2, %v1442_v2  ;;  %v5944_v2 = vcombine.high %v1820_v63, %v1822_v1 }
 0x63b   :  { %6288 = vmatpush3.msra.mxu0 %v1609_v4  ;;  %6289 = vmatprep.mubr.msk.f32.mxu0 %vm6907_vm0, %v6906_v0  ;;  %v5943_v4 = vcombine.low %v1820_v63, %v1822_v1 }
 0x63c   :  { %1901 = vmatprep.subr.bf16.mxu0 %v5944_v2  ;;  %v7323_v2 = vld [vmem:[#allocation13 + $0x80] sm:$0xff] }
 0x63e   :  { %6290 = vmatmul.mubr.msk.f32.vlgmr.msra.gmra.mxu0 %vm351_vm2, %v1607_v5 }
 0x63f   :  { %1902 = vmatpush1.bf16.msra.mxu0 %v5943_v4  ;;  %v7327_v4 = vld [vmem:[#allocation13 + $0x88] sm:$0xff] }
 0x6b9   :  { %v674_v6 = vpop.f32.mrf.mxu0 }
 0x6bb   :  { %v6231_v9 = vpop.f32.mrf.mxu0 }
 0x6bc   :  { %v1816_v9 = vld [vmem:[#allocation10] sm:$0xff] }
 0x6bd   :  { %v839_v10 = vpop.f32.mrf.mxu0 }
 0x6bf   :  { %v6241_v11 = vpop.f32.mrf.mxu0 }
 0x6c0   :  { %v1817_v11 = vld [vmem:[#allocation10 + $0x8] sm:$0xff] }
 0x6ee   :  { %v1004_v13 = vpop.f32.mrf.mxu0 }
 0x6f0   :  { %v6251_v14 = vpop.f32.mrf.mxu0 }
 0x6f1   :  { %v1819_v14 = vld [vmem:[#allocation10 + $0x48] sm:$0xff] }
 0x6f2   :  { %v1185_v17 = vpop.f32.mrf.mxu0 }
 0x6f4   :  { %v6261_v18 = vpop.f32.mrf.mxu0 }
 0x6f5   :  { %v5942_v18 = vcombine.high %v1817_v11, %v1819_v14 }
 0x6f6   :  { %v1350_v12 = vpop.f32.mrf.mxu0 }
 0x6f7   :  { %v6431_v20 = vpack.i.bf16 %v1350_v12, %v674_v6  ;;  %v2002_v12 = vld [vmem:[#allocation10 + $0xd0] sm:$0xff] }
 0x6f8   :  { %v6271_v21 = vpop.f32.mrf.mxu0 }
 0x6f9   :  { %6432 = vrot.lane.b32.xlu0 %v6431_v20, %s6918_s1  ;;  %v2001_v20 = vld [vmem:[#allocation10 + $0x98] sm:$0xff]  ;;  %v6921_v21 = vmov 0  }
 0x6fa   :  { %v1515_v22 = vpop.f32.mrf.mxu0  ;;  %1921 = vmatprep.mubr.bf16.mxu0 %v6921_v21 }
 0x6fb   :  { %v6436_v23 = vpack.i.bf16 %v1515_v22, %v839_v10  ;;  %v1818_v10 = vld [vmem:[#allocation10 + $0x40] sm:$0xff]  ;;  %v5954_v22 = vcombine.high %v2000_v19, %v2002_v12 }
 0x6fc   :  { %v6281_v24 = vpop.f32.mrf.mxu0  ;;  %v5939_v16 = vcombine.low %v1816_v9, %v1818_v10 }
 0x6fd   :  { %6437 = vrot.lane.b32.xlu1 %v6436_v23, %s6919_s6  ;;  %v2003_v23 = vld [vmem:[#allocation10 + $0xd8] sm:$0xff]  ;;  %v5953_v24 = vcombine.low %v2000_v19, %v2002_v12 }
 0x6fe   :  { %v1680_v25 = vpop.f32.mrf.mxu0 }
 0x6ff   :  { %v6441_v26 = vpack.i.bf16 %v1680_v25, %v1004_v13  ;;  %v5940_v13 = vcombine.high %v1816_v9, %v1818_v10  ;;  %v5955_v25 = vcombine.low %v2001_v20, %v2003_v23 }
 0x700   :  { %v6291_v27 = vpop.f32.mrf.mxu0 }
 0x701   :  { %6442 = vrot.lane.b32.xlu0 %v6441_v26, %s6920_s30  ;;  %1903 = vmatprep.subr.bf16.mxu0 %v5940_v13  ;;  %v5956_v26 = vcombine.high %v2001_v20, %v2003_v23  ;;  %v1826_v13 = vlaneseq }
 0x702   :  { %1904 = vmatpush1.bf16.msra.mxu0 %v5939_v16 }
 0x703   :  { %2079 = vmatprep.subr.bf16.mxu0 %v5954_v22  ;;  %v1827_v19 = vshrl.u32 %v1826_v13, 7 }
 0x76b   :  { %v6433_v28 = vpop.permute.xlu0 %6432 }
 0x76c   :  { %v6435_v30 = vunpack.i.h.bf16 %v6433_v28  ;;  %v6434_v31 = vunpack.i.l.bf16 %v6433_v28 }
 0x76e   :  { %v1696_v35 = vsel %vm351_vm2, %v1185_v17, %v6435_v30  ;;  %v1020_v36 = vsel %vm351_vm2, %v7226_v43, %v6434_v31  ;;  %v5941_v17 = vcombine.low %v1817_v11, %v1819_v14 }
 0x76f   :  { %v6438_v29 = vpop.permute.xlu1 %6437 }
 0x770   :  { %v6440_v32 = vunpack.i.h.bf16 %v6438_v29  ;;  %v6439_v33 = vunpack.i.l.bf16 %v6438_v29 }
 0x772   :  { %v1697_v39 = vsel %vm1021_vm3, %v1696_v35, %v6440_v32  ;;  %v1022_v40 = vsel %vm1021_vm3, %v1020_v36, %v6439_v33  ;;  %v5937_v35 = vld [vmem:[#allocation16] ss:$0 sm:$0xff] }
 0x773   :  { %v6443_v34 = vpop.permute.xlu0 %6442 }
 0x774   :  { %v6445_v37 = vunpack.i.h.bf16 %v6443_v34  ;;  %v6444_v38 = vunpack.i.l.bf16 %v6443_v34 }
 0x776   :  { %v1698_v41 = vsel %vm1023_vm4, %v1697_v39, %v6445_v37  ;;  %v1024_v42 = vsel %vm1023_vm4, %v1022_v40, %v6444_v38  ;;  %v5938_v39 = vld [vmem:[#allocation18] ss:$0 sm:$0xff] }
 0x777   :  { %v1699_v44 = vpack.c.bf16 %v1698_v41, %v1024_v42  ;;  %v1996_v41 = vld [vmem:[#allocation10 + $0x10] sm:$0xff] }
 0x778   :  { %v1998_v42 = vld [vmem:[#allocation10 + $0x50] sm:$0xff] }
 0x779   :  { %6297 = vmatmul.mubr.msk.bf16.vlgmr.msra.gmra.mxu1 %vm303_vm1, %v1699_v44  ;;  %v1997_v44 = vld [vmem:[#allocation10 + $0x18] sm:$0xff] }
 0x77a   :  { %1964 = vmatprep.mubr.bf16.mxu1 %v6921_v21 }
 0x839   :  { %v1760_v46 = vpop.f32.mrf.mxu1 }
 0x83a   :  { %v1761_v47 = vadd.f32 %v5933_v45, %v1760_v46 }
 0x83b   :  { %v6298_v48 = vpop.f32.mrf.mxu1 }
 0x83c   :  { %v1767_v49 = vadd.f32 %v1761_v47, %v7134_v7 }
 0x83d   :  { %v1763_v43 = vpop.f32.mrf.mxu1 }
 0x83e   :  { %v1764_v50 = vadd.f32 %v5933_v45, %v1763_v43  ;;  %v1771_v15 = vsel %vm303_vm1, %v1767_v49, 0.0  ;;  %v1999_v45 = vld [vmem:[#allocation10 + $0x58] sm:$0xff] }
 0x83f   :  { %1772 = vadd.xlane.f32.xlu1 %v1771_v15  ;;  %v6299_v51 = vpop.f32.mrf.mxu1  ;;  %v5952_v43 = vcombine.high %v1997_v44, %v1999_v45  ;;  %v5951_v15 = vcombine.low %v1997_v44, %v1999_v45 }
 0x840   :  { %v1768_v52 = vadd.f32 %v1764_v50, %v7136_v8  ;;  %v1821_v8 = vld [vmem:[#allocation10 + $0x88] sm:$0xff]  ;;  %v5949_v50 = vcombine.low %v1996_v41, %v1998_v42  ;;  %v2170_v51 = vld [vmem:[#allocation13 + $0x90] sm:$0xff] }
 0x841   :  { %v5945_v5 = vcombine.low %v1821_v8, %v1823_v3  ;;  %v5946_v6 = vcombine.high %v1821_v8, %v1823_v3  ;;  %v7325_v3 = vld [vmem:[#allocation13 + $0xc0] sm:$0xff] }
 0x842   :  { %v1774_v53 = vsel %vm303_vm1, %v1768_v52, 0.0  ;;  %v5971_v9 = vcombine.low %v7323_v2, %v7325_v3 }
 0x843   :  { %1775 = vadd.xlane.f32.xlu0 %v1774_v53  ;;  %1944 = vmatprep.subr.bf16.mxu1 %v5946_v6  ;;  %v2171_v53 = vld [vmem:[#allocation13 + $0x98] sm:$0xff]  ;;  %v7331_v6 = vld [vmem:[#allocation13 + $0xc8] sm:$0xff] }
 0x844   :  { %1945 = vmatpush1.bf16.msra.mxu1 %v5945_v5  ;;  %v5972_v5 = vcombine.high %v7323_v2, %v7325_v3  ;;  %v5973_v10 = vcombine.low %v7327_v4, %v7331_v6  ;;  %v5974_v11 = vcombine.high %v7327_v4, %v7331_v6 }
 0x845   :  { %1946 = vmatprep.subr.bf16.mxu1 %v5942_v18 }
 0x848   :  { %1947 = vmatpush1.bf16.msra.mxu1 %v5941_v17 }
 0x849   :  { %2122 = vmatprep.subr.bf16.mxu1 %v5956_v26  ;;  %v2005_v26 = vld [vmem:[#allocation12 + $0x4] sm:$0xf] }
 0x8c8   :  { %v1773_v54 = vpop.xlane.xlu1 %1772 }
 0x8c9   :  { %v1778_v55 = vmul.f32 0.03125, %v1773_v54 }
 0x8cb   :  { %v1780_v56 = vsub.f32 %v1767_v49, %v1778_v55  ;;  %v5950_v49 = vcombine.high %v1996_v41, %v1998_v42  ;;  %v2173_v55 = vld [vmem:[#allocation13 + $0xd8] sm:$0xff] }
 0x8cc   :  { %v1776_v57 = vpop.xlane.xlu0 %1775 }
 0x8cd   :  { %v1779_v58 = vmul.f32 0.03125, %v1776_v57  ;;  %v1782_v59 = vmul.f32 %v1780_v56, %v1780_v56  ;;  %v5965_v57 = vcombine.low %v2171_v53, %v2173_v55 }
 0x8cf   :  { %v1781_v60 = vsub.f32 %v1768_v52, %v1779_v58  ;;  %v1784_v7 = vsel %vm303_vm1, %v1782_v59, 0.0  ;;  %v2172_v52 = vld [vmem:[#allocation13 + $0xd0] sm:$0xff]  ;;  %v5966_v58 = vcombine.high %v2171_v53, %v2173_v55 }
 0x8d0   :  { %1785 = vadd.xlane.f32.xlu0 %v1784_v7  ;;  %v5964_v54 = vcombine.high %v2170_v51, %v2172_v52  ;;  %v2166_v59 = vld [vmem:[#allocation13 + $0x10] sm:$0xff]  ;;  %v2167_v7 = vld [vmem:[#allocation13 + $0x18] sm:$0xff] }
 0x8d1   :  { %v1783_v61 = vmul.f32 %v1781_v60, %v1781_v60 }
 0x8d3   :  { %v1787_v62 = vsel %vm303_vm1, %v1783_v61, 0.0 }
 0x8d4   :  { %1788 = vadd.xlane.f32.xlu1 %v1787_v62  ;;  %v2169_v62 = vld [vmem:[#allocation13 + $0x58] sm:$0xff] }
 0x8d5   :  { %v5961_v1 = vcombine.low %v2167_v7, %v2169_v62  ;;  %v5962_v8 = vcombine.high %v2167_v7, %v2169_v62 }
 0x959   :  { %v1786_v27 = vpop.xlane.xlu0 %1785 }
 0x95a   :  { %v1790_v28 = vmul.f32 0.03125, %v1786_v27  ;;  %v7351_v27 = vsub.s32 0, %v1827_v19 }
 0x95c   :  { %v1792_v29 = vadd.f32 1e-05, %v1790_v28  ;;  %v7353_v28 = vsub.s32 2, %v1827_v19 }
 0x95d   :  { %v1789_v30 = vpop.xlane.xlu1 %1788 }
 0x95e   :  { %6501 = vrsqrt.f32 %v1792_v29  ;;  %v1791_v31 = vmul.f32 0.03125, %v1789_v30 }
 0x960   :  { %v1793_v32 = vadd.f32 1e-05, %v1791_v31 }
 0x962   :  { %6503 = vrsqrt.f32 %v1793_v32 }
 0x96b   :  { %v6502_v33 = vpop.eup %6501 }
 0x96c   :  { %v1796_v34 = vmul.f32 %v6502_v33, %v1780_v56  ;;  %v5963_v56 = vcombine.low %v2170_v51, %v2172_v52  ;;  %v2010_v33 = vrot.slane %v2005_v26, %v7351_v27 }
 0x96e   :  { %v1804_v37 = vmul.f32 %v5937_v35, %v1796_v34  ;;  %v2018_v34 = vrot.slane %v2005_v26, %v7353_v28 }
 0x96f   :  { %v6504_v36 = vpop.eup %6503 }
 0x970   :  { %v1797_v38 = vmul.f32 %v6504_v36, %v1781_v60  ;;  %v7305_v46 = vadd.f32 %v5938_v39, %v1804_v37  ;;  %v2168_v60 = vld [vmem:[#allocation13 + $0x50] sm:$0xff] }
 0x971   :  { %v5960_v61 = vcombine.high %v2166_v59, %v2168_v60  ;;  %v5959_v63 = vcombine.low %v2166_v59, %v2168_v60  ;;  %v1824_v37 = vld [vmem:[#allocation12] sm:$0xf] }
 0x972   :  { %v1805_v40 = vmul.f32 %v5937_v35, %v1797_v38 }
 0x974   :  { %v7307_v47 = vadd.f32 %v5938_v39, %v1805_v40 }
 0x976   :  { %v7311_v48 = vpack.c.bf16 %v7307_v47, %v7305_v46 }
 0x978   :  { %5947 = vmatmul.mubr.msk.bf16.vlgmr.msra.gmra.mxu0 %vm303_vm1, %v7311_v48  ;;  %5948 = vmatmul.mubr.msk.bf16.vlgmr.msra.gmra.mxu1 %vm303_vm1, %v7311_v48 }
 0x979   :  { %2080 = vmatpush1.bf16.msra.mxu0 %v5953_v24  ;;  %2123 = vmatpush1.bf16.msra.mxu1 %v5955_v25  ;;  %v7347_v24 = vsub.s32 1, %v1827_v19  ;;  %v7349_v25 = vsub.s32 3, %v1827_v19  ;;  %v1988_v19 = vld [vmem:[#allocation13 + $0x8] sm:$0xff] }
 0x97a   :  { %2081 = vmatprep.subr.bf16.mxu0 %v5950_v49  ;;  %2124 = vmatprep.subr.bf16.mxu1 %v5952_v43 }
 0x97b   :  { %2099 = vmatprep.mubr.bf16.mxu0 %v6921_v21  ;;  %2142 = vmatprep.mubr.bf16.mxu1 %v6921_v21  ;;  %v2014_v31 = vrot.slane %v2005_v26, %v7347_v24  ;;  %v2022_v32 = vrot.slane %v2005_v26, %v7349_v25  ;;  %v1833_v38 = vrot.slane %v1824_v37, %v7347_v24 }
 0x97c   :  { %v1841_v39 = vrot.slane %v1824_v37, %v7349_v25 }
 0x97d   :  { %2082 = vmatpush1.bf16.msra.mxu0 %v5949_v50  ;;  %2125 = vmatpush1.bf16.msra.mxu1 %v5951_v15 }
 0x97e   :  { %2226 = vmatprep.subr.bf16.mxu0 %v5964_v54  ;;  %2267 = vmatprep.subr.bf16.mxu1 %v5966_v58 }
 0x980   :  { %5957 = vmatmul.mubr.msk.bf16.vlgmr.msra.gmra.mxu0 %vm303_vm1, %v7311_v48  ;;  %5958 = vmatmul.mubr.msk.bf16.vlgmr.msra.gmra.mxu1 %vm303_vm1, %v7311_v48 }
 0x981   :  { %2227 = vmatpush1.bf16.xpose.msra.mxu0 %v5963_v56  ;;  %2268 = vmatpush1.bf16.xpose.msra.mxu1 %v5965_v57 }
 0x982   :  { %2228 = vmatprep.subr.bf16.mxu0 %v5960_v61  ;;  %2269 = vmatprep.subr.bf16.mxu1 %v5962_v8 }
 0x989   :  { %2229 = vmatpush1.bf16.xpose.msra.mxu0 %v5959_v63  ;;  %2270 = vmatpush1.bf16.xpose.msra.mxu1 %v5961_v1  ;;  %v1987_v63 = vld [vmem:[#allocation13] sm:$0xff] }
 0x98a   :  { %2348 = vmatprep.subr.bf16.mxu0 %v5972_v5  ;;  %2389 = vmatprep.subr.bf16.mxu1 %v5974_v11  ;;  %v1989_v1 = vld [vmem:[#allocation13 + $0x40] sm:$0xff] }
 0xa38   :  { %v7339_v14 = vpop.f32.mrf.mxu0  ;;  %v7341_v16 = vpop.f32.mrf.mxu1 }
 0xa3a   :  { %v1925_v17 = vpop.f32.mrf.mxu0  ;;  %v1968_v18 = vpop.f32.mrf.mxu1 }
 0xa3b   :  { %v1926_v56 = vadd.f32 %v1925_v17, %v1833_v38  ;;  %v1969_v57 = vadd.f32 %v1968_v18, %v1841_v39 }
 0xa3c   :  { %v7343_v12 = vpop.f32.mrf.mxu0  ;;  %v7345_v20 = vpop.f32.mrf.mxu1 }
 0xa3e   :  { %v1929_v22 = vpop.f32.mrf.mxu0  ;;  %v1972_v23 = vpop.f32.mrf.mxu1 }
 0xa3f   :  { %v1930_v43 = vadd.f32 %v1929_v22, %v1833_v38  ;;  %v1973_v50 = vadd.f32 %v1972_v23, %v1841_v39  ;;  %v1990_v22 = vld [vmem:[#allocation13 + $0x48] sm:$0xff]  ;;  %v2424_v38 = vld [vmem:[#allocation10 + $0xa8] sm:$0xff] }
 0xa40   :  { %v2101_v29 = vpop.f32.mrf.mxu0  ;;  %v2144_v30 = vpop.f32.mrf.mxu1  ;;  %v2426_v39 = vld [vmem:[#allocation10 + $0xe8] sm:$0xff] }
 0xa41   :  { %v2102_v15 = vadd.f32 %v2101_v29, %v2010_v33  ;;  %v2145_v51 = vadd.f32 %v2144_v30, %v2018_v34  ;;  %v1980_v8 = vmax.f32 %v1930_v43, 0.0  ;;  %v1982_v5 = vmax.f32 %v1973_v50, 0.0  ;;  %v2419_v43 = vld [vmem:[#allocation10 + $0x20] sm:$0xff]  ;;  %v2420_v50 = vld [vmem:[#allocation10 + $0x28] sm:$0xff] }
 0xa42   :  { %v2103_v35 = vpop.f32.mrf.mxu0  ;;  %v2146_v36 = vpop.f32.mrf.mxu1  ;;  %v1976_v29 = vmax.f32 %v1926_v56, 0.0  ;;  %v1978_v30 = vmax.f32 %v1969_v57, 0.0  ;;  %v5982_v6 = vcombine.high %v2424_v38, %v2426_v39  ;;  %v2593_v57 = vld [vmem:[#allocation13 + $0xa0] sm:$0xff] }
 0xa43   :  { %v2104_v42 = vadd.f32 %v2103_v35, %v2014_v31  ;;  %v2147_v44 = vadd.f32 %v2146_v36, %v2022_v32  ;;  %v2153_v11 = vmax.f32 %v2102_v15, 0.0  ;;  %v2155_v13 = vmax.f32 %v2145_v51, 0.0  ;;  %v2423_v35 = vld [vmem:[#allocation10 + $0xa0] sm:$0xff]  ;;  %v2422_v15 = vld [vmem:[#allocation10 + $0x68] sm:$0xff] }
 0xa44   :  { %v2105_v40 = vpop.f32.mrf.mxu0  ;;  %v2148_v41 = vpop.f32.mrf.mxu1  ;;  %v2425_v36 = vld [vmem:[#allocation10 + $0xe0] sm:$0xff]  ;;  %v5977_v56 = vcombine.low %v2420_v50, %v2422_v15 }
 0xa45   :  { %v2106_v45 = vadd.f32 %v2105_v40, %v2010_v33  ;;  %v2149_v49 = vadd.f32 %v2148_v41, %v2018_v34  ;;  %v2154_v60 = vmax.f32 %v2104_v42, 0.0  ;;  %v2156_v7 = vmax.f32 %v2147_v44, 0.0 }
 0xa46   :  { %v2107_v52 = vpop.f32.mrf.mxu0  ;;  %v2150_v53 = vpop.f32.mrf.mxu1  ;;  %v1984_v33 = vpack.c.bf16 %v1980_v8, %v1976_v29  ;;  %v1986_v34 = vpack.c.bf16 %v1982_v5, %v1978_v30  ;;  %v1829_v40 = vrot.slane %v1824_v37, %v7351_v27  ;;  %v1837_v41 = vrot.slane %v1824_v37, %v7353_v28  ;;  %v2421_v37 = vld [vmem:[#allocation10 + $0x60] sm:$0xff]  ;;  %v2591_v8 = vld [vmem:[#allocation13 + $0x60] sm:$0xff]  ;;  %v2590_v5 = vld [vmem:[#allocation13 + $0x28] sm:$0xff] }
 0xa47   :  { %v2108_v54 = vadd.f32 %v2107_v52, %v2014_v31  ;;  %v2151_v55 = vadd.f32 %v2150_v53, %v2022_v32  ;;  %v2157_v58 = vmax.f32 %v2106_v45, 0.0  ;;  %v2159_v59 = vmax.f32 %v2149_v49, 0.0  ;;  %v7381_v29 = vld [vmem:[#allocation10 + $0xf0] sm:$0xff]  ;;  %v7383_v30 = vld [vmem:[#allocation10 + $0xb8] sm:$0xff] }
 0xa48   :  { %v5968_v31 = vcombine.high %v1987_v63, %v1989_v1  ;;  %v5970_v32 = vcombine.high %v1988_v19, %v1990_v22  ;;  %v5967_v42 = vcombine.low %v1987_v63, %v1989_v1  ;;  %v5969_v44 = vcombine.low %v1988_v19, %v1990_v22  ;;  %v2589_v1 = vld [vmem:[#allocation13 + $0x20] sm:$0xff] }
 0xa49   :  { %v2158_v61 = vmax.f32 %v2108_v54, 0.0  ;;  %v2160_v62 = vmax.f32 %v2151_v55, 0.0  ;;  %v2161_v17 = vpack.c.bf16 %v2157_v58, %v2153_v11  ;;  %v2163_v18 = vpack.c.bf16 %v2159_v59, %v2155_v13  ;;  %v2595_v58 = vld [vmem:[#allocation13 + $0xe0] sm:$0xff]  ;;  %v2594_v59 = vld [vmem:[#allocation13 + $0xa8] sm:$0xff] }
 0xa4a   :  { %v1928_v2 = vadd.f32 %v7343_v12, %v1829_v40  ;;  %v1971_v3 = vadd.f32 %v7345_v20, %v1837_v41  ;;  %v5980_v4 = vcombine.high %v2423_v35, %v2425_v36  ;;  %v5979_v52 = vcombine.low %v2423_v35, %v2425_v36  ;;  %v2592_v13 = vld [vmem:[#allocation13 + $0x68] sm:$0xff] }
 0xa4b   :  { %v2162_v23 = vpack.c.bf16 %v2158_v61, %v2154_v60  ;;  %v2164_v26 = vpack.c.bf16 %v2160_v62, %v2156_v7  ;;  %v5981_v20 = vcombine.low %v2424_v38, %v2426_v39  ;;  %v5976_v55 = vcombine.high %v2419_v43, %v2421_v37  ;;  %v2596_v7 = vld [vmem:[#allocation13 + $0xe8] sm:$0xff] }
 0xa4c   :  { %v1979_v45 = vmax.f32 %v1928_v2, 0.0  ;;  %v1981_v49 = vmax.f32 %v1971_v3, 0.0  ;;  %v5990_v60 = vcombine.high %v2593_v57, %v2595_v58  ;;  %v5989_v61 = vcombine.low %v2593_v57, %v2595_v58 }
 0xa4d   :  { %2246 = vmatprep.mubr.bf16.mxu0 %v2162_v23  ;;  %2287 = vmatprep.mubr.bf16.mxu1 %v2164_v26  ;;  %v5991_v62 = vcombine.low %v2594_v59, %v2596_v7  ;;  %v5992_v63 = vcombine.high %v2594_v59, %v2596_v7  ;;  %v5986_v11 = vcombine.high %v2589_v1, %v2591_v8  ;;  %v7379_v26 = vld [vmem:[#allocation10 + $0xb0] sm:$0xff] }
 0xa4e   :  { %2247 = vmatmul.mubr.bf16.vlgmr.msra.gmra.mxu0 %v2161_v17  ;;  %2288 = vmatmul.mubr.bf16.vlgmr.msra.gmra.mxu1 %v2163_v18  ;;  %v5985_v19 = vcombine.low %v2589_v1, %v2591_v8  ;;  %v5987_v22 = vcombine.low %v2590_v5, %v2592_v13  ;;  %v5988_v23 = vcombine.high %v2590_v5, %v2592_v13  ;;  %v7387_v18 = vld [vmem:[#allocation10 + $0xf8] sm:$0xff] }
 0xa4f   :  { %2349 = vmatpush1.bf16.xpose.msra.mxu0 %v5971_v9  ;;  %2390 = vmatpush1.bf16.xpose.msra.mxu1 %v5973_v10  ;;  %v1924_v9 = vadd.f32 %v7339_v14, %v1829_v40  ;;  %v1967_v10 = vadd.f32 %v7341_v16, %v1837_v41  ;;  %v5978_v14 = vcombine.high %v2420_v50, %v2422_v15 }
 0xa50   :  { %2368 = vmatprep.mubr.bf16.mxu0 %v1984_v33  ;;  %2409 = vmatprep.mubr.bf16.mxu1 %v1986_v34  ;;  %v5975_v16 = vcombine.low %v2419_v43, %v2421_v37  ;;  %v5998_v17 = vcombine.high %v7379_v26, %v7381_v29  ;;  %v6000_v33 = vcombine.high %v7383_v30, %v7387_v18 }
 0xa51   :  { %2350 = vmatprep.subr.bf16.mxu0 %v5968_v31  ;;  %2391 = vmatprep.subr.bf16.mxu1 %v5970_v32  ;;  %v1975_v51 = vmax.f32 %v1924_v9, 0.0  ;;  %v1977_v12 = vmax.f32 %v1967_v10, 0.0  ;;  %v5997_v31 = vcombine.low %v7379_v26, %v7381_v29  ;;  %v5999_v32 = vcombine.low %v7383_v30, %v7387_v18  ;;  %v2896_v26 = vld [vmem:[#allocation13 + $0xb0] sm:$0xff]  ;;  %v2897_v30 = vld [vmem:[#allocation13 + $0xb8] sm:$0xff] }
 0xa52   :  { %v2898_v29 = vld [vmem:[#allocation13 + $0xf0] sm:$0xff] }
 0xa53   :  { %v1983_v53 = vpack.c.bf16 %v1979_v45, %v1975_v51  ;;  %v1985_v54 = vpack.c.bf16 %v1981_v49, %v1977_v12  ;;  %v2428_v12 = vld [vmem:[#allocation12 + $0x8] sm:$0xf]  ;;  %v6008_v18 = vcombine.high %v2896_v26, %v2898_v29 }
 0xa57   :  { %2351 = vmatpush1.bf16.xpose.msra.mxu0 %v5967_v42  ;;  %2392 = vmatpush1.bf16.xpose.msra.mxu1 %v5969_v44 }
 0xa58   :  { %2502 = vmatprep.subr.bf16.mxu0 %v5980_v4  ;;  %2545 = vmatprep.subr.bf16.mxu1 %v5982_v6 }
 0xa5e   :  { %2369 = vmatmul.mubr.bf16.vlgmr.msra.gmra.mxu0 %v1983_v53  ;;  %2410 = vmatmul.mubr.bf16.vlgmr.msra.gmra.mxu1 %v1985_v54  ;;  %v2437_v53 = vrot.slane %v2428_v12, %v7347_v24  ;;  %v2445_v54 = vrot.slane %v2428_v12, %v7349_v25 }
 0xa5f   :  { %2503 = vmatpush1.bf16.msra.mxu0 %v5979_v52  ;;  %2546 = vmatpush1.bf16.msra.mxu1 %v5981_v20 }
 0xa60   :  { %2504 = vmatprep.subr.bf16.mxu0 %v5976_v55  ;;  %2547 = vmatprep.subr.bf16.mxu1 %v5978_v14  ;;  %v2433_v55 = vrot.slane %v2428_v12, %v7351_v27  ;;  %v2441_v14 = vrot.slane %v2428_v12, %v7353_v28  ;;  %v2895_v12 = vld [vmem:[#allocation13 + $0x78] sm:$0xff] }
 0xa61   :  { %2522 = vmatprep.mubr.bf16.mxu0 %v6921_v21  ;;  %2565 = vmatprep.mubr.bf16.mxu1 %v6921_v21 }
 0xa63   :  { %2505 = vmatpush1.bf16.msra.mxu0 %v5975_v16  ;;  %2548 = vmatpush1.bf16.msra.mxu1 %v5977_v56 }
 0xa64   :  { %2649 = vmatprep.subr.bf16.mxu0 %v5990_v60  ;;  %2690 = vmatprep.subr.bf16.mxu1 %v5992_v63 }
 0xa66   :  { %5983 = vmatmul.mubr.msk.bf16.vlgmr.msra.gmra.mxu0 %vm303_vm1, %v7311_v48  ;;  %5984 = vmatmul.mubr.msk.bf16.vlgmr.msra.gmra.mxu1 %vm303_vm1, %v7311_v48 }
 0xa67   :  { %2650 = vmatpush1.bf16.xpose.msra.mxu0 %v5989_v61  ;;  %2691 = vmatpush1.bf16.xpose.msra.mxu1 %v5991_v62 }
 0xa68   :  { %2651 = vmatprep.subr.bf16.mxu0 %v5986_v11  ;;  %2692 = vmatprep.subr.bf16.mxu1 %v5988_v23  ;;  %v2724_v23 = vld [vmem:[#allocation10 + $0x70] sm:$0xff] }
 0xa6f   :  { %2652 = vmatpush1.bf16.xpose.msra.mxu0 %v5985_v19  ;;  %2693 = vmatpush1.bf16.xpose.msra.mxu1 %v5987_v22  ;;  %v2722_v22 = vld [vmem:[#allocation10 + $0x30] sm:$0xff] }
 0xa70   :  { %2805 = vmatprep.subr.bf16.mxu0 %v5998_v17  ;;  %2848 = vmatprep.subr.bf16.mxu1 %v6000_v33 }
 0xb0e   :  { %v2248_v34 = vpop.f32.mrf.mxu0  ;;  %v2289_v35 = vpop.f32.mrf.mxu1 }
 0xb0f   :  { %v2290_v36 = vadd.f32 %v2289_v35, %v2248_v34 }
 0xb10   :  { %v2250_v38 = vpop.f32.mrf.mxu0  ;;  %v2291_v39 = vpop.f32.mrf.mxu1 }
 0xb11   :  { %v2725_v38 = vld [vmem:[#allocation10 + $0x78] sm:$0xff] }
 0xb12   :  { %v2251_v40 = vpop.f32.mrf.mxu0  ;;  %v2292_v41 = vpop.f32.mrf.mxu1 }
 0xb13   :  { %v2293_v42 = vadd.f32 %v2292_v41, %v2251_v40 }
 0xb14   :  { %v2253_v44 = vpop.f32.mrf.mxu0  ;;  %v2294_v2 = vpop.f32.mrf.mxu1 }
 0xb1e   :  { %v2370_v3 = vpop.f32.mrf.mxu0  ;;  %v2411_v4 = vpop.f32.mrf.mxu1 }
 0xb1f   :  { %v2371_v6 = vadd.f32 %v2370_v3, %v2290_v36  ;;  %v2723_v36 = vld [vmem:[#allocation10 + $0x38] sm:$0xff]  ;;  %v5994_v3 = vcombine.high %v2722_v22, %v2724_v23 }
 0xb20   :  { %v2372_v9 = vpop.f32.mrf.mxu0  ;;  %v2413_v10 = vpop.f32.mrf.mxu1 }
 0xb21   :  { %v7395_v45 = vadd.f32 %v2411_v4, %v2371_v6  ;;  %v5996_v4 = vcombine.high %v2723_v36, %v2725_v38  ;;  %v5993_v6 = vcombine.low %v2722_v22, %v2724_v23  ;;  %v5995_v9 = vcombine.low %v2723_v36, %v2725_v38 }
 0xb22   :  { %v2373_v49 = vpop.f32.mrf.mxu0  ;;  %v2414_v43 = vpop.f32.mrf.mxu1 }
 0xb23   :  { %v2374_v37 = vadd.f32 %v2373_v49, %v2293_v42 }
 0xb24   :  { %v2375_v50 = vpop.f32.mrf.mxu0  ;;  %v2416_v15 = vpop.f32.mrf.mxu1 }
 0xb25   :  { %v7397_v51 = vadd.f32 %v2414_v43, %v2374_v37  ;;  %v2892_v43 = vld [vmem:[#allocation13 + $0x30] sm:$0xff]  ;;  %v2893_v50 = vld [vmem:[#allocation13 + $0x38] sm:$0xff] }
 0xb26   :  { %v2524_v52 = vpop.f32.mrf.mxu0  ;;  %v2567_v20 = vpop.f32.mrf.mxu1  ;;  %v2894_v37 = vld [vmem:[#allocation13 + $0x70] sm:$0xff] }
 0xb27   :  { %v2525_v62 = vadd.f32 %v2524_v52, %v2433_v55  ;;  %v2568_v63 = vadd.f32 %v2567_v20, %v2441_v14  ;;  %v6004_v15 = vcombine.high %v2892_v43, %v2894_v37  ;;  %v6003_v52 = vcombine.low %v2892_v43, %v2894_v37 }
 0xb28   :  { %v2526_v16 = vpop.f32.mrf.mxu0  ;;  %v2569_v56 = vpop.f32.mrf.mxu1  ;;  %v6005_v20 = vcombine.low %v2893_v50, %v2895_v12 }
 0xb29   :  { %v2527_v59 = vadd.f32 %v2526_v16, %v2437_v53  ;;  %v2570_v60 = vadd.f32 %v2569_v56, %v2445_v54  ;;  %v2576_v39 = vmax.f32 %v2525_v62, 0.0  ;;  %v2578_v40 = vmax.f32 %v2568_v63, 0.0  ;;  %v2731_v62 = vld [vmem:[#allocation12 + $0xc] sm:$0xf] }
 0xb2a   :  { %v2528_v57 = vpop.f32.mrf.mxu0  ;;  %v2571_v58 = vpop.f32.mrf.mxu1 }
 0xb2b   :  { %v2529_v7 = vadd.f32 %v2528_v57, %v2433_v55  ;;  %v2572_v61 = vadd.f32 %v2571_v58, %v2441_v14  ;;  %v2577_v17 = vmax.f32 %v2527_v59, 0.0  ;;  %v2579_v33 = vmax.f32 %v2570_v60, 0.0 }
 0xb2c   :  { %v2530_v1 = vpop.f32.mrf.mxu0  ;;  %v2573_v8 = vpop.f32.mrf.mxu1 }
 0xb2d   :  { %v2531_v5 = vadd.f32 %v2530_v1, %v2437_v53  ;;  %v2574_v11 = vadd.f32 %v2573_v8, %v2445_v54  ;;  %v2580_v13 = vmax.f32 %v2529_v7, 0.0  ;;  %v2582_v19 = vmax.f32 %v2572_v61, 0.0 }
 0xb2e   :  { %v2740_v8 = vrot.slane %v2731_v62, %v7347_v24 }
 0xb2f   :  { %v2581_v34 = vmax.f32 %v2531_v5, 0.0  ;;  %v2583_v35 = vmax.f32 %v2574_v11, 0.0  ;;  %v2584_v44 = vpack.c.bf16 %v2580_v13, %v2576_v39  ;;  %v2586_v2 = vpack.c.bf16 %v2582_v19, %v2578_v40 }
 0xb30   :  { %v2748_v5 = vrot.slane %v2731_v62, %v7349_v25  ;;  %v2736_v11 = vrot.slane %v2731_v62, %v7351_v27  ;;  %v2744_v13 = vrot.slane %v2731_v62, %v7353_v28 }
 0xb31   :  { %v2585_v41 = vpack.c.bf16 %v2581_v34, %v2577_v17  ;;  %v2587_v42 = vpack.c.bf16 %v2583_v35, %v2579_v33 }
 0xb33   :  { %2669 = vmatprep.mubr.bf16.mxu0 %v2585_v41  ;;  %2710 = vmatprep.mubr.bf16.mxu1 %v2587_v42 }
 0xb34   :  { %2670 = vmatmul.mubr.bf16.vlgmr.msra.gmra.mxu0 %v2584_v44  ;;  %2711 = vmatmul.mubr.bf16.vlgmr.msra.gmra.mxu1 %v2586_v2 }
 0xb35   :  { %2806 = vmatpush1.bf16.msra.mxu0 %v5997_v31  ;;  %2849 = vmatpush1.bf16.msra.mxu1 %v5999_v32  ;;  %v2899_v31 = vld [vmem:[#allocation13 + $0xf8] sm:$0xff]  ;;  %v6007_v32 = vcombine.low %v2896_v26, %v2898_v29 }
 0xb36   :  { %2807 = vmatprep.subr.bf16.mxu0 %v5994_v3  ;;  %2850 = vmatprep.subr.bf16.mxu1 %v5996_v4  ;;  %v6009_v10 = vcombine.low %v2897_v30, %v2899_v31  ;;  %v6010_v49 = vcombine.high %v2897_v30, %v2899_v31 }
 0xb37   :  { %2825 = vmatprep.mubr.bf16.mxu0 %v6921_v21  ;;  %2868 = vmatprep.mubr.bf16.mxu1 %v6921_v21 }
 0xb39   :  { %2808 = vmatpush1.bf16.msra.mxu0 %v5993_v6  ;;  %2851 = vmatpush1.bf16.msra.mxu1 %v5995_v9 }
 0xb3a   :  { %2952 = vmatprep.subr.bf16.mxu0 %v6008_v18  ;;  %2993 = vmatprep.subr.bf16.mxu1 %v6010_v49 }
 0xb3c   :  { %6001 = vmatmul.mubr.msk.bf16.vlgmr.msra.gmra.mxu0 %vm303_vm1, %v7311_v48  ;;  %6002 = vmatmul.mubr.msk.bf16.vlgmr.msra.gmra.mxu1 %vm303_vm1, %v7311_v48  ;;  %v6006_v48 = vcombine.high %v2893_v50, %v2895_v12  ;;  %v6011_v50 = vld [vmem:[#allocation15] ss:$0 sm:$0xff] }
 0xb3d   :  { %2953 = vmatpush1.bf16.xpose.msra.mxu0 %v6007_v32  ;;  %2994 = vmatpush1.bf16.xpose.msra.mxu1 %v6009_v10 }
 0xb3e   :  { %2954 = vmatprep.subr.bf16.mxu0 %v6004_v15  ;;  %2995 = vmatprep.subr.bf16.mxu1 %v6006_v48 }
 0xb45   :  { %2955 = vmatpush1.bf16.xpose.msra.mxu0 %v6003_v52  ;;  %2996 = vmatpush1.bf16.xpose.msra.mxu1 %v6005_v20 }
 0xb46   :  { %6300 = vmatprep.subr.bf16.mxu0 %v6906_v0  ;;  %6308 = vmatprep.subr.mxu1 %v6906_v0 }
 0xbf4   :  { %v2671_v53 = vpop.f32.mrf.mxu0  ;;  %v2712_v54 = vpop.f32.mrf.mxu1 }
 0xbf5   :  { %v2713_v55 = vadd.f32 %v2712_v54, %v2671_v53 }
 0xbf6   :  { %v2673_v14 = vpop.f32.mrf.mxu0  ;;  %v2714_v16 = vpop.f32.mrf.mxu1 }
 0xbf7   :  { %v2719_v56 = vadd.f32 %v2713_v55, %v7395_v45 }
 0xbf8   :  { %v2674_v57 = vpop.f32.mrf.mxu0  ;;  %v2715_v58 = vpop.f32.mrf.mxu1 }
 0xbf9   :  { %v2716_v59 = vadd.f32 %v2715_v58, %v2674_v57 }
 0xbfa   :  { %v2676_v60 = vpop.f32.mrf.mxu0  ;;  %v2717_v7 = vpop.f32.mrf.mxu1 }
 0xbfb   :  { %v2720_v61 = vadd.f32 %v2716_v59, %v7397_v51 }
 0xbfc   :  { %v2827_v63 = vpop.f32.mrf.mxu0  ;;  %v2870_v1 = vpop.f32.mrf.mxu1 }
 0xbfd   :  { %v2828_v51 = vadd.f32 %v2827_v63, %v2736_v11  ;;  %v2871_v36 = vadd.f32 %v2870_v1, %v2744_v13 }
 0xbfe   :  { %v2829_v19 = vpop.f32.mrf.mxu0  ;;  %v2872_v45 = vpop.f32.mrf.mxu1 }
 0xbff   :  { %v2830_v17 = vadd.f32 %v2829_v19, %v2740_v8  ;;  %v2873_v33 = vadd.f32 %v2872_v45, %v2748_v5  ;;  %v2879_v9 = vmax.f32 %v2828_v51, 0.0  ;;  %v2881_v26 = vmax.f32 %v2871_v36, 0.0 }
 0xc00   :  { %v2831_v22 = vpop.f32.mrf.mxu0  ;;  %v2874_v23 = vpop.f32.mrf.mxu1 }
 0xc01   :  { %v2832_v34 = vadd.f32 %v2831_v22, %v2736_v11  ;;  %v2875_v35 = vadd.f32 %v2874_v23, %v2744_v13  ;;  %v2880_v2 = vmax.f32 %v2830_v17, 0.0  ;;  %v2882_v3 = vmax.f32 %v2873_v33, 0.0  ;;  %v6466_v11 = vld [vmem:[%s7793_s14] sm:$0xff]  }
 0xc02   :  { %v2833_v38 = vpop.f32.mrf.mxu0  ;;  %v2876_v39 = vpop.f32.mrf.mxu1 }
 0xc03   :  { %v2834_v40 = vadd.f32 %v2833_v38, %v2740_v8  ;;  %v2877_v41 = vadd.f32 %v2876_v39, %v2748_v5  ;;  %v2883_v42 = vmax.f32 %v2832_v34, 0.0  ;;  %v2885_v44 = vmax.f32 %v2875_v35, 0.0  ;;  %v6012_v35 = vld [vmem:[#allocation19] ss:$0 sm:$0xff]  ;;  %v6013_v39 = vld [vmem:[#allocation21] ss:$0 sm:$0xff] }
 0xc05   :  { %v2884_v4 = vmax.f32 %v2834_v40, 0.0  ;;  %v2886_v6 = vmax.f32 %v2877_v41, 0.0  ;;  %v2887_v18 = vpack.c.bf16 %v2883_v42, %v2879_v9  ;;  %v2889_v31 = vpack.c.bf16 %v2885_v44, %v2881_v26 }
 0xc07   :  { %v2888_v29 = vpack.c.bf16 %v2884_v4, %v2880_v2  ;;  %v2890_v30 = vpack.c.bf16 %v2886_v6, %v2882_v3  ;;  %v6014_v2 = vld [vmem:[#allocation22] ss:$0 sm:$0xff] }
 0xc09   :  { %2972 = vmatprep.mubr.bf16.mxu0 %v2888_v29  ;;  %3013 = vmatprep.mubr.bf16.mxu1 %v2890_v30 }
 0xc0a   :  { %2973 = vmatmul.mubr.bf16.vlgmr.msra.gmra.mxu0 %v2887_v18  ;;  %3014 = vmatmul.mubr.bf16.vlgmr.msra.gmra.mxu1 %v2889_v31 }
 0xc0b   :  { %6304 = vmatprep.mubr.msk.bf16.mxu0 %vm6907_vm0, %v6906_v0  ;;  %6310 = vmatprep.mubr.msk.f32.mxu1 %vm6907_vm0, %v6906_v0 }
 0xcca   :  { %v2974_v32 = vpop.f32.mrf.mxu0  ;;  %v3015_v10 = vpop.f32.mrf.mxu1 }
 0xccb   :  { %v3016_v49 = vadd.f32 %v3015_v10, %v2974_v32 }
 0xccc   :  { %v2976_v43 = vpop.f32.mrf.mxu0  ;;  %v3017_v37 = vpop.f32.mrf.mxu1 }
 0xccd   :  { %v3022_v15 = vadd.f32 %v3016_v49, %v2719_v56 }
 0xcce   :  { %v2977_v12 = vpop.f32.mrf.mxu0  ;;  %v3018_v52 = vpop.f32.mrf.mxu1 }
 0xccf   :  { %v3019_v20 = vadd.f32 %v3018_v52, %v2977_v12  ;;  %v3030_v48 = vadd.f32 %v6011_v50, %v3022_v15 }
 0xcd0   :  { %v2979_v53 = vpop.f32.mrf.mxu0  ;;  %v3020_v54 = vpop.f32.mrf.mxu1 }
 0xcd1   :  { %v3023_v55 = vadd.f32 %v3019_v20, %v2720_v61  ;;  %v3032_v14 = vadd.f32 %v3030_v48, %v7305_v46 }
 0xcd3   :  { %v3036_v16 = vsel %vm303_vm1, %v3032_v14, 0.0  ;;  %v3031_v57 = vadd.f32 %v6011_v50, %v3023_v55 }
 0xcd4   :  { %3037 = vadd.xlane.f32.xlu0 %v3036_v16 }
 0xcd5   :  { %v3033_v58 = vadd.f32 %v3031_v57, %v7307_v47  ;;  %v6465_v47 = vld [vmem:[%s7793_s14 + $0x8] sm:$0xff]   ;;  %s6922_s14 = smov [#allocation2]  }
 0xcd6   :  { %6301 = vmatpush3.bf16.msra.mxu0 %v6465_v47 }
 0xcd7   :  { %v3039_v59 = vsel %vm303_vm1, %v3033_v58, 0.0  ;;  %6302 = vmatprep.subr.bf16.mxu0 %v6906_v0 }
 0xcd8   :  { %3040 = vadd.xlane.f32.xlu1 %v3039_v59 }
 0xcda   :  { %6303 = vmatpush3.bf16.msra.mxu0 %v6466_v11 }
 0xcdb   :  { %6313 = vmatprep.subr.mxu0 %v6906_v0 }
 0xd5d   :  { %v3038_v60 = vpop.xlane.xlu0 %3037 }
 0xd5e   :  { %v3042_v56 = vmul.f32 0.03125, %v3038_v60 }
 0xd60   :  { %v3044_v7 = vsub.f32 %v3032_v14, %v3042_v56 }
 0xd61   :  { %v3041_v62 = vpop.xlane.xlu1 %3040 }
 0xd62   :  { %v3043_v63 = vmul.f32 0.03125, %v3041_v62  ;;  %v3046_v1 = vmul.f32 %v3044_v7, %v3044_v7 }
 0xd64   :  { %v3045_v8 = vsub.f32 %v3033_v58, %v3043_v63  ;;  %v3048_v61 = vsel %vm303_vm1, %v3046_v1, 0.0 }
 0xd65   :  { %3049 = vadd.xlane.f32.xlu0 %v3048_v61 }
 0xd66   :  { %v3047_v46 = vmul.f32 %v3045_v8, %v3045_v8 }
 0xd68   :  { %v3051_v5 = vsel %vm303_vm1, %v3047_v46, 0.0 }
 0xd69   :  { %3052 = vadd.xlane.f32.xlu1 %v3051_v5 }
 0xdee   :  { %v3050_v13 = vpop.xlane.xlu0 %3049 }
 0xdef   :  { %v3054_v19 = vmul.f32 0.03125, %v3050_v13 }
 0xdf1   :  { %v3056_v45 = vadd.f32 1e-05, %v3054_v19 }
 0xdf2   :  { %v3053_v22 = vpop.xlane.xlu1 %3052 }
 0xdf3   :  { %6505 = vrsqrt.f32 %v3056_v45  ;;  %v3055_v23 = vmul.f32 0.03125, %v3053_v22 }
 0xdf5   :  { %v3057_v17 = vadd.f32 1e-05, %v3055_v23 }
 0xdf7   :  { %6507 = vrsqrt.f32 %v3057_v17 }
 0xe00   :  { %v6506_v33 = vpop.eup %6505 }
 0xe01   :  { %v3060_v34 = vmul.f32 %v6506_v33, %v3044_v7 }
 0xe03   :  { %v3068_v38 = vmul.f32 %v6012_v35, %v3060_v34 }
 0xe04   :  { %v6508_v51 = vpop.eup %6507 }
 0xe05   :  { %v3061_v36 = vmul.f32 %v6508_v51, %v3045_v8  ;;  %v7441_v41 = vadd.f32 %v6013_v39, %v3068_v38 }
 0xe07   :  { %v3069_v40 = vmul.f32 %v6012_v35, %v3061_v36 }
 0xe09   :  { %v7443_v42 = vadd.f32 %v6013_v39, %v3069_v40 }
 0xe0b   :  { %v3078_v44 = vpack.c.bf16 %v7443_v42, %v7441_v41 }
 0xe0d   :  { %6305 = vmatmul.mubr.msk.bf16.vlgmr.msra.gmra.mxu0 %vm303_vm1, %v3078_v44 }
 0xe0e   :  { %6315 = vmatprep.mubr.msk.f32.mxu0 %vm6907_vm0, %v6906_v0 }
 0xecd   :  { %v3139_v3 = vpop.f32.mrf.mxu0 }
 0xece   :  { %v7450_v4 = vadd.f32 %v6014_v2, %v3139_v3 }
 0xecf   :  { %v6306_v6 = vpop.f32.mrf.mxu0 }
 0xed0   :  { %3312 = vrot.lane.b32.xlu1 %v7450_v4, %s6909_s26  ;;  %3147 = vrot.lane.b32.xlu0 %v7450_v4, %s6908_s15 }
 0xed1   :  { %v3142_v9 = vpop.f32.mrf.mxu0 }
 0xed2   :  { %v7464_v29 = vadd.f32 %v6014_v2, %v3142_v9 }
 0xed3   :  { %v6307_v26 = vpop.f32.mrf.mxu0 }
 0xed4   :  { %3310 = vrot.lane.b32.xlu1 %v7450_v4, %s6910_s13  ;;  %3477 = vrot.lane.b32.xlu0 %v7450_v4, %s6911_s9 }
 0xed8   :  { %3475 = vrot.lane.b32.xlu1 %v7450_v4, %s6912_s2  ;;  %3642 = vrot.lane.b32.xlu0 %v7450_v4, %s6913_s4 }
 0xedc   :  { %3640 = vrot.lane.b32.xlu1 %v7450_v4, %s6914_s16  ;;  %3821 = vrot.lane.b32.xlu0 %v7464_v29, %s6908_s15 }
 0xee0   :  { %3986 = vrot.lane.b32.xlu1 %v7464_v29, %s6909_s26  ;;  %3984 = vrot.lane.b32.xlu0 %v7464_v29, %s6910_s13 }
 0xee4   :  { %4151 = vrot.lane.b32.xlu1 %v7464_v29, %s6911_s9  ;;  %4149 = vrot.lane.b32.xlu0 %v7464_v29, %s6912_s2 }
 0xee8   :  { %4316 = vrot.lane.b32.xlu1 %v7464_v29, %s6913_s4  ;;  %4314 = vrot.lane.b32.xlu0 %v7464_v29, %s6914_s16 }
 0xeec   :  { %3234 = vrot.lane.b32.xlu1 %v7450_v4, %s6890_s28 }
 0xf42   :  { %v3313_v30 = vpop.permute.xlu1 %3312  ;;  %v3148_v18 = vpop.permute.xlu0 %3147 }
 0xf43   :  { %6309 = vmatpush3.xpose.msk.msra.mxu1 %vm351_vm2, %v3148_v18 }
 0xf44   :  { %6318 = vmatprep.subr.mxu1 %v6906_v0 }
 0xf46   :  { %v3311_v31 = vpop.permute.xlu1 %3310  ;;  %6311 = vmatmul.mubr.msk.f32.vlgmr.msra.gmra.mxu1 %vm351_vm2, %v7450_v4  ;;  %v3478_v32 = vpop.permute.xlu0 %3477 }
 0xf47   :  { %6319 = vmatpush3.xpose.msk.msra.mxu1 %vm351_vm2, %v3313_v30  ;;  %6320 = vmatprep.mubr.msk.f32.mxu1 %vm6907_vm0, %v6906_v0 }
 0xf48   :  { %6328 = vmatprep.subr.mxu1 %v6906_v0 }
 0xf4a   :  { %v3476_v10 = vpop.permute.xlu1 %3475  ;;  %6321 = vmatmul.mubr.msk.f32.vlgmr.msra.gmra.mxu1 %vm351_vm2, %v3311_v31  ;;  %v3643_v49 = vpop.permute.xlu0 %3642 }
 0xf4b   :  { %6329 = vmatpush3.xpose.msk.msra.mxu1 %vm351_vm2, %v3478_v32  ;;  %6330 = vmatprep.mubr.msk.f32.mxu1 %vm6907_vm0, %v6906_v0 }
 0xf4c   :  { %6338 = vmatprep.subr.mxu1 %v6906_v0 }
 0xf4e   :  { %v3641_v43 = vpop.permute.xlu1 %3640  ;;  %6331 = vmatmul.mubr.msk.f32.vlgmr.msra.gmra.mxu1 %vm351_vm2, %v3476_v10  ;;  %v3822_v37 = vpop.permute.xlu0 %3821 }
 0xf4f   :  { %6339 = vmatpush3.xpose.msk.msra.mxu1 %vm351_vm2, %v3643_v49  ;;  %6340 = vmatprep.mubr.msk.f32.mxu1 %vm6907_vm0, %v6906_v0 }
 0xf50   :  { %6348 = vmatprep.subr.mxu1 %v6906_v0 }
 0xf52   :  { %6341 = vmatmul.mubr.msk.f32.vlgmr.msra.gmra.mxu1 %vm351_vm2, %v3641_v43  ;;  %v3987_v50 = vpop.permute.xlu1 %3986  ;;  %v3985_v15 = vpop.permute.xlu0 %3984 }
 0xf53   :  { %6349 = vmatpush3.xpose.msk.msra.mxu1 %vm351_vm2, %v3822_v37  ;;  %6350 = vmatprep.mubr.msk.f32.mxu1 %vm6907_vm0, %v6906_v0 }
 0xf54   :  { %6358 = vmatprep.subr.mxu1 %v6906_v0 }
 0xf56   :  { %v4152_v12 = vpop.permute.xlu1 %4151  ;;  %6351 = vmatmul.mubr.msk.f32.vlgmr.msra.gmra.mxu1 %vm351_vm2, %v7464_v29  ;;  %v4150_v20 = vpop.permute.xlu0 %4149 }
 0xf57   :  { %6359 = vmatpush3.xpose.msk.msra.mxu1 %vm351_vm2, %v3987_v50  ;;  %6360 = vmatprep.mubr.msk.f32.mxu1 %vm6907_vm0, %v6906_v0 }
 0xf58   :  { %6368 = vmatprep.subr.mxu1 %v6906_v0 }
 0xf5a   :  { %v4317_v52 = vpop.permute.xlu1 %4316  ;;  %6361 = vmatmul.mubr.msk.f32.vlgmr.msra.gmra.mxu1 %vm351_vm2, %v3985_v15  ;;  %v4315_v53 = vpop.permute.xlu0 %4314 }
 0xf5b   :  { %6369 = vmatpush3.xpose.msk.msra.mxu1 %vm351_vm2, %v4152_v12  ;;  %6370 = vmatprep.mubr.msk.f32.mxu1 %vm6907_vm0, %v6906_v0 }
 0xf5c   :  { %6378 = vmatprep.subr.mxu1 %v6906_v0 }
 0xf5e   :  { %v3235_v48 = vpop.permute.xlu1 %3234  ;;  %6371 = vmatmul.mubr.msk.f32.vlgmr.msra.gmra.mxu1 %vm351_vm2, %v4150_v20 }
 0xf5f   :  { %6314 = vmatpush3.msra.mxu0 %v3235_v48  ;;  %6379 = vmatpush3.xpose.msk.msra.mxu1 %vm351_vm2, %v4317_v52 }
 0xf60   :  { %6380 = vmatprep.mubr.msk.f32.mxu1 %vm6907_vm0, %v6906_v0  ;;  %6323 = vmatprep.subr.mxu0 %v6906_v0 }
 0xf61   :  { %6388 = vmatprep.subr.bf16.mxu1 %v6906_v0 }
 0xf62   :  { %6381 = vmatmul.mubr.msk.f32.vlgmr.msra.gmra.mxu1 %vm351_vm2, %v4315_v53 }
 0xf63   :  { %6392 = vmatprep.mubr.msk.bf16.mxu1 %vm6907_vm0, %v6906_v0 }
0x1006   :  { %v3219_v54 = vpop.f32.mrf.mxu1 }
0x1007   :  { %v3223_v55 = vsel %vm351_vm2, %v3219_v54, -inf }
0x1008   :  { %v6312_v14 = vpop.f32.mrf.mxu1  ;;  %3224 = vmax.xlane.f32.xlu1 %v3223_v55 }
0x100a   :  { %v3384_v16 = vpop.f32.mrf.mxu1 }
0x100b   :  { %v3388_v57 = vsel %vm351_vm2, %v3384_v16, -inf }
0x100c   :  { %v6322_v58 = vpop.f32.mrf.mxu1  ;;  %3389 = vmax.xlane.f32.xlu0 %v3388_v57 }
0x100e   :  { %v3549_v59 = vpop.f32.mrf.mxu1 }
0x100f   :  { %v3553_v60 = vsel %vm351_vm2, %v3549_v59, -inf }
0x1010   :  { %v6332_v56 = vpop.f32.mrf.mxu1  ;;  %3554 = vmax.xlane.f32.xlu0 %v3553_v60 }
0x1012   :  { %v3714_v7 = vpop.f32.mrf.mxu1 }
0x1013   :  { %v3718_v62 = vsel %vm351_vm2, %v3714_v7, -inf }
0x1014   :  { %v6342_v63 = vpop.f32.mrf.mxu1  ;;  %3719 = vmax.xlane.f32.xlu1 %v3718_v62 }
0x1016   :  { %v3893_v1 = vpop.f32.mrf.mxu1 }
0x1017   :  { %v3897_v8 = vsel %vm351_vm2, %v3893_v1, -inf }
0x1018   :  { %3898 = vmax.xlane.f32.xlu0 %v3897_v8  ;;  %v6352_v61 = vpop.f32.mrf.mxu1 }
0x101a   :  { %v4058_v46 = vpop.f32.mrf.mxu1 }
0x101b   :  { %v4062_v5 = vsel %vm351_vm2, %v4058_v46, -inf }
0x101c   :  { %4063 = vmax.xlane.f32.xlu1 %v4062_v5  ;;  %v6362_v47 = vpop.f32.mrf.mxu1 }
0x101e   :  { %v4223_v11 = vpop.f32.mrf.mxu1 }
0x101f   :  { %v4227_v13 = vsel %vm351_vm2, %v4223_v11, -inf }
0x1020   :  { %4228 = vmax.xlane.f32.xlu0 %v4227_v13  ;;  %v6372_v19 = vpop.f32.mrf.mxu1 }
0x1022   :  { %v4388_v45 = vpop.f32.mrf.mxu1 }
0x1023   :  { %v4392_v23 = vsel %vm351_vm2, %v4388_v45, -inf }
0x1024   :  { %v6382_v22 = vpop.f32.mrf.mxu1 }
0x102d   :  { %3564 = vrot.lane.b32.xlu1 %v7450_v4, %s6915_s17 }
0x1036   :  { %3399 = vrot.lane.b32.xlu0 %v7450_v4, %s6917_s10 }
0x1051   :  { %4393 = vmax.xlane.f32.xlu1 %v4392_v23 }
0x1062   :  { %3729 = vrot.lane.b32.xlu1 %v7450_v4, %s6916_s8 }
0x1091   :  { %v3225_v17 = vpop.xlane.xlu1 %3224 }
0x1092   :  { %v3226_v33 = vsub.f32 %v3219_v54, %v3225_v17 }
0x1094   :  { %v3227_v34 = vmul.f32 1.442695, %v3226_v33 }
0x1095   :  { %v3390_v35 = vpop.xlane.xlu0 %3389 }
0x1096   :  { %6509 = vpow2.f32 %v3227_v34  ;;  %v3391_v51 = vsub.f32 %v3384_v16, %v3390_v35 }
0x1098   :  { %v3392_v36 = vmul.f32 1.442695, %v3391_v51 }
0x1099   :  { %v3555_v38 = vpop.xlane.xlu0 %3554 }
0x109a   :  { %6511 = vpow2.f32 %v3392_v36  ;;  %v3556_v39 = vsub.f32 %v3549_v59, %v3555_v38 }
0x109c   :  { %v3557_v40 = vmul.f32 1.442695, %v3556_v39 }
0x109d   :  { %v3720_v26 = vpop.xlane.xlu1 %3719 }
0x109e   :  { %6513 = vpow2.f32 %v3557_v40  ;;  %v3721_v30 = vsub.f32 %v3714_v7, %v3720_v26 }
0x10a0   :  { %v3722_v10 = vmul.f32 1.442695, %v3721_v30 }
0x10a1   :  { %v3899_v18 = vpop.xlane.xlu0 %3898 }
0x10a2   :  { %v3900_v32 = vsub.f32 %v3893_v1, %v3899_v18  ;;  %6515 = vpow2.f32 %v3722_v10 }
0x10a3   :  { %v6510_v44 = vpop.eup %6509 }
0x10a4   :  { %v3229_v2 = vsel %vm351_vm2, %v6510_v44, 0.0  ;;  %v3901_v37 = vmul.f32 1.442695, %v3900_v32 }
0x10a5   :  { %3230 = vadd.xlane.f32.xlu0 %v3229_v2  ;;  %v4064_v31 = vpop.xlane.xlu1 %4063 }
0x10a6   :  { %v4065_v49 = vsub.f32 %v4058_v46, %v4064_v31  ;;  %6517 = vpow2.f32 %v3901_v37  ;;  %v6467_v37 = vld [vmem:[#allocation24 + $0x8] sm:$0xff]  }
0x10a7   :  { %v6512_v3 = vpop.eup %6511  ;;  %6389 = vmatpush3.bf16.msra.mxu1 %v6467_v37 }
0x10a8   :  { %v3394_v6 = vsel %vm351_vm2, %v6512_v3, 0.0  ;;  %v4066_v50 = vmul.f32 1.442695, %v4065_v49  ;;  %6390 = vmatprep.subr.bf16.mxu1 %v6906_v0 }
0x10a9   :  { %3395 = vadd.xlane.f32.xlu1 %v3394_v6  ;;  %v4229_v43 = vpop.xlane.xlu0 %4228  ;;  %v3565_v52 = vpop.permute.xlu1 %3564 }
0x10aa   :  { %v4230_v15 = vsub.f32 %v4223_v11, %v4229_v43  ;;  %6519 = vpow2.f32 %v4066_v50 }
0x10ab   :  { %v7543_v4 = vpop.eup %6513 }
0x10ac   :  { %v3559_v9 = vsel %vm351_vm2, %v7543_v4, 0.0  ;;  %v4231_v12 = vmul.f32 1.442695, %v4230_v15 }
0x10ad   :  { %3560 = vadd.xlane.f32.xlu0 %v3559_v9  ;;  %v3400_v62 = vpop.permute.xlu0 %3399 }
0x10ae   :  { %6521 = vpow2.f32 %v4231_v12  ;;  %v6468_v12 = vld [vmem:[#allocation24] sm:$0xff]  }
0x10af   :  { %v6516_v20 = vpop.eup %6515  ;;  %6391 = vmatpush3.bf16.msra.mxu1 %v6468_v12 }
0x10b0   :  { %v3724_v14 = vsel %vm351_vm2, %v6516_v20, 0.0 }
0x10b3   :  { %v7551_v54 = vpop.eup %6517 }
0x10b4   :  { %v3903_v58 = vsel %vm351_vm2, %v7551_v54, 0.0 }
0x10b7   :  { %v7554_v16 = vpop.eup %6519 }
0x10b8   :  { %v4068_v57 = vsel %vm351_vm2, %v7554_v16, 0.0 }
0x10ba   :  { %3908 = vrot.lane.b32.xlu1 %v7464_v29, %s6890_s28  ;;  %s257_s28 = sshll.u32 %s6922_s14, 4  ;;  %s258_s28 = int_to_ptr.vmem [resolvable:$true] %s257_s28 }
0x10bb   :  { %v7560_v59 = vpop.eup %6521  ;;  %s6837_s7 = scalar_lea.vmem %s258_s28, 4096  ;;  %p6842_p1 = scmp.lt.s32.totalorder %s258_s28, %s258_s28 }
0x10bc   :  { %v4233_v60 = vsel %vm351_vm2, %v7560_v59, 0.0  ;;  %p6838_p0 = scmp.ne.s32.totalorder %s258_s28, %s6837_s7  ;;  %p6843_p2 = scmp.lt.s32.totalorder %s6837_s7, %s6837_s7 }
0x10be   :  { %p6844_p3 = por %p6843_p2, %p6842_p1 }
0x10c0   :  { %p6845_p4 = pnand %p6844_p3, %p6838_p0 }
0x10c3   :  { %4073 = vrot.lane.b32.xlu0 %v7464_v29, %s6917_s10 }
0x10da   :  { %v4394_v48 = vpop.xlane.xlu1 %4393 }
0x10db   :  { %v4395_v53 = vsub.f32 %v4388_v45, %v4394_v48 }
0x10dd   :  { %v4396_v55 = vmul.f32 1.442695, %v4395_v53 }
0x10de   :  { %3725 = vadd.xlane.f32.xlu1 %v3724_v14  ;;  %v3730_v63 = vpop.permute.xlu1 %3729 }
0x10df   :  { %6523 = vpow2.f32 %v4396_v55 }
0x10e2   :  { %4069 = vadd.xlane.f32.xlu1 %v4068_v57  ;;  %3904 = vadd.xlane.f32.xlu0 %v3903_v58 }
0x10e6   :  { %4234 = vadd.xlane.f32.xlu0 %v4233_v60 }
0x10ec   :  { %v7564_v56 = vpop.eup %6523 }
0x10ed   :  { %v4398_v7 = vsel %vm351_vm2, %v7564_v56, 0.0 }
0x10ee   :  { %4399 = vadd.xlane.f32.xlu0 %v4398_v7 }
0x10f3   :  { %4238 = vrot.lane.b32.xlu1 %v7464_v29, %s6915_s17 }
0x1104   :  { %4403 = vrot.lane.b32.xlu0 %v7464_v29, %s6916_s8 }
0x112e   :  { %v3231_v1 = vpop.xlane.xlu0 %3230 }
0x112f   :  { %6525 = vrcp.f32 %v3231_v1 }
0x1132   :  { %v3396_v8 = vpop.xlane.xlu1 %3395 }
0x1133   :  { %6527 = vrcp.f32 %v3396_v8 }
0x1136   :  { %v3561_v61 = vpop.xlane.xlu0 %3560  ;;  %v3909_v19 = vpop.permute.xlu1 %3908 }
0x1137   :  { %6529 = vrcp.f32 %v3561_v61 }
0x113a   :  { %v4074_v45 = vpop.permute.xlu0 %4073 }
0x113c   :  { %v6526_v46 = vpop.eup %6525 }
0x113d   :  { %v3233_v5 = vmul.f32 %v6526_v46, %v6510_v44 }
0x113f   :  { %6316 = vmatmul.mubr.msk.f32.vlgmr.msra.gmra.mxu0 %vm351_vm2, %v3233_v5 }
0x1140   :  { %v6528_v47 = vpop.eup %6527  ;;  %6324 = vmatpush3.msra.mxu0 %v3400_v62  ;;  %6325 = vmatprep.mubr.msk.f32.mxu0 %vm6907_vm0, %v6906_v0 }
0x1141   :  { %6333 = vmatprep.subr.mxu0 %v6906_v0  ;;  %v3398_v29 = vmul.f32 %v6528_v47, %v6512_v3 }
0x1143   :  { %6326 = vmatmul.mubr.msk.f32.vlgmr.msra.gmra.mxu0 %vm351_vm2, %v3398_v29 }
0x1144   :  { %v6530_v11 = vpop.eup %6529  ;;  %6334 = vmatpush3.msra.mxu0 %v3565_v52  ;;  %6335 = vmatprep.mubr.msk.f32.mxu0 %vm6907_vm0, %v6906_v0 }
0x1145   :  { %6343 = vmatprep.subr.mxu0 %v6906_v0  ;;  %v3563_v13 = vmul.f32 %v6530_v11, %v7543_v4 }
0x1147   :  { %6336 = vmatmul.mubr.msk.f32.vlgmr.msra.gmra.mxu0 %vm351_vm2, %v3563_v13  ;;  %v6042_v13 = vld [vmem:[#allocation25] ss:$0 sm:$0xff] }
0x1148   :  { %6344 = vmatpush3.msra.mxu0 %v3730_v63  ;;  %6345 = vmatprep.mubr.msk.f32.mxu0 %vm6907_vm0, %v6906_v0 }
0x1149   :  { %6353 = vmatprep.subr.mxu0 %v6906_v0 }
0x1167   :  { %v3726_v22 = vpop.xlane.xlu1 %3725 }
0x1168   :  { %6531 = vrcp.f32 %v3726_v22 }
0x116b   :  { %v3905_v23 = vpop.xlane.xlu0 %3904  ;;  %v4070_v17 = vpop.xlane.xlu1 %4069 }
0x116c   :  { %6533 = vrcp.f32 %v3905_v23 }
0x116d   :  { %6535 = vrcp.f32 %v4070_v17 }
0x116f   :  { %v4235_v33 = vpop.xlane.xlu0 %4234  ;;  %v4239_v2 = vpop.permute.xlu1 %4238 }
0x1170   :  { %6537 = vrcp.f32 %v4235_v33 }
0x1175   :  { %v6532_v34 = vpop.eup %6531 }
0x1176   :  { %v3728_v35 = vmul.f32 %v6532_v34, %v6516_v20 }
0x1177   :  { %v4400_v51 = vpop.xlane.xlu0 %4399 }
0x1178   :  { %6539 = vrcp.f32 %v4400_v51  ;;  %6346 = vmatmul.mubr.msk.f32.vlgmr.msra.gmra.mxu0 %vm351_vm2, %v3728_v35 }
0x1179   :  { %6354 = vmatpush3.msra.mxu0 %v3909_v19  ;;  %6355 = vmatprep.mubr.msk.f32.mxu0 %vm6907_vm0, %v6906_v0  ;;  %v6534_v36 = vpop.eup %6533 }
0x117a   :  { %6363 = vmatprep.subr.mxu0 %v6906_v0  ;;  %v3907_v38 = vmul.f32 %v6534_v36, %v7551_v54  ;;  %v6536_v39 = vpop.eup %6535 }
0x117b   :  { %v4072_v40 = vmul.f32 %v6536_v39, %v7554_v16  ;;  %v4404_v4 = vpop.permute.xlu0 %4403 }
0x117c   :  { %6356 = vmatmul.mubr.msk.f32.vlgmr.msra.gmra.mxu0 %vm351_vm2, %v3907_v38 }
0x117d   :  { %6364 = vmatpush3.msra.mxu0 %v4074_v45  ;;  %6365 = vmatprep.mubr.msk.f32.mxu0 %vm6907_vm0, %v6906_v0  ;;  %v6538_v44 = vpop.eup %6537 }
0x117e   :  { %6373 = vmatprep.subr.mxu0 %v6906_v0  ;;  %v4237_v3 = vmul.f32 %v6538_v44, %v7560_v59 }
0x1180   :  { %6366 = vmatmul.mubr.msk.f32.vlgmr.msra.gmra.mxu0 %vm351_vm2, %v4072_v40 }
0x1181   :  { %6374 = vmatpush3.msra.mxu0 %v4239_v2  ;;  %6375 = vmatprep.mubr.msk.f32.mxu0 %vm6907_vm0, %v6906_v0 }
0x1182   :  { %6383 = vmatprep.subr.mxu0 %v6906_v0 }
0x1184   :  { %6376 = vmatmul.mubr.msk.f32.vlgmr.msra.gmra.mxu0 %vm351_vm2, %v4237_v3 }
0x1185   :  { %v6540_v6 = vpop.eup %6539  ;;  %6384 = vmatpush3.msra.mxu0 %v4404_v4  ;;  %6385 = vmatprep.mubr.msk.f32.mxu0 %vm6907_vm0, %v6906_v0 }
0x1186   :  { %v4402_v9 = vmul.f32 %v6540_v6, %v7564_v56 }
0x1188   :  { %6386 = vmatmul.mubr.msk.f32.vlgmr.msra.gmra.mxu0 %vm351_vm2, %v4402_v9 }
0x11ff   :  { %v3306_v26 = vpop.f32.mrf.mxu0 }
0x1201   :  { %v6317_v30 = vpop.f32.mrf.mxu0 }
0x1203   :  { %v3471_v18 = vpop.f32.mrf.mxu0 }
0x1205   :  { %v6327_v31 = vpop.f32.mrf.mxu0 }
0x1207   :  { %v3636_v32 = vpop.f32.mrf.mxu0 }
0x1209   :  { %v6337_v10 = vpop.f32.mrf.mxu0 }
0x1238   :  { %v3801_v49 = vpop.f32.mrf.mxu0 }
0x123a   :  { %v6347_v43 = vpop.f32.mrf.mxu0 }
0x123c   :  { %v3980_v50 = vpop.f32.mrf.mxu0 }
0x123e   :  { %v6357_v15 = vpop.f32.mrf.mxu0 }
0x1240   :  { %v4145_v52 = vpop.f32.mrf.mxu0 }
0x1241   :  { %v6446_v20 = vpack.i.bf16 %v4145_v52, %v3471_v18 }
0x1242   :  { %v6367_v48 = vpop.f32.mrf.mxu0 }
0x1243   :  { %6447 = vrot.lane.b32.xlu1 %v6446_v20, %s6918_s1 }
0x1244   :  { %v4310_v53 = vpop.f32.mrf.mxu0 }
0x1245   :  { %v6451_v54 = vpack.i.bf16 %v4310_v53, %v3636_v32 }
0x1246   :  { %v6377_v55 = vpop.f32.mrf.mxu0 }
0x1247   :  { %6452 = vrot.lane.b32.xlu0 %v6451_v54, %s6919_s6 }
0x1248   :  { %v4475_v14 = vpop.f32.mrf.mxu0 }
0x1249   :  { %v6456_v16 = vpack.i.bf16 %v4475_v14, %v3801_v49 }
0x124a   :  { %v6387_v57 = vpop.f32.mrf.mxu0 }
0x124b   :  { %6457 = vrot.lane.b32.xlu1 %v6456_v16, %s6920_s30 }
0x12b5   :  { %v6448_v58 = vpop.permute.xlu1 %6447 }
0x12b6   :  { %v6450_v0 = vunpack.i.h.bf16 %v6448_v58  ;;  %v6449_v60 = vunpack.i.l.bf16 %v6448_v58 }
0x12b8   :  { %v4491_v63 = vsel %vm351_vm2, %v3980_v50, %v6450_v0  ;;  %v3817_v1 = vsel %vm351_vm2, %v3306_v26, %v6449_v60 }
0x12b9   :  { %v6453_v59 = vpop.permute.xlu0 %6452 }
0x12ba   :  { %v6455_v56 = vunpack.i.h.bf16 %v6453_v59  ;;  %v6454_v7 = vunpack.i.l.bf16 %v6453_v59 }
0x12bc   :  { %v4492_v46 = vsel %vm1021_vm3, %v4491_v63, %v6455_v56  ;;  %v3818_v5 = vsel %vm1021_vm3, %v3817_v1, %v6454_v7 }
0x12bd   :  { %v6458_v62 = vpop.permute.xlu1 %6457 }
0x12be   :  { %v6460_v8 = vunpack.i.h.bf16 %v6458_v62  ;;  %v6459_v61 = vunpack.i.l.bf16 %v6458_v62 }
0x12c0   :  { %v4493_v47 = vsel %vm1023_vm4, %v4492_v46, %v6460_v8  ;;  %v3819_v29 = vsel %vm1023_vm4, %v3818_v5, %v6459_v61 }
0x12c1   :  { %v4494_v11 = vpack.c.bf16 %v4493_v47, %v3819_v29 }
0x12c3   :  { %6393 = vmatmul.mubr.msk.bf16.vlgmr.msra.gmra.mxu1 %vm303_vm1, %v4494_v11 }
0x1383   :  { %v4555_v19 = vpop.f32.mrf.mxu1 }
0x1384   :  { %v4556_v45 = vadd.f32 %v6042_v13, %v4555_v19 }
0x1385   :  { %v6394_v22 = vpop.f32.mrf.mxu1 }
0x1386   :  { %v4562_v23 = vadd.f32 %v4556_v45, %v7441_v41 }
0x1387   :  { %v4558_v17 = vpop.f32.mrf.mxu1 }
0x1388   :  { %v4559_v33 = vadd.f32 %v6042_v13, %v4558_v17  ;;  %v4566_v34 = vsel %vm303_vm1, %v4562_v23, 0.0 }
0x1389   :  { %4567 = vadd.xlane.f32.xlu0 %v4566_v34  ;;  %v6395_v35 = vpop.f32.mrf.mxu1 }
0x138a   :  { %v4563_v51 = vadd.f32 %v4559_v33, %v7443_v42 }
0x138c   :  { %v4569_v36 = vsel %vm303_vm1, %v4563_v51, 0.0 }
0x138d   :  { %4570 = vadd.xlane.f32.xlu1 %v4569_v36 }
0x1412   :  { %v4568_v38 = vpop.xlane.xlu0 %4567 }
0x1413   :  { %v4572_v39 = vmul.f32 0.03125, %v4568_v38 }
0x1415   :  { %v4574_v40 = vsub.f32 %v4562_v23, %v4572_v39 }
0x1416   :  { %v4571_v44 = vpop.xlane.xlu1 %4570 }
0x1417   :  { %v4573_v2 = vmul.f32 0.03125, %v4571_v44  ;;  %v4576_v3 = vmul.f32 %v4574_v40, %v4574_v40 }
0x1419   :  { %v4575_v6 = vsub.f32 %v4563_v51, %v4573_v2  ;;  %v4578_v41 = vsel %vm303_vm1, %v4576_v3, 0.0 }
0x141a   :  { %4579 = vadd.xlane.f32.xlu0 %v4578_v41 }
0x141b   :  { %v4577_v4 = vmul.f32 %v4575_v6, %v4575_v6 }
0x141d   :  { %v4581_v9 = vsel %vm303_vm1, %v4577_v4, 0.0 }
0x141e   :  { %4582 = vadd.xlane.f32.xlu0 %v4581_v9 }
0x141f   :  { %6848 = shalt.err (!%p6845_p4)  }
0x1420   :  { %260 = dma.hbm_to_vmem [thread:$0]  %s7797_s18, 4096, %s258_s28, [#allocation4] }
0x1421   :  { %s6857_s26 = scalar_lea.vmem %s270_s5, 4096  ;;  %p6862_p6 = scmp.lt.s32.totalorder %s270_s5, %s270_s5 }
0x1422   :  { %p6858_p5 = scmp.ne.s32.totalorder %s270_s5, %s6857_s26  ;;  %p6863_p7 = scmp.lt.s32.totalorder %s6857_s26, %s6857_s26 }
0x1424   :  { %p6864_p8 = por %p6863_p7, %p6862_p6 }
0x1426   :  { %p6865_p9 = pnand %p6864_p8, %p6858_p5 }
0x1428   :  { %6868 = shalt.err (!%p6865_p9)  }
0x1429   :  { %272 = dma.hbm_to_vmem [thread:$0]  %s7799_s20, 4096, %s270_s5, [#allocation4 + $0x1]  ;;  %v6046_v49 = vld [vmem:[%s7801_s22] ss:$0 sm:$0xff] }
0x142a   :  { %v6047_v37 = vld [vmem:[%s7802_s23] ss:$0 sm:$0xff] }
0x14a3   :  { %v4580_v42 = vpop.xlane.xlu0 %4579 }
0x14a4   :  { %v4584_v26 = vmul.f32 0.03125, %v4580_v42 }
0x14a6   :  { %v4586_v30 = vadd.f32 1e-05, %v4584_v26 }
0x14a7   :  { %v4583_v18 = vpop.xlane.xlu0 %4582 }
0x14a8   :  { %6541 = vrsqrt.f32 %v4586_v30  ;;  %v4585_v31 = vmul.f32 0.03125, %v4583_v18 }
0x14aa   :  { %v4587_v32 = vadd.f32 1e-05, %v4585_v31 }
0x14ac   :  { %6543 = vrsqrt.f32 %v4587_v32 }
0x14b5   :  { %v6542_v10 = vpop.eup %6541 }
0x14b6   :  { %v4590_v43 = vmul.f32 %v6542_v10, %v4574_v40 }
0x14b8   :  { %v4598_v50 = vmul.f32 %v6046_v49, %v4590_v43 }
0x14b9   :  { %v6544_v15 = vpop.eup %6543 }
0x14ba   :  { %v7634_v12 = vadd.f32 %v6047_v37, %v4598_v50  ;;  %v4591_v52 = vmul.f32 %v6544_v15, %v4575_v6 }
0x14bc   :  { %v4599_v20 = vmul.f32 %v6046_v49, %v4591_v52 }
0x14be   :  { %v7636_v48 = vadd.f32 %v6047_v37, %v4599_v20 }
0x14bf   :  { %6885 = dma.done.wait [#allocation4], 4096 }
0x14c0   :  { %6886 = vsyncadd [#allocation4], 4294963200 }
0x14c1   :  { %6887 = dma.done.wait [#allocation4 + $0x1], 4096 }
0x14c2   :  { %6888 = vsyncadd [#allocation4 + $0x1], 4294963200  ;;  %4721 = vmatprep.mubr.bf16.mxu0 %v6921_v21  ;;  %4764 = vmatprep.mubr.bf16.mxu1 %v6921_v21  ;;  %v4620_v53 = vld [vmem:[#allocation2 + $0x80] sm:$0xff]  ;;  %v4621_v55 = vld [vmem:[#allocation2 + $0x88] sm:$0xff]  ;;  %v7642_v45 = vpack.c.bf16 %v7636_v48, %v7634_v12  ;;  %s7835_s28 = sld [smem:[#allocation54_spill]] }
0x14c3   :  { %v4622_v54 = vld [vmem:[#allocation2 + $0xc0] sm:$0xff]  ;;  %v4623_v16 = vld [vmem:[#allocation2 + $0xc8] sm:$0xff]  ;;  %v4800_v63 = vld [vmem:[#allocation2 + $0x90] sm:$0xff] }
0x14c4   :  { %v6053_v14 = vcombine.high %v4620_v53, %v4622_v54  ;;  %v6052_v57 = vcombine.low %v4620_v53, %v4622_v54  ;;  %v4616_v58 = vld [vmem:[#allocation2] sm:$0xff]  ;;  %v6055_v0 = vcombine.high %v4621_v55, %v4623_v16  ;;  %v6054_v60 = vcombine.low %v4621_v55, %v4623_v16  ;;  %v4617_v7 = vld [vmem:[#allocation2 + $0x8] sm:$0xff]  ;;  %v4802_v8 = vld [vmem:[#allocation2 + $0xd0] sm:$0xff] }
0x14c5   :  { %v4618_v59 = vld [vmem:[#allocation2 + $0x40] sm:$0xff]  ;;  %v4619_v62 = vld [vmem:[#allocation2 + $0x48] sm:$0xff]  ;;  %v4801_v61 = vld [vmem:[#allocation2 + $0x98] sm:$0xff]  ;;  %v6064_v29 = vcombine.high %v4800_v63, %v4802_v8  ;;  %v6063_v17 = vcombine.low %v4800_v63, %v4802_v8 }
0x14c6   :  { %v6049_v56 = vcombine.high %v4616_v58, %v4618_v59  ;;  %4701 = vmatprep.subr.bf16.mxu0 %v6053_v14  ;;  %v6051_v1 = vcombine.high %v4617_v7, %v4619_v62  ;;  %v4803_v46 = vld [vmem:[#allocation2 + $0xd8] sm:$0xff]  ;;  %4744 = vmatprep.subr.bf16.mxu1 %v6055_v0  ;;  %v6048_v5 = vcombine.low %v4616_v58, %v4618_v59  ;;  %v4796_v13 = vld [vmem:[#allocation2 + $0x10] sm:$0xff]  ;;  %v7654_v10 = vld [vmem:[#allocation3 + $0x80] sm:$0xff] }
0x14c7   :  { %4702 = vmatpush1.bf16.msra.mxu0 %v6052_v57  ;;  %4745 = vmatpush1.bf16.msra.mxu1 %v6054_v60  ;;  %v6050_v47 = vcombine.low %v4617_v7, %v4619_v62  ;;  %v6066_v11 = vcombine.high %v4801_v61, %v4803_v46  ;;  %v4798_v19 = vld [vmem:[#allocation2 + $0x50] sm:$0xff]  ;;  %v4797_v22 = vld [vmem:[#allocation2 + $0x18] sm:$0xff]  ;;  %v6065_v33 = vcombine.low %v4801_v61, %v4803_v46  ;;  %v7656_v49 = vld [vmem:[#allocation3 + $0xc0] sm:$0xff] }
0x14c8   :  { %4703 = vmatprep.subr.bf16.mxu0 %v6049_v56  ;;  %4746 = vmatprep.subr.bf16.mxu1 %v6051_v1  ;;  %v4799_v23 = vld [vmem:[#allocation2 + $0x58] sm:$0xff]  ;;  %v6060_v34 = vcombine.high %v4796_v13, %v4798_v19  ;;  %v6059_v51 = vcombine.low %v4796_v13, %v4798_v19  ;;  %v4970_v38 = vld [vmem:[#allocation3 + $0x90] sm:$0xff]  ;;  %v7658_v43 = vld [vmem:[#allocation3 + $0x88] sm:$0xff]  ;;  %v6082_v37 = vcombine.high %v7654_v10, %v7656_v49 }
0x14c9   :  { %v6062_v35 = vcombine.high %v4797_v22, %v4799_v23  ;;  %v6061_v36 = vcombine.low %v4797_v22, %v4799_v23  ;;  %v4972_v39 = vld [vmem:[#allocation3 + $0xd0] sm:$0xff]  ;;  %v4971_v40 = vld [vmem:[#allocation3 + $0x98] sm:$0xff]  ;;  %v7662_v50 = vld [vmem:[#allocation3 + $0xc8] sm:$0xff]  ;;  %v6081_v15 = vcombine.low %v7654_v10, %v7656_v49 }
0x14ca   :  { %v6074_v44 = vcombine.high %v4970_v38, %v4972_v39  ;;  %v4973_v2 = vld [vmem:[#allocation3 + $0xd8] sm:$0xff]  ;;  %v6073_v3 = vcombine.low %v4970_v38, %v4972_v39  ;;  %v4966_v4 = vld [vmem:[#allocation3 + $0x10] sm:$0xff]  ;;  %v6083_v52 = vcombine.low %v7658_v43, %v7662_v50  ;;  %v6084_v20 = vcombine.high %v7658_v43, %v7662_v50  ;;  %v6058_v0 = vld [vmem:[%s7798_s19 + $0x4] sm:$0xf] }
0x14cb   :  { %4704 = vmatpush1.bf16.msra.mxu0 %v6048_v5  ;;  %4747 = vmatpush1.bf16.msra.mxu1 %v6050_v47  ;;  %v6075_v6 = vcombine.low %v4971_v40, %v4973_v2  ;;  %v6076_v41 = vcombine.high %v4971_v40, %v4973_v2  ;;  %v4968_v9 = vld [vmem:[#allocation3 + $0x50] sm:$0xff]  ;;  %v4967_v42 = vld [vmem:[#allocation3 + $0x18] sm:$0xff]  ;;  %v4814_v7 = vrot.slane %v6058_v0, %v7347_v24  ;;  %v4624_v8 = vld [vmem:[%s7798_s19] sm:$0xf] }
0x14cc   :  { %4879 = vmatprep.subr.bf16.mxu0 %v6064_v29  ;;  %4922 = vmatprep.subr.bf16.mxu1 %v6066_v11  ;;  %v6070_v26 = vcombine.high %v4966_v4, %v4968_v9  ;;  %v4969_v30 = vld [vmem:[#allocation3 + $0x58] sm:$0xff]  ;;  %v6069_v18 = vcombine.low %v4966_v4, %v4968_v9  ;;  %v4810_v62 = vrot.slane %v6058_v0, %v7351_v27 }
0x14cd   :  { %v6071_v31 = vcombine.low %v4967_v42, %v4969_v30  ;;  %v6072_v32 = vcombine.high %v4967_v42, %v4969_v30  ;;  %v4822_v1 = vrot.slane %v6058_v0, %v7349_v25  ;;  %v4818_v61 = vrot.slane %v6058_v0, %v7353_v28  ;;  %v4787_v30 = vld [vmem:[#allocation3] sm:$0xff] }
0x14ce   :  { %6056 = vmatmul.mubr.msk.bf16.vlgmr.msra.gmra.mxu0 %vm303_vm1, %v7642_v45  ;;  %6057 = vmatmul.mubr.msk.bf16.vlgmr.msra.gmra.mxu1 %vm303_vm1, %v7642_v45  ;;  %v4633_v5 = vrot.slane %v4624_v8, %v7347_v24  ;;  %v4641_v29 = vrot.slane %v4624_v8, %v7349_v25 }
0x14cf   :  { %4880 = vmatpush1.bf16.msra.mxu0 %v6063_v17  ;;  %4923 = vmatpush1.bf16.msra.mxu1 %v6065_v33 }
0x14d0   :  { %4881 = vmatprep.subr.bf16.mxu0 %v6060_v34  ;;  %4924 = vmatprep.subr.bf16.mxu1 %v6062_v35 }
0x14d1   :  { %4899 = vmatprep.mubr.bf16.mxu0 %v6921_v21  ;;  %4942 = vmatprep.mubr.bf16.mxu1 %v6921_v21 }
0x14d3   :  { %4882 = vmatpush1.bf16.msra.mxu0 %v6059_v51  ;;  %4925 = vmatpush1.bf16.msra.mxu1 %v6061_v36 }
0x14d4   :  { %5026 = vmatprep.subr.bf16.mxu0 %v6074_v44  ;;  %5067 = vmatprep.subr.bf16.mxu1 %v6076_v41 }
0x14d6   :  { %6067 = vmatmul.mubr.msk.bf16.vlgmr.msra.gmra.mxu0 %vm303_vm1, %v7642_v45  ;;  %6068 = vmatmul.mubr.msk.bf16.vlgmr.msra.gmra.mxu1 %vm303_vm1, %v7642_v45 }
0x14d7   :  { %5027 = vmatpush1.bf16.xpose.msra.mxu0 %v6073_v3  ;;  %5068 = vmatpush1.bf16.xpose.msra.mxu1 %v6075_v6 }
0x14d8   :  { %5028 = vmatprep.subr.bf16.mxu0 %v6070_v26  ;;  %5069 = vmatprep.subr.bf16.mxu1 %v6072_v32 }
0x14df   :  { %5029 = vmatpush1.bf16.xpose.msra.mxu0 %v6069_v18  ;;  %5070 = vmatpush1.bf16.xpose.msra.mxu1 %v6071_v31  ;;  %v4789_v18 = vld [vmem:[#allocation3 + $0x40] sm:$0xff] }
0x14e0   :  { %5148 = vmatprep.subr.bf16.mxu0 %v6082_v37  ;;  %5189 = vmatprep.subr.bf16.mxu1 %v6084_v20  ;;  %v4788_v20 = vld [vmem:[#allocation3 + $0x8] sm:$0xff] }
0x158e   :  { %v7670_v53 = vpop.f32.mrf.mxu0  ;;  %v7672_v54 = vpop.f32.mrf.mxu1 }
0x1590   :  { %v4725_v55 = vpop.f32.mrf.mxu0  ;;  %v4768_v14 = vpop.f32.mrf.mxu1 }
0x1591   :  { %v4726_v39 = vadd.f32 %v4725_v55, %v4633_v5  ;;  %v4769_v2 = vadd.f32 %v4768_v14, %v4641_v29  ;;  %v6078_v14 = vcombine.high %v4787_v30, %v4789_v18 }
0x1592   :  { %v7674_v16 = vpop.f32.mrf.mxu0  ;;  %v7676_v57 = vpop.f32.mrf.mxu1 }
0x1594   :  { %v4729_v58 = vpop.f32.mrf.mxu0  ;;  %v4772_v59 = vpop.f32.mrf.mxu1 }
0x1595   :  { %v4730_v22 = vadd.f32 %v4729_v58, %v4633_v5  ;;  %v4773_v35 = vadd.f32 %v4772_v59, %v4641_v29  ;;  %v4790_v58 = vld [vmem:[#allocation3 + $0x48] sm:$0xff]  ;;  %v4776_v59 = vmax.f32 %v4726_v39, 0.0  ;;  %v4637_v29 = vrot.slane %v4624_v8, %v7353_v28 }
0x1596   :  { %v4901_v60 = vpop.f32.mrf.mxu0  ;;  %v4944_v56 = vpop.f32.mrf.mxu1  ;;  %v5224_v5 = vld [vmem:[#allocation2 + $0xa8] sm:$0xff]  ;;  %v6079_v49 = vcombine.low %v4788_v20, %v4790_v58 }
0x1597   :  { %v4902_v23 = vadd.f32 %v4901_v60, %v4810_v62  ;;  %v4945_v51 = vadd.f32 %v4944_v56, %v4818_v61  ;;  %v4780_v4 = vmax.f32 %v4730_v22, 0.0  ;;  %v4782_v31 = vmax.f32 %v4773_v35, 0.0 }
0x1598   :  { %v4903_v63 = vpop.f32.mrf.mxu0  ;;  %v4946_v46 = vpop.f32.mrf.mxu1  ;;  %v4778_v60 = vmax.f32 %v4769_v2, 0.0  ;;  %v4771_v43 = vadd.f32 %v7676_v57, %v4637_v29  ;;  %v5394_v2 = vld [vmem:[#allocation3 + $0xa8] sm:$0xff] }
0x1599   :  { %v4904_v11 = vadd.f32 %v4903_v63, %v4814_v7  ;;  %v4947_v17 = vadd.f32 %v4946_v46, %v4822_v1  ;;  %v4953_v9 = vmax.f32 %v4902_v23, 0.0  ;;  %v4955_v32 = vmax.f32 %v4945_v51, 0.0  ;;  %v5219_v23 = vld [vmem:[#allocation2 + $0x20] sm:$0xff] }
0x159a   :  { %v4905_v47 = vpop.f32.mrf.mxu0  ;;  %v4948_v19 = vpop.f32.mrf.mxu1  ;;  %v4786_v63 = vpack.c.bf16 %v4782_v31, %v4778_v60  ;;  %v4629_v46 = vrot.slane %v4624_v8, %v7351_v27  ;;  %v4781_v22 = vmax.f32 %v4771_v43, 0.0  ;;  %v5221_v8 = vld [vmem:[#allocation2 + $0x60] sm:$0xff]  ;;  %v5392_v31 = vld [vmem:[#allocation3 + $0x68] sm:$0xff]  ;;  %v7716_v60 = vld [vmem:[#allocation2 + $0xf8] sm:$0xff] }
0x159b   :  { %v4906_v13 = vadd.f32 %v4905_v47, %v4810_v62  ;;  %v4949_v33 = vadd.f32 %v4948_v19, %v4818_v61  ;;  %v4954_v3 = vmax.f32 %v4904_v11, 0.0  ;;  %v4956_v42 = vmax.f32 %v4947_v17, 0.0  ;;  %v5225_v61 = vld [vmem:[#allocation2 + $0xe0] sm:$0xff]  ;;  %v5226_v47 = vld [vmem:[#allocation2 + $0xe8] sm:$0xff] }
0x159c   :  { %v4907_v34 = vpop.f32.mrf.mxu0  ;;  %v4950_v38 = vpop.f32.mrf.mxu1  ;;  %v6080_v62 = vcombine.high %v4788_v20, %v4790_v58  ;;  %v6077_v11 = vcombine.low %v4787_v30, %v4789_v18  ;;  %v4728_v10 = vadd.f32 %v7674_v16, %v4629_v46  ;;  %v6093_v50 = vcombine.high %v5224_v5, %v5226_v47  ;;  %v5222_v16 = vld [vmem:[#allocation2 + $0x68] sm:$0xff]  ;;  %v7708_v58 = vld [vmem:[#allocation2 + $0xb0] sm:$0xff] }
0x159d   :  { %v4908_v36 = vadd.f32 %v4907_v34, %v4814_v7  ;;  %v4957_v40 = vmax.f32 %v4906_v13, 0.0  ;;  %v4951_v44 = vadd.f32 %v4950_v38, %v4822_v1  ;;  %v4959_v6 = vmax.f32 %v4949_v33, 0.0  ;;  %v5223_v1 = vld [vmem:[#allocation2 + $0xa0] sm:$0xff]  ;;  %v5220_v33 = vld [vmem:[#allocation2 + $0x28] sm:$0xff] }
0x159e   :  { %v4784_v7 = vpack.c.bf16 %v4780_v4, %v4776_v59  ;;  %v4767_v13 = vadd.f32 %v7672_v54, %v4637_v29  ;;  %v4779_v19 = vmax.f32 %v4728_v10, 0.0  ;;  %v6090_v35 = vcombine.low %v5223_v1, %v5225_v61  ;;  %v5390_v30 = vld [vmem:[#allocation3 + $0x28] sm:$0xff]  ;;  %v7710_v59 = vld [vmem:[#allocation2 + $0xf0] sm:$0xff] }
0x159f   :  { %v4958_v41 = vmax.f32 %v4908_v36, 0.0  ;;  %v4960_v26 = vmax.f32 %v4951_v44, 0.0  ;;  %v4961_v0 = vpack.c.bf16 %v4957_v40, %v4953_v9  ;;  %v4963_v56 = vpack.c.bf16 %v4959_v6, %v4955_v32  ;;  %v5393_v40 = vld [vmem:[#allocation3 + $0xa0] sm:$0xff]  ;;  %v5396_v6 = vld [vmem:[#allocation3 + $0xe8] sm:$0xff] }
0x15a0   :  { %v4777_v34 = vmax.f32 %v4767_v13, 0.0  ;;  %v6092_v57 = vcombine.low %v5224_v5, %v5226_v47  ;;  %v6087_v36 = vcombine.high %v5219_v23, %v5221_v8  ;;  %v6086_v54 = vcombine.low %v5219_v23, %v5221_v8  ;;  %v5395_v44 = vld [vmem:[#allocation3 + $0xe0] sm:$0xff] }
0x15a1   :  { %v4962_v37 = vpack.c.bf16 %v4958_v41, %v4954_v3  ;;  %v4964_v55 = vpack.c.bf16 %v4960_v26, %v4956_v42  ;;  %v6088_v39 = vcombine.low %v5220_v33, %v5222_v16  ;;  %v6101_v3 = vcombine.high %v5393_v40, %v5395_v44  ;;  %v5389_v42 = vld [vmem:[#allocation3 + $0x20] sm:$0xff] }
0x15a2   :  { %v4785_v38 = vpack.c.bf16 %v4781_v22, %v4777_v34  ;;  %v6100_v41 = vcombine.low %v5393_v40, %v5395_v44  ;;  %v6102_v4 = vcombine.low %v5394_v2, %v5396_v6  ;;  %v6103_v9 = vcombine.high %v5394_v2, %v5396_v6  ;;  %v5391_v26 = vld [vmem:[#allocation3 + $0x60] sm:$0xff] }
0x15a3   :  { %5046 = vmatprep.mubr.bf16.mxu0 %v4962_v37  ;;  %5087 = vmatprep.mubr.bf16.mxu1 %v4964_v55  ;;  %v6097_v18 = vcombine.high %v5389_v42, %v5391_v26  ;;  %v6096_v32 = vcombine.low %v5389_v42, %v5391_v26  ;;  %v6098_v37 = vcombine.low %v5390_v30, %v5392_v31 }
0x15a4   :  { %5047 = vmatmul.mubr.bf16.vlgmr.msra.gmra.mxu0 %v4961_v0  ;;  %5088 = vmatmul.mubr.bf16.vlgmr.msra.gmra.mxu1 %v4963_v56  ;;  %v6099_v20 = vcombine.high %v5390_v30, %v5392_v31  ;;  %v7712_v0 = vld [vmem:[#allocation2 + $0xb8] sm:$0xff]  ;;  %v6110_v55 = vcombine.high %v7708_v58, %v7710_v59  ;;  %v6109_v56 = vcombine.low %v7708_v58, %v7710_v59  ;;  %v5696_v58 = vld [vmem:[#allocation3 + $0xb0] sm:$0xff] }
0x15a5   :  { %5149 = vmatpush1.bf16.xpose.msra.mxu0 %v6081_v15  ;;  %5190 = vmatpush1.bf16.xpose.msra.mxu1 %v6083_v52  ;;  %v6091_v15 = vcombine.high %v5223_v1, %v5225_v61  ;;  %v4724_v52 = vadd.f32 %v7670_v53, %v4629_v46  ;;  %v6089_v53 = vcombine.high %v5220_v33, %v5222_v16  ;;  %v6085_v16 = vld [vmem:[%s7798_s19 + $0x8] sm:$0xf]  ;;  %v5698_v59 = vld [vmem:[#allocation3 + $0xf0] sm:$0xff] }
0x15a6   :  { %5168 = vmatprep.mubr.bf16.mxu0 %v4784_v7  ;;  %5209 = vmatprep.mubr.bf16.mxu1 %v4786_v63  ;;  %v6112_v7 = vcombine.high %v7712_v0, %v7716_v60 }
0x15a7   :  { %5150 = vmatprep.subr.bf16.mxu0 %v6078_v14  ;;  %5191 = vmatprep.subr.bf16.mxu1 %v6080_v62  ;;  %v4775_v17 = vmax.f32 %v4724_v52, 0.0  ;;  %v6111_v14 = vcombine.low %v7712_v0, %v7716_v60  ;;  %v6120_v0 = vcombine.high %v5696_v58, %v5698_v59  ;;  %v5699_v60 = vld [vmem:[#allocation3 + $0xf8] sm:$0xff] }
0x15a9   :  { %v4783_v51 = vpack.c.bf16 %v4779_v19, %v4775_v17 }
0x15ad   :  { %5151 = vmatpush1.bf16.xpose.msra.mxu0 %v6077_v11  ;;  %5192 = vmatpush1.bf16.xpose.msra.mxu1 %v6079_v49 }
0x15ae   :  { %5302 = vmatprep.subr.bf16.mxu0 %v6091_v15  ;;  %5345 = vmatprep.subr.bf16.mxu1 %v6093_v50 }
0x15b4   :  { %5169 = vmatmul.mubr.bf16.vlgmr.msra.gmra.mxu0 %v4783_v51  ;;  %5210 = vmatmul.mubr.bf16.vlgmr.msra.gmra.mxu1 %v4785_v38  ;;  %v5237_v51 = vrot.slane %v6085_v16, %v7347_v24  ;;  %v5245_v38 = vrot.slane %v6085_v16, %v7349_v25 }
0x15b5   :  { %5303 = vmatpush1.bf16.msra.mxu0 %v6090_v35  ;;  %5346 = vmatpush1.bf16.msra.mxu1 %v6092_v57  ;;  %v5233_v57 = vrot.slane %v6085_v16, %v7351_v27 }
0x15b6   :  { %5304 = vmatprep.subr.bf16.mxu0 %v6087_v36  ;;  %5347 = vmatprep.subr.bf16.mxu1 %v6089_v53  ;;  %v5241_v53 = vrot.slane %v6085_v16, %v7353_v28 }
0x15b7   :  { %5322 = vmatprep.mubr.bf16.mxu0 %v6921_v21  ;;  %5365 = vmatprep.mubr.bf16.mxu1 %v6921_v21 }
0x15b9   :  { %5305 = vmatpush1.bf16.msra.mxu0 %v6086_v54  ;;  %5348 = vmatpush1.bf16.msra.mxu1 %v6088_v39 }
0x15ba   :  { %5449 = vmatprep.subr.bf16.mxu0 %v6101_v3  ;;  %5490 = vmatprep.subr.bf16.mxu1 %v6103_v9 }
0x15bc   :  { %6094 = vmatmul.mubr.msk.bf16.vlgmr.msra.gmra.mxu0 %vm303_vm1, %v7642_v45  ;;  %6095 = vmatmul.mubr.msk.bf16.vlgmr.msra.gmra.mxu1 %vm303_vm1, %v7642_v45 }
0x15bd   :  { %5450 = vmatpush1.bf16.xpose.msra.mxu0 %v6100_v41  ;;  %5491 = vmatpush1.bf16.xpose.msra.mxu1 %v6102_v4 }
0x15be   :  { %5451 = vmatprep.subr.bf16.mxu0 %v6097_v18  ;;  %5492 = vmatprep.subr.bf16.mxu1 %v6099_v20  ;;  %v5522_v20 = vld [vmem:[#allocation2 + $0x30] sm:$0xff] }
0x15c5   :  { %5452 = vmatpush1.bf16.xpose.msra.mxu0 %v6096_v32  ;;  %5493 = vmatpush1.bf16.xpose.msra.mxu1 %v6098_v37 }
0x15c6   :  { %5605 = vmatprep.subr.bf16.mxu0 %v6110_v55  ;;  %5648 = vmatprep.subr.bf16.mxu1 %v6112_v7  ;;  %v5524_v55 = vld [vmem:[#allocation2 + $0x70] sm:$0xff] }
0x1664   :  { %v5048_v62 = vpop.f32.mrf.mxu0  ;;  %v5089_v63 = vpop.f32.mrf.mxu1 }
0x1665   :  { %v5090_v1 = vadd.f32 %v5089_v63, %v5048_v62 }
0x1666   :  { %v5050_v61 = vpop.f32.mrf.mxu0  ;;  %v5091_v46 = vpop.f32.mrf.mxu1 }
0x1667   :  { %v5525_v61 = vld [vmem:[#allocation2 + $0x78] sm:$0xff] }
0x1668   :  { %v5051_v5 = vpop.f32.mrf.mxu0  ;;  %v5092_v47 = vpop.f32.mrf.mxu1 }
0x1669   :  { %v5093_v29 = vadd.f32 %v5092_v47, %v5051_v5 }
0x166a   :  { %v5053_v11 = vpop.f32.mrf.mxu0  ;;  %v5094_v10 = vpop.f32.mrf.mxu1 }
0x166b   :  { %v6106_v11 = vcombine.high %v5522_v20, %v5524_v55 }
0x1674   :  { %v5170_v49 = vpop.f32.mrf.mxu0  ;;  %v5211_v43 = vpop.f32.mrf.mxu1 }
0x1675   :  { %v5171_v15 = vadd.f32 %v5170_v49, %v5090_v1  ;;  %v5523_v1 = vld [vmem:[#allocation2 + $0x38] sm:$0xff] }
0x1676   :  { %v5172_v50 = vpop.f32.mrf.mxu0  ;;  %v5213_v13 = vpop.f32.mrf.mxu1  ;;  %v6108_v49 = vcombine.high %v5523_v1, %v5525_v61 }
0x1677   :  { %v7724_v52 = vadd.f32 %v5211_v43, %v5171_v15  ;;  %v6105_v15 = vcombine.low %v5522_v20, %v5524_v55  ;;  %v6107_v43 = vcombine.low %v5523_v1, %v5525_v61 }
0x1678   :  { %v5173_v19 = vpop.f32.mrf.mxu0  ;;  %v5214_v23 = vpop.f32.mrf.mxu1 }
0x1679   :  { %v5174_v22 = vadd.f32 %v5173_v19, %v5093_v29  ;;  %v5694_v19 = vld [vmem:[#allocation3 + $0x70] sm:$0xff] }
0x167a   :  { %v5175_v8 = vpop.f32.mrf.mxu0  ;;  %v5216_v33 = vpop.f32.mrf.mxu1 }
0x167b   :  { %v7726_v17 = vadd.f32 %v5214_v23, %v5174_v22  ;;  %v5693_v22 = vld [vmem:[#allocation3 + $0x38] sm:$0xff] }
0x167c   :  { %v5324_v34 = vpop.f32.mrf.mxu0  ;;  %v5367_v35 = vpop.f32.mrf.mxu1  ;;  %v5695_v8 = vld [vmem:[#allocation3 + $0x78] sm:$0xff] }
0x167d   :  { %v5325_v3 = vadd.f32 %v5324_v34, %v5233_v57  ;;  %v5368_v9 = vadd.f32 %v5367_v35, %v5241_v53  ;;  %v6117_v16 = vcombine.low %v5693_v22, %v5695_v8 }
0x167e   :  { %v5326_v36 = vpop.f32.mrf.mxu0  ;;  %v5369_v54 = vpop.f32.mrf.mxu1 }
0x167f   :  { %v5327_v40 = vadd.f32 %v5326_v36, %v5237_v51  ;;  %v5370_v6 = vadd.f32 %v5369_v54, %v5245_v38  ;;  %v5376_v7 = vmax.f32 %v5325_v3, 0.0  ;;  %v5378_v46 = vmax.f32 %v5368_v9, 0.0 }
0x1680   :  { %v5328_v39 = vpop.f32.mrf.mxu0  ;;  %v5371_v2 = vpop.f32.mrf.mxu1 }
0x1681   :  { %v5329_v44 = vadd.f32 %v5328_v39, %v5233_v57  ;;  %v5372_v41 = vadd.f32 %v5371_v2, %v5241_v53  ;;  %v5377_v31 = vmax.f32 %v5327_v40, 0.0  ;;  %v5379_v62 = vmax.f32 %v5370_v6, 0.0  ;;  %v6104_v2 = vld [vmem:[%s7798_s19 + $0xc] sm:$0xf] }
0x1682   :  { %v5330_v4 = vpop.f32.mrf.mxu0  ;;  %v5373_v26 = vpop.f32.mrf.mxu1  ;;  %v5536_v9 = vrot.slane %v6104_v2, %v7351_v27 }
0x1683   :  { %v5331_v42 = vadd.f32 %v5330_v4, %v5237_v51  ;;  %v5380_v30 = vmax.f32 %v5329_v44, 0.0  ;;  %v5374_v18 = vadd.f32 %v5373_v26, %v5245_v38  ;;  %v5382_v32 = vmax.f32 %v5372_v41, 0.0 }
0x1684   :  { %v5540_v4 = vrot.slane %v6104_v2, %v7347_v24  ;;  %v5544_v26 = vrot.slane %v6104_v2, %v7353_v28 }
0x1685   :  { %v5381_v37 = vmax.f32 %v5331_v42, 0.0  ;;  %v5383_v63 = vmax.f32 %v5374_v18, 0.0  ;;  %v5384_v47 = vpack.c.bf16 %v5380_v30, %v5376_v7  ;;  %v5386_v10 = vpack.c.bf16 %v5382_v32, %v5378_v46 }
0x1687   :  { %v5385_v5 = vpack.c.bf16 %v5381_v37, %v5377_v31  ;;  %v5387_v29 = vpack.c.bf16 %v5383_v63, %v5379_v62 }
0x1689   :  { %5469 = vmatprep.mubr.bf16.mxu0 %v5385_v5  ;;  %5510 = vmatprep.mubr.bf16.mxu1 %v5387_v29 }
0x168a   :  { %5470 = vmatmul.mubr.bf16.vlgmr.msra.gmra.mxu0 %v5384_v47  ;;  %5511 = vmatmul.mubr.bf16.vlgmr.msra.gmra.mxu1 %v5386_v10 }
0x168b   :  { %5606 = vmatpush1.bf16.msra.mxu0 %v6109_v56  ;;  %5649 = vmatpush1.bf16.msra.mxu1 %v6111_v14  ;;  %v5697_v56 = vld [vmem:[#allocation3 + $0xb8] sm:$0xff]  ;;  %v6119_v14 = vcombine.low %v5696_v58, %v5698_v59 }
0x168c   :  { %5607 = vmatprep.subr.bf16.mxu0 %v6106_v11  ;;  %5650 = vmatprep.subr.bf16.mxu1 %v6108_v49  ;;  %v6121_v50 = vcombine.low %v5697_v56, %v5699_v60  ;;  %v6122_v13 = vcombine.high %v5697_v56, %v5699_v60  ;;  %v6123_v60 = vld [vmem:[%s7800_s21] ss:$0 sm:$0xff] }
0x168d   :  { %5625 = vmatprep.mubr.bf16.mxu0 %v6921_v21  ;;  %5668 = vmatprep.mubr.bf16.mxu1 %v6921_v21  ;;  %v5692_v21 = vld [vmem:[#allocation3 + $0x30] sm:$0xff] }
0x168e   :  { %v6116_v23 = vcombine.high %v5692_v21, %v5694_v19  ;;  %v6115_v33 = vcombine.low %v5692_v21, %v5694_v19 }
0x168f   :  { %5608 = vmatpush1.bf16.msra.mxu0 %v6105_v15  ;;  %5651 = vmatpush1.bf16.msra.mxu1 %v6107_v43 }
0x1690   :  { %5752 = vmatprep.subr.bf16.mxu0 %v6120_v0  ;;  %5793 = vmatprep.subr.bf16.mxu1 %v6122_v13 }
0x1692   :  { %6113 = vmatmul.mubr.msk.bf16.vlgmr.msra.gmra.mxu0 %vm303_vm1, %v7642_v45  ;;  %6114 = vmatmul.mubr.msk.bf16.vlgmr.msra.gmra.mxu1 %vm303_vm1, %v7642_v45  ;;  %v6118_v45 = vcombine.high %v5693_v22, %v5695_v8 }
0x1693   :  { %5753 = vmatpush1.bf16.xpose.msra.mxu0 %v6119_v14  ;;  %5794 = vmatpush1.bf16.xpose.msra.mxu1 %v6121_v50 }
0x1694   :  { %5754 = vmatprep.subr.bf16.mxu0 %v6116_v23  ;;  %5795 = vmatprep.subr.bf16.mxu1 %v6118_v45 }
0x169b   :  { %5755 = vmatpush1.bf16.xpose.msra.mxu0 %v6115_v33  ;;  %5796 = vmatpush1.bf16.xpose.msra.mxu1 %v6117_v16 }
0x174a   :  { %v5471_v34 = vpop.f32.mrf.mxu0  ;;  %v5512_v35 = vpop.f32.mrf.mxu1 }
0x174b   :  { %v5513_v51 = vadd.f32 %v5512_v35, %v5471_v34 }
0x174c   :  { %v5473_v57 = vpop.f32.mrf.mxu0  ;;  %v5514_v36 = vpop.f32.mrf.mxu1 }
0x174d   :  { %v5519_v38 = vadd.f32 %v5513_v51, %v7724_v52  ;;  %v5548_v52 = vrot.slane %v6104_v2, %v7349_v25 }
0x174e   :  { %v5474_v53 = vpop.f32.mrf.mxu0  ;;  %v5515_v54 = vpop.f32.mrf.mxu1 }
0x174f   :  { %v5516_v39 = vadd.f32 %v5515_v54, %v5474_v53 }
0x1750   :  { %v5476_v40 = vpop.f32.mrf.mxu0  ;;  %v5517_v44 = vpop.f32.mrf.mxu1 }
0x1751   :  { %v5520_v3 = vadd.f32 %v5516_v39, %v7726_v17 }
0x1752   :  { %v5627_v6 = vpop.f32.mrf.mxu0  ;;  %v5670_v41 = vpop.f32.mrf.mxu1 }
0x1753   :  { %v5628_v20 = vadd.f32 %v5627_v6, %v5536_v9  ;;  %v5671_v62 = vadd.f32 %v5670_v41, %v5544_v26 }
0x1754   :  { %v5629_v42 = vpop.f32.mrf.mxu0  ;;  %v5672_v30 = vpop.f32.mrf.mxu1 }
0x1755   :  { %v5630_v31 = vadd.f32 %v5629_v42, %v5540_v4  ;;  %v5673_v55 = vadd.f32 %v5672_v30, %v5548_v52  ;;  %v5679_v25 = vmax.f32 %v5628_v20, 0.0  ;;  %v5681_v29 = vmax.f32 %v5671_v62, 0.0  ;;  %v6124_v42 = vld [vmem:[%s7803_s24] ss:$0 sm:$0xff] }
0x1756   :  { %v5631_v18 = vpop.f32.mrf.mxu0  ;;  %v5674_v37 = vpop.f32.mrf.mxu1 }
0x1757   :  { %v5632_v32 = vadd.f32 %v5631_v18, %v5536_v9  ;;  %v5675_v7 = vadd.f32 %v5674_v37, %v5544_v26  ;;  %v5680_v27 = vmax.f32 %v5630_v31, 0.0  ;;  %v5682_v47 = vmax.f32 %v5673_v55, 0.0  ;;  %v6125_v26 = vld [vmem:[%s7804_s25] ss:$0 sm:$0xff] }
0x1758   :  { %v5633_v17 = vpop.f32.mrf.mxu0  ;;  %v5676_v1 = vpop.f32.mrf.mxu1 }
0x1759   :  { %v5634_v63 = vadd.f32 %v5633_v17, %v5540_v4  ;;  %v5683_v24 = vmax.f32 %v5632_v32, 0.0  ;;  %v5677_v61 = vadd.f32 %v5676_v1, %v5548_v52  ;;  %v5685_v46 = vmax.f32 %v5675_v7, 0.0 }
0x175b   :  { %v5684_v5 = vmax.f32 %v5634_v63, 0.0  ;;  %v5686_v28 = vmax.f32 %v5677_v61, 0.0  ;;  %v5687_v10 = vpack.c.bf16 %v5683_v24, %v5679_v25  ;;  %v5689_v15 = vpack.c.bf16 %v5685_v46, %v5681_v29 }
0x175d   :  { %v5688_v11 = vpack.c.bf16 %v5684_v5, %v5680_v27  ;;  %v5690_v49 = vpack.c.bf16 %v5686_v28, %v5682_v47 }
0x175f   :  { %5772 = vmatprep.mubr.bf16.mxu0 %v5688_v11  ;;  %5813 = vmatprep.mubr.bf16.mxu1 %v5690_v49 }
0x1760   :  { %5773 = vmatmul.mubr.bf16.vlgmr.msra.gmra.mxu0 %v5687_v10  ;;  %5814 = vmatmul.mubr.bf16.vlgmr.msra.gmra.mxu1 %v5689_v15 }
0x1820   :  { %v5774_v43 = vpop.f32.mrf.mxu0  ;;  %v5815_v58 = vpop.f32.mrf.mxu1 }
0x1821   :  { %v5816_v59 = vadd.f32 %v5815_v58, %v5774_v43 }
0x1822   :  { %v5776_v56 = vpop.f32.mrf.mxu0  ;;  %v5817_v0 = vpop.f32.mrf.mxu1 }
0x1823   :  { %v5822_v14 = vadd.f32 %v5816_v59, %v5519_v38 }
0x1824   :  { %v5777_v50 = vpop.f32.mrf.mxu0  ;;  %v5818_v13 = vpop.f32.mrf.mxu1 }
0x1825   :  { %v5819_v21 = vadd.f32 %v5818_v13, %v5777_v50  ;;  %v5830_v22 = vadd.f32 %v6123_v60, %v5822_v14 }
0x1826   :  { %v5779_v19 = vpop.f32.mrf.mxu0  ;;  %v5820_v23 = vpop.f32.mrf.mxu1 }
0x1827   :  { %v5823_v8 = vadd.f32 %v5819_v21, %v5520_v3  ;;  %v5832_v33 = vadd.f32 %v5830_v22, %v7634_v12 }
0x1829   :  { %v5836_v16 = vsel %vm303_vm1, %v5832_v33, 0.0  ;;  %v5831_v45 = vadd.f32 %v6123_v60, %v5823_v8 }
0x182a   :  { %5837 = vadd.xlane.f32.xlu0 %v5836_v16 }
0x182b   :  { %v5833_v34 = vadd.f32 %v5831_v45, %v7636_v48 }
0x182d   :  { %v5839_v35 = vsel %vm303_vm1, %v5833_v34, 0.0 }
0x182e   :  { %5840 = vadd.xlane.f32.xlu0 %v5839_v35 }
0x18b3   :  { %v5838_v51 = vpop.xlane.xlu0 %5837 }
0x18b4   :  { %v5842_v57 = vmul.f32 0.03125, %v5838_v51 }
0x18b6   :  { %v5844_v36 = vsub.f32 %v5832_v33, %v5842_v57 }
0x18b7   :  { %v5841_v38 = vpop.xlane.xlu0 %5840 }
0x18b8   :  { %v5843_v53 = vmul.f32 0.03125, %v5841_v38  ;;  %v5846_v54 = vmul.f32 %v5844_v36, %v5844_v36 }
0x18ba   :  { %v5845_v39 = vsub.f32 %v5833_v34, %v5843_v53  ;;  %v5848_v40 = vsel %vm303_vm1, %v5846_v54, 0.0 }
0x18bb   :  { %5849 = vadd.xlane.f32.xlu1 %v5848_v40 }
0x18bc   :  { %v5847_v12 = vmul.f32 %v5845_v39, %v5845_v39 }
0x18be   :  { %v5851_v44 = vsel %vm303_vm1, %v5847_v12, 0.0 }
0x18bf   :  { %5852 = vadd.xlane.f32.xlu1 %v5851_v44 }
0x1944   :  { %v5850_v2 = vpop.xlane.xlu1 %5849 }
0x1945   :  { %v5854_v3 = vmul.f32 0.03125, %v5850_v2 }
0x1947   :  { %v5856_v48 = vadd.f32 1e-05, %v5854_v3 }
0x1948   :  { %v5853_v6 = vpop.xlane.xlu1 %5852 }
0x1949   :  { %6545 = vrsqrt.f32 %v5856_v48  ;;  %v5855_v41 = vmul.f32 0.03125, %v5853_v6 }
0x194b   :  { %v5857_v4 = vadd.f32 1e-05, %v5855_v41 }
0x194d   :  { %6547 = vrsqrt.f32 %v5857_v4 }
0x1956   :  { %v6546_v9 = vpop.eup %6545 }
0x1957   :  { %v5860_v52 = vmul.f32 %v6546_v9, %v5844_v36 }
0x1959   :  { %v5868_v30 = vmul.f32 %v6124_v42, %v5860_v52 }
0x195a   :  { %v6548_v18 = vpop.eup %6547 }
0x195b   :  { %v5876_v31 = vadd.f32 %v6125_v26, %v5868_v30  ;;  %v5861_v32 = vmul.f32 %v6548_v18, %v5845_v39 }
0x195d   :  { %5878 = vst.msk [vmem:[%s7835_s28] sm:$0xff] %vm303_vm1, %v5876_v31  ;;  %v5869_v37 = vmul.f32 %v6124_v42, %v5861_v32 }
0x195f   :  { %v5877_v20 = vadd.f32 %v6125_v26, %v5869_v37 }
0x1961   :  { %5879 = vst.msk [vmem:[%s7835_s28 + $0x8] sm:$0xff] %vm303_vm1, %v5877_v20 }
0x1962   :  { %5884 = vsyncpa [#allocation6], 1 }
0x1963   :  { %5885 = vsyncpa [#allocation8], 1 }
0x1964   :  { %5886 = vsyncpa [#allocation11], 1 }
0x1965   :  { %5887 = vsyncpa [#allocation14], 1 }
0x1966   :  { %5888 = vsyncpa [#allocation17], 1 }
0x1967   :  { %5889 = vsyncpa [#allocation20], 1 }
0x1968   :  { %5890 = vsyncpa [#allocation23], 1 }
0x1969   :  { %5891 = vsyncpa [#allocation26], 1 }
0x196a   :  { %5892 = vsyncmov [#allocation4] }
0x196d   :  { %s5893_s24 = vpop.sfrf %5892 }
0x196e   :  { %p6126_p10 = scmp.ne.s32.totalorder %s5893_s24, 0 }
0x1970   :  { %5897 = shalt.err (%p6126_p10)  }
0x1971   :  { %5899 = vsyncmov [#allocation4 + $0x1] }
0x1974   :  { %s5900_s25 = vpop.sfrf %5899 }
0x1975   :  { %p6127_p11 = scmp.ne.s32.totalorder %s5900_s25, 0 }
0x1977   :  { %5904 = shalt.err (%p6127_p11)  }

</bundles_post_ra>
